<compile_context>
chip_gen: v7x
topology: tpu7x:2x2x1
jax: 0.10.0
libtpu: 0.0.40
codegen_flags: <defaults>
</compile_context>

<pallas_src>
import jax
import jax.numpy as jnp
from jax import lax
from jax.experimental import pallas as pl
from jax.experimental.pallas import tpu as pltpu

BIGNET_DIM = 256          # small synthetic BIGNET_DIM (divisible by 2*GROUP_SIZE and 128)
GROUP_SIZE = 16
LN_EPS = 1e-5             # torch.nn.LayerNorm default
BATCH = 16                # 16 rows -> bf16-sublane-complete, 2 batch tiles
BATCH_TILE = 8

N_BLOCKS = 6
N_LIN = N_BLOCKS * 3      # 18 Linear4Bit layers
N_LN = N_BLOCKS - 1       # 5 LayerNorms


# ----------------------------------------------------------------------------
# Fused Pallas kernel: the entire BigNet4Bit forward in one launch.
# All weights / biases / LN params are full-extent VMEM blocks; the grid only
# tiles the batch dimension ("parallel" -> sharded across TCs on v7x).
# ----------------------------------------------------------------------------
def _bignet_fused_kernel(x_ref, w_ref, bias_ref, lng_ref, lnb_ref, o_ref):
    dn = (((1,), (0,)), ((), ()))      # ordinary (B,K)@(K,N) contraction

    def linear(h, li, relu):
        # Weights are pre-dequantized bf16 W^T -> single MXU matmul, f32 acc.
        acc = lax.dot_general(h.astype(jnp.bfloat16), w_ref[li], dn,
                              preferred_element_type=jnp.float32)
        acc = acc + bias_ref[li]                   # (1, D) broadcast, f32
        if relu:
            acc = jnp.maximum(acc, 0.0)
        return acc

    def layer_norm(h, ni):
        mu = jnp.mean(h, axis=-1, keepdims=True)
        xc = h - mu
        var = jnp.mean(xc * xc, axis=-1, keepdims=True)   # biased var (torch LN)
        return xc * lax.rsqrt(var + LN_EPS) * lng_ref[ni] + lnb_ref[ni]

    h = x_ref[...]                                 # (BATCH_TILE, D) f32
    li = 0
    for blk in range(N_BLOCKS):
        y = linear(h, li + 0, relu=True)
        y = linear(y, li + 1, relu=True)
        h = linear(y, li + 2, relu=False) + h      # Block residual (f32)
        li += 3
        if blk < N_BLOCKS - 1:
            h = layer_norm(h, blk)
    o_ref[...] = h


# ----------------------------------------------------------------------------
# Wrapper: one pallas_call, one jit dispatch.
# ----------------------------------------------------------------------------
@jax.jit
def bignet4bit_forward(x, params):
    B, D = x.shape
    n_tiles = B // BATCH_TILE
    return pl.pallas_call(
        _bignet_fused_kernel,
        out_shape=jax.ShapeDtypeStruct((B, D), jnp.float32),
        grid=(n_tiles,),
        in_specs=[
            pl.BlockSpec((BATCH_TILE, D), lambda i: (i, 0)),       # activation tile
            pl.BlockSpec((N_LIN, D, D), lambda i: (0, 0, 0)),      # bf16 W^T (all layers)
            pl.BlockSpec((N_LIN, 1, D), lambda i: (0, 0, 0)),      # biases
            pl.BlockSpec((N_LN, 1, D), lambda i: (0, 0, 0)),       # LN gamma
            pl.BlockSpec((N_LN, 1, D), lambda i: (0, 0, 0)),       # LN beta
        ],
        out_specs=pl.BlockSpec((BATCH_TILE, D), lambda i: (i, 0)),
        compiler_params=pltpu.CompilerParams(
            dimension_semantics=("parallel",),     # batch tiles -> v7x 2-TC sharding
            vmem_limit_bytes=16 * 1024 * 1024,
        ),
    )(x, params["w"], params["bias"], params["ln_gamma"], params["ln_beta"])


# ----------------------------------------------------------------------------
# Host-side parameter construction.
# Replicates block_quantize_4bit (int 0..15 per group, fp16 group scale) and
# block_dequantize_4bit (q/15*2*norm - norm with f32 norm from fp16), then
# stores the dequantized weight transposed in bf16 for the kernel.
# ----------------------------------------------------------------------------
def quantize_dequantize_4bit(w):
    """Return (w_deq_f32, w_deq_T_bf16) matching the module's dequant math."""
    out_f, in_f = w.shape
    flat = w.reshape(-1, GROUP_SIZE)
    norm = jnp.max(jnp.abs(flat), axis=-1, keepdims=True)
    # Guard all-zero groups (original would produce 0/0); q=0, norm=0 -> w_deq=0,
    # identical for kernel and reference, so semantics are unchanged.
    norm_safe = jnp.maximum(norm, 1e-8)
    q = jnp.round((flat + norm) / (2.0 * norm_safe) * 15.0)           # 0..15
    norm32 = norm.astype(jnp.float16).astype(jnp.float32)             # fp16 storage roundtrip
    w_deq = (q / 15.0 * 2.0 * norm32 - norm32).reshape(out_f, in_f)   # f32 dequant
    return w_deq, w_deq.T.astype(jnp.bfloat16)


def init_bignet4bit(key):
    keys = jax.random.split(key, N_LIN * 2)
    bound = 1.0 / (BIGNET_DIM ** 0.5)
    w_ts, biases, w_deqs = [], [], []
    for i in range(N_LIN):
        kw, kb = keys[2 * i], keys[2 * i + 1]
        w = jax.random.uniform(kw, (BIGNET_DIM, BIGNET_DIM), jnp.float32, -bound, bound)
        b = jax.random.uniform(kb, (BIGNET_DIM,), jnp.float32, -bound, bound)
        w_deq, w_t_bf16 = quantize_dequantize_4bit(w)
        w_ts.append(w_t_bf16)
        biases.append(b)
        w_deqs.append(w_deq)

    params = {
        "w": jnp.stack(w_ts),                               # (18, D, D) bf16, W^T
        "bias": jnp.stack(biases)[:, None, :],              # (18, 1, D) f32
        "ln_gamma": jnp.ones((N_LN, 1, BIGNET_DIM), jnp.float32),
        "ln_beta": jnp.zeros((N_LN, 1, BIGNET_DIM), jnp.float32),
    }
    ref = {
        "w_deq": jnp.stack(w_deqs),                         # (18, D, D) f32
        "bias": jnp.stack(biases),                          # (18, D)
        "ln_gamma": params["ln_gamma"][:, 0],               # (5, D)
        "ln_beta": params["ln_beta"][:, 0],
    }
    return params, ref


# ----------------------------------------------------------------------------
# Pure-JAX reference (f32 dequantized weights, HIGHEST-precision matmuls
# = the PyTorch module math in float32).
# ----------------------------------------------------------------------------
def _mm(a, b):
    return jnp.dot(a, b, precision=jax.lax.Precision.HIGHEST)


def ref_forward(x, ref):
    h = x
    li = 0
    for blk in range(N_BLOCKS):
        w0, w1, w2 = ref["w_deq"][li], ref["w_deq"][li + 1], ref["w_deq"][li + 2]
        b0, b1, b2 = ref["bias"][li], ref["bias"][li + 1], ref["bias"][li + 2]
        y = jnp.maximum(_mm(h, w0.T) + b0, 0.0)
        y = jnp.maximum(_mm(y, w1.T) + b1, 0.0)
        h = _mm(y, w2.T) + b2 + h
        li += 3
        if blk < N_BLOCKS - 1:
            g, be = ref["ln_gamma"][blk], ref["ln_beta"][blk]
            mu = jnp.mean(h, axis=-1, keepdims=True)
            var = jnp.mean((h - mu) ** 2, axis=-1, keepdims=True)
            h = (h - mu) / jnp.sqrt(var + LN_EPS) * g + be
    return h


if __name__ == "__main__":
    key = jax.random.PRNGKey(0)
    k_params, k_x = jax.random.split(key)
    params, ref = init_bignet4bit(k_params)
    x = jax.random.normal(k_x, (BATCH, BIGNET_DIM), jnp.float32)

    out = jax.block_until_ready(bignet4bit_forward(x, params))
    expected = jax.block_until_ready(ref_forward(x, ref))

    max_diff = float(jnp.max(jnp.abs(out - expected)))
    assert out.shape == (BATCH, BIGNET_DIM) and out.dtype == jnp.float32
    assert max_diff < 0.1, f"kernel/reference mismatch: {max_diff}"
    print("KERNEL_OK")
</pallas_src>

<mosaic_0001>
module attributes {stable_mosaic.version = 11 : i64} {
  func.func @_bignet_fused_kernel(%arg0: i32, %arg1: memref<8x256xf32, #tpu.memory_space<vmem>>, %arg2: memref<18x256x256xbf16, #tpu.memory_space<vmem>>, %arg3: memref<18x1x256xf32, #tpu.memory_space<vmem>>, %arg4: memref<5x1x256xf32, #tpu.memory_space<vmem>>, %arg5: memref<5x1x256xf32, #tpu.memory_space<vmem>>, %arg6: memref<8x256xf32, #tpu.memory_space<vmem>>) attributes {dimension_semantics = [#tpu.dimension_semantics<parallel>], iteration_bounds = array<i64: 2>, scalar_prefetch = 0 : i64, scratch_operands = 0 : i64, tpu.core_type = #tpu.core_type<tc>, window_params = [{transform_indices = @transform_0, window_bounds = array<i64: 8, 256>}, {pipeline_mode = #tpu.pipeline_mode<synchronous>, transform_indices = @transform_1, window_bounds = array<i64: 18, 256, 256>}, {pipeline_mode = #tpu.pipeline_mode<synchronous>, transform_indices = @transform_2, window_bounds = array<i64: 18, 1, 256>}, {pipeline_mode = #tpu.pipeline_mode<synchronous>, transform_indices = @transform_3, window_bounds = array<i64: 5, 1, 256>}, {pipeline_mode = #tpu.pipeline_mode<synchronous>, transform_indices = @transform_4, window_bounds = array<i64: 5, 1, 256>}, {transform_indices = @transform_5, window_bounds = array<i64: 8, 256>}]} {
    %c0 = arith.constant 0 : index
    %c0_0 = arith.constant 0 : index
    %0 = vector.load %arg1[%c0, %c0_0] : memref<8x256xf32, #tpu.memory_space<vmem>>, vector<8x256xf32>
    %1 = arith.truncf %0 : vector<8x256xf32> to vector<8x256xbf16>
    %c0_1 = arith.constant 0 : index
    %c0_2 = arith.constant 0 : index
    %c0_3 = arith.constant 0 : index
    %2 = vector.load %arg2[%c0_1, %c0_2, %c0_3] : memref<18x256x256xbf16, #tpu.memory_space<vmem>>, vector<1x256x256xbf16>
    %3 = vector.shape_cast %2 : vector<1x256x256xbf16> to vector<256x256xbf16>
    %cst = arith.constant dense<0.000000e+00> : vector<8x256xf32>
    %4 = tpu.matmul %1, %3, %cst {dimension_numbers = #tpu.dot_dimension_numbers<[1], [0], [0], [1], [0, 0, 1, 1], [], []>} : vector<8x256xbf16>, vector<256x256xbf16>, vector<8x256xf32> -> vector<8x256xf32>
    %c0_4 = arith.constant 0 : index
    %c0_5 = arith.constant 0 : index
    %c0_6 = arith.constant 0 : index
    %5 = vector.load %arg3[%c0_4, %c0_5, %c0_6] : memref<18x1x256xf32, #tpu.memory_space<vmem>>, vector<1x1x256xf32>
    %6 = vector.shape_cast %5 : vector<1x1x256xf32> to vector<1x256xf32>
    %7 = vector.broadcast %6 : vector<1x256xf32> to vector<8x256xf32>
    %8 = arith.addf %4, %7 : vector<8x256xf32>
    %cst_7 = arith.constant 0.000000e+00 : f32
    %9 = vector.broadcast %cst_7 : f32 to vector<8x256xf32>
    %10 = arith.maximumf %8, %9 : vector<8x256xf32>
    %11 = arith.truncf %10 : vector<8x256xf32> to vector<8x256xbf16>
    %c1 = arith.constant 1 : index
    %c0_8 = arith.constant 0 : index
    %c0_9 = arith.constant 0 : index
    %12 = vector.load %arg2[%c1, %c0_8, %c0_9] : memref<18x256x256xbf16, #tpu.memory_space<vmem>>, vector<1x256x256xbf16>
    %13 = vector.shape_cast %12 : vector<1x256x256xbf16> to vector<256x256xbf16>
    %cst_10 = arith.constant dense<0.000000e+00> : vector<8x256xf32>
    %14 = tpu.matmul %11, %13, %cst_10 {dimension_numbers = #tpu.dot_dimension_numbers<[1], [0], [0], [1], [0, 0, 1, 1], [], []>} : vector<8x256xbf16>, vector<256x256xbf16>, vector<8x256xf32> -> vector<8x256xf32>
    %c1_11 = arith.constant 1 : index
    %c0_12 = arith.constant 0 : index
    %c0_13 = arith.constant 0 : index
    %15 = vector.load %arg3[%c1_11, %c0_12, %c0_13] : memref<18x1x256xf32, #tpu.memory_space<vmem>>, vector<1x1x256xf32>
    %16 = vector.shape_cast %15 : vector<1x1x256xf32> to vector<1x256xf32>
    %17 = vector.broadcast %16 : vector<1x256xf32> to vector<8x256xf32>
    %18 = arith.addf %14, %17 : vector<8x256xf32>
    %cst_14 = arith.constant 0.000000e+00 : f32
    %19 = vector.broadcast %cst_14 : f32 to vector<8x256xf32>
    %20 = arith.maximumf %18, %19 : vector<8x256xf32>
    %21 = arith.truncf %20 : vector<8x256xf32> to vector<8x256xbf16>
    %c2 = arith.constant 2 : index
    %c0_15 = arith.constant 0 : index
    %c0_16 = arith.constant 0 : index
    %22 = vector.load %arg2[%c2, %c0_15, %c0_16] : memref<18x256x256xbf16, #tpu.memory_space<vmem>>, vector<1x256x256xbf16>
    %23 = vector.shape_cast %22 : vector<1x256x256xbf16> to vector<256x256xbf16>
    %cst_17 = arith.constant dense<0.000000e+00> : vector<8x256xf32>
    %24 = tpu.matmul %21, %23, %cst_17 {dimension_numbers = #tpu.dot_dimension_numbers<[1], [0], [0], [1], [0, 0, 1, 1], [], []>} : vector<8x256xbf16>, vector<256x256xbf16>, vector<8x256xf32> -> vector<8x256xf32>
    %c2_18 = arith.constant 2 : index
    %c0_19 = arith.constant 0 : index
    %c0_20 = arith.constant 0 : index
    %25 = vector.load %arg3[%c2_18, %c0_19, %c0_20] : memref<18x1x256xf32, #tpu.memory_space<vmem>>, vector<1x1x256xf32>
    %26 = vector.shape_cast %25 : vector<1x1x256xf32> to vector<1x256xf32>
    %27 = vector.broadcast %26 : vector<1x256xf32> to vector<8x256xf32>
    %28 = arith.addf %24, %27 : vector<8x256xf32>
    %29 = arith.addf %28, %0 : vector<8x256xf32>
    %cst_21 = arith.constant dense<0.000000e+00> : vector<8xf32>
    %30 = vector.multi_reduction <add>, %29, %cst_21 [1] : vector<8x256xf32> to vector<8xf32>
    %31 = vector.shape_cast %30 : vector<8xf32> to vector<8x1xf32>
    %cst_22 = arith.constant 2.560000e+02 : f32
    %32 = vector.broadcast %cst_22 : f32 to vector<8x1xf32>
    %33 = arith.divf %31, %32 : vector<8x1xf32>
    %34 = vector.broadcast %33 : vector<8x1xf32> to vector<8x256xf32>
    %35 = arith.subf %29, %34 : vector<8x256xf32>
    %36 = arith.mulf %35, %35 : vector<8x256xf32>
    %cst_23 = arith.constant dense<0.000000e+00> : vector<8xf32>
    %37 = vector.multi_reduction <add>, %36, %cst_23 [1] : vector<8x256xf32> to vector<8xf32>
    %38 = vector.shape_cast %37 : vector<8xf32> to vector<8x1xf32>
    %cst_24 = arith.constant 2.560000e+02 : f32
    %39 = vector.broadcast %cst_24 : f32 to vector<8x1xf32>
    %40 = arith.divf %38, %39 : vector<8x1xf32>
    %cst_25 = arith.constant 9.99999974E-6 : f32
    %41 = vector.broadcast %cst_25 : f32 to vector<8x1xf32>
    %42 = arith.addf %40, %41 : vector<8x1xf32>
    %43 = math.rsqrt %42 : vector<8x1xf32>
    %44 = vector.broadcast %43 : vector<8x1xf32> to vector<8x256xf32>
    %45 = arith.mulf %35, %44 : vector<8x256xf32>
    %c0_26 = arith.constant 0 : index
    %c0_27 = arith.constant 0 : index
    %c0_28 = arith.constant 0 : index
    %46 = vector.load %arg4[%c0_26, %c0_27, %c0_28] : memref<5x1x256xf32, #tpu.memory_space<vmem>>, vector<1x1x256xf32>
    %47 = vector.shape_cast %46 : vector<1x1x256xf32> to vector<1x256xf32>
    %48 = vector.broadcast %47 : vector<1x256xf32> to vector<8x256xf32>
    %49 = arith.mulf %45, %48 : vector<8x256xf32>
    %c0_29 = arith.constant 0 : index
    %c0_30 = arith.constant 0 : index
    %c0_31 = arith.constant 0 : index
    %50 = vector.load %arg5[%c0_29, %c0_30, %c0_31] : memref<5x1x256xf32, #tpu.memory_space<vmem>>, vector<1x1x256xf32>
    %51 = vector.shape_cast %50 : vector<1x1x256xf32> to vector<1x256xf32>
    %52 = vector.broadcast %51 : vector<1x256xf32> to vector<8x256xf32>
    %53 = arith.addf %49, %52 : vector<8x256xf32>
    %54 = arith.truncf %53 : vector<8x256xf32> to vector<8x256xbf16>
    %c3 = arith.constant 3 : index
    %c0_32 = arith.constant 0 : index
    %c0_33 = arith.constant 0 : index
    %55 = vector.load %arg2[%c3, %c0_32, %c0_33] : memref<18x256x256xbf16, #tpu.memory_space<vmem>>, vector<1x256x256xbf16>
    %56 = vector.shape_cast %55 : vector<1x256x256xbf16> to vector<256x256xbf16>
    %cst_34 = arith.constant dense<0.000000e+00> : vector<8x256xf32>
    %57 = tpu.matmul %54, %56, %cst_34 {dimension_numbers = #tpu.dot_dimension_numbers<[1], [0], [0], [1], [0, 0, 1, 1], [], []>} : vector<8x256xbf16>, vector<256x256xbf16>, vector<8x256xf32> -> vector<8x256xf32>
    %c3_35 = arith.constant 3 : index
    %c0_36 = arith.constant 0 : index
    %c0_37 = arith.constant 0 : index
    %58 = vector.load %arg3[%c3_35, %c0_36, %c0_37] : memref<18x1x256xf32, #tpu.memory_space<vmem>>, vector<1x1x256xf32>
    %59 = vector.shape_cast %58 : vector<1x1x256xf32> to vector<1x256xf32>
    %60 = vector.broadcast %59 : vector<1x256xf32> to vector<8x256xf32>
    %61 = arith.addf %57, %60 : vector<8x256xf32>
    %cst_38 = arith.constant 0.000000e+00 : f32
    %62 = vector.broadcast %cst_38 : f32 to vector<8x256xf32>
    %63 = arith.maximumf %61, %62 : vector<8x256xf32>
    %64 = arith.truncf %63 : vector<8x256xf32> to vector<8x256xbf16>
    %c4 = arith.constant 4 : index
    %c0_39 = arith.constant 0 : index
    %c0_40 = arith.constant 0 : index
    %65 = vector.load %arg2[%c4, %c0_39, %c0_40] : memref<18x256x256xbf16, #tpu.memory_space<vmem>>, vector<1x256x256xbf16>
    %66 = vector.shape_cast %65 : vector<1x256x256xbf16> to vector<256x256xbf16>
    %cst_41 = arith.constant dense<0.000000e+00> : vector<8x256xf32>
    %67 = tpu.matmul %64, %66, %cst_41 {dimension_numbers = #tpu.dot_dimension_numbers<[1], [0], [0], [1], [0, 0, 1, 1], [], []>} : vector<8x256xbf16>, vector<256x256xbf16>, vector<8x256xf32> -> vector<8x256xf32>
    %c4_42 = arith.constant 4 : index
    %c0_43 = arith.constant 0 : index
    %c0_44 = arith.constant 0 : index
    %68 = vector.load %arg3[%c4_42, %c0_43, %c0_44] : memref<18x1x256xf32, #tpu.memory_space<vmem>>, vector<1x1x256xf32>
    %69 = vector.shape_cast %68 : vector<1x1x256xf32> to vector<1x256xf32>
    %70 = vector.broadcast %69 : vector<1x256xf32> to vector<8x256xf32>
    %71 = arith.addf %67, %70 : vector<8x256xf32>
    %cst_45 = arith.constant 0.000000e+00 : f32
    %72 = vector.broadcast %cst_45 : f32 to vector<8x256xf32>
    %73 = arith.maximumf %71, %72 : vector<8x256xf32>
    %74 = arith.truncf %73 : vector<8x256xf32> to vector<8x256xbf16>
    %c5 = arith.constant 5 : index
    %c0_46 = arith.constant 0 : index
    %c0_47 = arith.constant 0 : index
    %75 = vector.load %arg2[%c5, %c0_46, %c0_47] : memref<18x256x256xbf16, #tpu.memory_space<vmem>>, vector<1x256x256xbf16>
    %76 = vector.shape_cast %75 : vector<1x256x256xbf16> to vector<256x256xbf16>
    %cst_48 = arith.constant dense<0.000000e+00> : vector<8x256xf32>
    %77 = tpu.matmul %74, %76, %cst_48 {dimension_numbers = #tpu.dot_dimension_numbers<[1], [0], [0], [1], [0, 0, 1, 1], [], []>} : vector<8x256xbf16>, vector<256x256xbf16>, vector<8x256xf32> -> vector<8x256xf32>
    %c5_49 = arith.constant 5 : index
    %c0_50 = arith.constant 0 : index
    %c0_51 = arith.constant 0 : index
    %78 = vector.load %arg3[%c5_49, %c0_50, %c0_51] : memref<18x1x256xf32, #tpu.memory_space<vmem>>, vector<1x1x256xf32>
    %79 = vector.shape_cast %78 : vector<1x1x256xf32> to vector<1x256xf32>
    %80 = vector.broadcast %79 : vector<1x256xf32> to vector<8x256xf32>
    %81 = arith.addf %77, %80 : vector<8x256xf32>
    %82 = arith.addf %81, %53 : vector<8x256xf32>
    %cst_52 = arith.constant dense<0.000000e+00> : vector<8xf32>
    %83 = vector.multi_reduction <add>, %82, %cst_52 [1] : vector<8x256xf32> to vector<8xf32>
    %84 = vector.shape_cast %83 : vector<8xf32> to vector<8x1xf32>
    %cst_53 = arith.constant 2.560000e+02 : f32
    %85 = vector.broadcast %cst_53 : f32 to vector<8x1xf32>
    %86 = arith.divf %84, %85 : vector<8x1xf32>
    %87 = vector.broadcast %86 : vector<8x1xf32> to vector<8x256xf32>
    %88 = arith.subf %82, %87 : vector<8x256xf32>
    %89 = arith.mulf %88, %88 : vector<8x256xf32>
    %cst_54 = arith.constant dense<0.000000e+00> : vector<8xf32>
    %90 = vector.multi_reduction <add>, %89, %cst_54 [1] : vector<8x256xf32> to vector<8xf32>
    %91 = vector.shape_cast %90 : vector<8xf32> to vector<8x1xf32>
    %cst_55 = arith.constant 2.560000e+02 : f32
    %92 = vector.broadcast %cst_55 : f32 to vector<8x1xf32>
    %93 = arith.divf %91, %92 : vector<8x1xf32>
    %cst_56 = arith.constant 9.99999974E-6 : f32
    %94 = vector.broadcast %cst_56 : f32 to vector<8x1xf32>
    %95 = arith.addf %93, %94 : vector<8x1xf32>
    %96 = math.rsqrt %95 : vector<8x1xf32>
    %97 = vector.broadcast %96 : vector<8x1xf32> to vector<8x256xf32>
    %98 = arith.mulf %88, %97 : vector<8x256xf32>
    %c1_57 = arith.constant 1 : index
    %c0_58 = arith.constant 0 : index
    %c0_59 = arith.constant 0 : index
    %99 = vector.load %arg4[%c1_57, %c0_58, %c0_59] : memref<5x1x256xf32, #tpu.memory_space<vmem>>, vector<1x1x256xf32>
    %100 = vector.shape_cast %99 : vector<1x1x256xf32> to vector<1x256xf32>
    %101 = vector.broadcast %100 : vector<1x256xf32> to vector<8x256xf32>
    %102 = arith.mulf %98, %101 : vector<8x256xf32>
    %c1_60 = arith.constant 1 : index
    %c0_61 = arith.constant 0 : index
    %c0_62 = arith.constant 0 : index
    %103 = vector.load %arg5[%c1_60, %c0_61, %c0_62] : memref<5x1x256xf32, #tpu.memory_space<vmem>>, vector<1x1x256xf32>
    %104 = vector.shape_cast %103 : vector<1x1x256xf32> to vector<1x256xf32>
    %105 = vector.broadcast %104 : vector<1x256xf32> to vector<8x256xf32>
    %106 = arith.addf %102, %105 : vector<8x256xf32>
    %107 = arith.truncf %106 : vector<8x256xf32> to vector<8x256xbf16>
    %c6 = arith.constant 6 : index
    %c0_63 = arith.constant 0 : index
    %c0_64 = arith.constant 0 : index
    %108 = vector.load %arg2[%c6, %c0_63, %c0_64] : memref<18x256x256xbf16, #tpu.memory_space<vmem>>, vector<1x256x256xbf16>
    %109 = vector.shape_cast %108 : vector<1x256x256xbf16> to vector<256x256xbf16>
    %cst_65 = arith.constant dense<0.000000e+00> : vector<8x256xf32>
    %110 = tpu.matmul %107, %109, %cst_65 {dimension_numbers = #tpu.dot_dimension_numbers<[1], [0], [0], [1], [0, 0, 1, 1], [], []>} : vector<8x256xbf16>, vector<256x256xbf16>, vector<8x256xf32> -> vector<8x256xf32>
    %c6_66 = arith.constant 6 : index
    %c0_67 = arith.constant 0 : index
    %c0_68 = arith.constant 0 : index
    %111 = vector.load %arg3[%c6_66, %c0_67, %c0_68] : memref<18x1x256xf32, #tpu.memory_space<vmem>>, vector<1x1x256xf32>
    %112 = vector.shape_cast %111 : vector<1x1x256xf32> to vector<1x256xf32>
    %113 = vector.broadcast %112 : vector<1x256xf32> to vector<8x256xf32>
    %114 = arith.addf %110, %113 : vector<8x256xf32>
    %cst_69 = arith.constant 0.000000e+00 : f32
    %115 = vector.broadcast %cst_69 : f32 to vector<8x256xf32>
    %116 = arith.maximumf %114, %115 : vector<8x256xf32>
    %117 = arith.truncf %116 : vector<8x256xf32> to vector<8x256xbf16>
    %c7 = arith.constant 7 : index
    %c0_70 = arith.constant 0 : index
    %c0_71 = arith.constant 0 : index
    %118 = vector.load %arg2[%c7, %c0_70, %c0_71] : memref<18x256x256xbf16, #tpu.memory_space<vmem>>, vector<1x256x256xbf16>
    %119 = vector.shape_cast %118 : vector<1x256x256xbf16> to vector<256x256xbf16>
    %cst_72 = arith.constant dense<0.000000e+00> : vector<8x256xf32>
    %120 = tpu.matmul %117, %119, %cst_72 {dimension_numbers = #tpu.dot_dimension_numbers<[1], [0], [0], [1], [0, 0, 1, 1], [], []>} : vector<8x256xbf16>, vector<256x256xbf16>, vector<8x256xf32> -> vector<8x256xf32>
    %c7_73 = arith.constant 7 : index
    %c0_74 = arith.constant 0 : index
    %c0_75 = arith.constant 0 : index
    %121 = vector.load %arg3[%c7_73, %c0_74, %c0_75] : memref<18x1x256xf32, #tpu.memory_space<vmem>>, vector<1x1x256xf32>
    %122 = vector.shape_cast %121 : vector<1x1x256xf32> to vector<1x256xf32>
    %123 = vector.broadcast %122 : vector<1x256xf32> to vector<8x256xf32>
    %124 = arith.addf %120, %123 : vector<8x256xf32>
    %cst_76 = arith.constant 0.000000e+00 : f32
    %125 = vector.broadcast %cst_76 : f32 to vector<8x256xf32>
    %126 = arith.maximumf %124, %125 : vector<8x256xf32>
    %127 = arith.truncf %126 : vector<8x256xf32> to vector<8x256xbf16>
    %c8 = arith.constant 8 : index
    %c0_77 = arith.constant 0 : index
    %c0_78 = arith.constant 0 : index
    %128 = vector.load %arg2[%c8, %c0_77, %c0_78] : memref<18x256x256xbf16, #tpu.memory_space<vmem>>, vector<1x256x256xbf16>
    %129 = vector.shape_cast %128 : vector<1x256x256xbf16> to vector<256x256xbf16>
    %cst_79 = arith.constant dense<0.000000e+00> : vector<8x256xf32>
    %130 = tpu.matmul %127, %129, %cst_79 {dimension_numbers = #tpu.dot_dimension_numbers<[1], [0], [0], [1], [0, 0, 1, 1], [], []>} : vector<8x256xbf16>, vector<256x256xbf16>, vector<8x256xf32> -> vector<8x256xf32>
    %c8_80 = arith.constant 8 : index
    %c0_81 = arith.constant 0 : index
    %c0_82 = arith.constant 0 : index
    %131 = vector.load %arg3[%c8_80, %c0_81, %c0_82] : memref<18x1x256xf32, #tpu.memory_space<vmem>>, vector<1x1x256xf32>
    %132 = vector.shape_cast %131 : vector<1x1x256xf32> to vector<1x256xf32>
    %133 = vector.broadcast %132 : vector<1x256xf32> to vector<8x256xf32>
    %134 = arith.addf %130, %133 : vector<8x256xf32>
    %135 = arith.addf %134, %106 : vector<8x256xf32>
    %cst_83 = arith.constant dense<0.000000e+00> : vector<8xf32>
    %136 = vector.multi_reduction <add>, %135, %cst_83 [1] : vector<8x256xf32> to vector<8xf32>
    %137 = vector.shape_cast %136 : vector<8xf32> to vector<8x1xf32>
    %cst_84 = arith.constant 2.560000e+02 : f32
    %138 = vector.broadcast %cst_84 : f32 to vector<8x1xf32>
    %139 = arith.divf %137, %138 : vector<8x1xf32>
    %140 = vector.broadcast %139 : vector<8x1xf32> to vector<8x256xf32>
    %141 = arith.subf %135, %140 : vector<8x256xf32>
    %142 = arith.mulf %141, %141 : vector<8x256xf32>
    %cst_85 = arith.constant dense<0.000000e+00> : vector<8xf32>
    %143 = vector.multi_reduction <add>, %142, %cst_85 [1] : vector<8x256xf32> to vector<8xf32>
    %144 = vector.shape_cast %143 : vector<8xf32> to vector<8x1xf32>
    %cst_86 = arith.constant 2.560000e+02 : f32
    %145 = vector.broadcast %cst_86 : f32 to vector<8x1xf32>
    %146 = arith.divf %144, %145 : vector<8x1xf32>
    %cst_87 = arith.constant 9.99999974E-6 : f32
    %147 = vector.broadcast %cst_87 : f32 to vector<8x1xf32>
    %148 = arith.addf %146, %147 : vector<8x1xf32>
    %149 = math.rsqrt %148 : vector<8x1xf32>
    %150 = vector.broadcast %149 : vector<8x1xf32> to vector<8x256xf32>
    %151 = arith.mulf %141, %150 : vector<8x256xf32>
    %c2_88 = arith.constant 2 : index
    %c0_89 = arith.constant 0 : index
    %c0_90 = arith.constant 0 : index
    %152 = vector.load %arg4[%c2_88, %c0_89, %c0_90] : memref<5x1x256xf32, #tpu.memory_space<vmem>>, vector<1x1x256xf32>
    %153 = vector.shape_cast %152 : vector<1x1x256xf32> to vector<1x256xf32>
    %154 = vector.broadcast %153 : vector<1x256xf32> to vector<8x256xf32>
    %155 = arith.mulf %151, %154 : vector<8x256xf32>
    %c2_91 = arith.constant 2 : index
    %c0_92 = arith.constant 0 : index
    %c0_93 = arith.constant 0 : index
    %156 = vector.load %arg5[%c2_91, %c0_92, %c0_93] : memref<5x1x256xf32, #tpu.memory_space<vmem>>, vector<1x1x256xf32>
    %157 = vector.shape_cast %156 : vector<1x1x256xf32> to vector<1x256xf32>
    %158 = vector.broadcast %157 : vector<1x256xf32> to vector<8x256xf32>
    %159 = arith.addf %155, %158 : vector<8x256xf32>
    %160 = arith.truncf %159 : vector<8x256xf32> to vector<8x256xbf16>
    %c9 = arith.constant 9 : index
    %c0_94 = arith.constant 0 : index
    %c0_95 = arith.constant 0 : index
    %161 = vector.load %arg2[%c9, %c0_94, %c0_95] : memref<18x256x256xbf16, #tpu.memory_space<vmem>>, vector<1x256x256xbf16>
    %162 = vector.shape_cast %161 : vector<1x256x256xbf16> to vector<256x256xbf16>
    %cst_96 = arith.constant dense<0.000000e+00> : vector<8x256xf32>
    %163 = tpu.matmul %160, %162, %cst_96 {dimension_numbers = #tpu.dot_dimension_numbers<[1], [0], [0], [1], [0, 0, 1, 1], [], []>} : vector<8x256xbf16>, vector<256x256xbf16>, vector<8x256xf32> -> vector<8x256xf32>
    %c9_97 = arith.constant 9 : index
    %c0_98 = arith.constant 0 : index
    %c0_99 = arith.constant 0 : index
    %164 = vector.load %arg3[%c9_97, %c0_98, %c0_99] : memref<18x1x256xf32, #tpu.memory_space<vmem>>, vector<1x1x256xf32>
    %165 = vector.shape_cast %164 : vector<1x1x256xf32> to vector<1x256xf32>
    %166 = vector.broadcast %165 : vector<1x256xf32> to vector<8x256xf32>
    %167 = arith.addf %163, %166 : vector<8x256xf32>
    %cst_100 = arith.constant 0.000000e+00 : f32
    %168 = vector.broadcast %cst_100 : f32 to vector<8x256xf32>
    %169 = arith.maximumf %167, %168 : vector<8x256xf32>
    %170 = arith.truncf %169 : vector<8x256xf32> to vector<8x256xbf16>
    %c10 = arith.constant 10 : index
    %c0_101 = arith.constant 0 : index
    %c0_102 = arith.constant 0 : index
    %171 = vector.load %arg2[%c10, %c0_101, %c0_102] : memref<18x256x256xbf16, #tpu.memory_space<vmem>>, vector<1x256x256xbf16>
    %172 = vector.shape_cast %171 : vector<1x256x256xbf16> to vector<256x256xbf16>
    %cst_103 = arith.constant dense<0.000000e+00> : vector<8x256xf32>
    %173 = tpu.matmul %170, %172, %cst_103 {dimension_numbers = #tpu.dot_dimension_numbers<[1], [0], [0], [1], [0, 0, 1, 1], [], []>} : vector<8x256xbf16>, vector<256x256xbf16>, vector<8x256xf32> -> vector<8x256xf32>
    %c10_104 = arith.constant 10 : index
    %c0_105 = arith.constant 0 : index
    %c0_106 = arith.constant 0 : index
    %174 = vector.load %arg3[%c10_104, %c0_105, %c0_106] : memref<18x1x256xf32, #tpu.memory_space<vmem>>, vector<1x1x256xf32>
    %175 = vector.shape_cast %174 : vector<1x1x256xf32> to vector<1x256xf32>
    %176 = vector.broadcast %175 : vector<1x256xf32> to vector<8x256xf32>
    %177 = arith.addf %173, %176 : vector<8x256xf32>
    %cst_107 = arith.constant 0.000000e+00 : f32
    %178 = vector.broadcast %cst_107 : f32 to vector<8x256xf32>
    %179 = arith.maximumf %177, %178 : vector<8x256xf32>
    %180 = arith.truncf %179 : vector<8x256xf32> to vector<8x256xbf16>
    %c11 = arith.constant 11 : index
    %c0_108 = arith.constant 0 : index
    %c0_109 = arith.constant 0 : index
    %181 = vector.load %arg2[%c11, %c0_108, %c0_109] : memref<18x256x256xbf16, #tpu.memory_space<vmem>>, vector<1x256x256xbf16>
    %182 = vector.shape_cast %181 : vector<1x256x256xbf16> to vector<256x256xbf16>
    %cst_110 = arith.constant dense<0.000000e+00> : vector<8x256xf32>
    %183 = tpu.matmul %180, %182, %cst_110 {dimension_numbers = #tpu.dot_dimension_numbers<[1], [0], [0], [1], [0, 0, 1, 1], [], []>} : vector<8x256xbf16>, vector<256x256xbf16>, vector<8x256xf32> -> vector<8x256xf32>
    %c11_111 = arith.constant 11 : index
    %c0_112 = arith.constant 0 : index
    %c0_113 = arith.constant 0 : index
    %184 = vector.load %arg3[%c11_111, %c0_112, %c0_113] : memref<18x1x256xf32, #tpu.memory_space<vmem>>, vector<1x1x256xf32>
    %185 = vector.shape_cast %184 : vector<1x1x256xf32> to vector<1x256xf32>
    %186 = vector.broadcast %185 : vector<1x256xf32> to vector<8x256xf32>
    %187 = arith.addf %183, %186 : vector<8x256xf32>
    %188 = arith.addf %187, %159 : vector<8x256xf32>
    %cst_114 = arith.constant dense<0.000000e+00> : vector<8xf32>
    %189 = vector.multi_reduction <add>, %188, %cst_114 [1] : vector<8x256xf32> to vector<8xf32>
    %190 = vector.shape_cast %189 : vector<8xf32> to vector<8x1xf32>
    %cst_115 = arith.constant 2.560000e+02 : f32
    %191 = vector.broadcast %cst_115 : f32 to vector<8x1xf32>
    %192 = arith.divf %190, %191 : vector<8x1xf32>
    %193 = vector.broadcast %192 : vector<8x1xf32> to vector<8x256xf32>
    %194 = arith.subf %188, %193 : vector<8x256xf32>
    %195 = arith.mulf %194, %194 : vector<8x256xf32>
    %cst_116 = arith.constant dense<0.000000e+00> : vector<8xf32>
    %196 = vector.multi_reduction <add>, %195, %cst_116 [1] : vector<8x256xf32> to vector<8xf32>
    %197 = vector.shape_cast %196 : vector<8xf32> to vector<8x1xf32>
    %cst_117 = arith.constant 2.560000e+02 : f32
    %198 = vector.broadcast %cst_117 : f32 to vector<8x1xf32>
    %199 = arith.divf %197, %198 : vector<8x1xf32>
    %cst_118 = arith.constant 9.99999974E-6 : f32
    %200 = vector.broadcast %cst_118 : f32 to vector<8x1xf32>
    %201 = arith.addf %199, %200 : vector<8x1xf32>
    %202 = math.rsqrt %201 : vector<8x1xf32>
    %203 = vector.broadcast %202 : vector<8x1xf32> to vector<8x256xf32>
    %204 = arith.mulf %194, %203 : vector<8x256xf32>
    %c3_119 = arith.constant 3 : index
    %c0_120 = arith.constant 0 : index
    %c0_121 = arith.constant 0 : index
    %205 = vector.load %arg4[%c3_119, %c0_120, %c0_121] : memref<5x1x256xf32, #tpu.memory_space<vmem>>, vector<1x1x256xf32>
    %206 = vector.shape_cast %205 : vector<1x1x256xf32> to vector<1x256xf32>
    %207 = vector.broadcast %206 : vector<1x256xf32> to vector<8x256xf32>
    %208 = arith.mulf %204, %207 : vector<8x256xf32>
    %c3_122 = arith.constant 3 : index
    %c0_123 = arith.constant 0 : index
    %c0_124 = arith.constant 0 : index
    %209 = vector.load %arg5[%c3_122, %c0_123, %c0_124] : memref<5x1x256xf32, #tpu.memory_space<vmem>>, vector<1x1x256xf32>
    %210 = vector.shape_cast %209 : vector<1x1x256xf32> to vector<1x256xf32>
    %211 = vector.broadcast %210 : vector<1x256xf32> to vector<8x256xf32>
    %212 = arith.addf %208, %211 : vector<8x256xf32>
    %213 = arith.truncf %212 : vector<8x256xf32> to vector<8x256xbf16>
    %c12 = arith.constant 12 : index
    %c0_125 = arith.constant 0 : index
    %c0_126 = arith.constant 0 : index
    %214 = vector.load %arg2[%c12, %c0_125, %c0_126] : memref<18x256x256xbf16, #tpu.memory_space<vmem>>, vector<1x256x256xbf16>
    %215 = vector.shape_cast %214 : vector<1x256x256xbf16> to vector<256x256xbf16>
    %cst_127 = arith.constant dense<0.000000e+00> : vector<8x256xf32>
    %216 = tpu.matmul %213, %215, %cst_127 {dimension_numbers = #tpu.dot_dimension_numbers<[1], [0], [0], [1], [0, 0, 1, 1], [], []>} : vector<8x256xbf16>, vector<256x256xbf16>, vector<8x256xf32> -> vector<8x256xf32>
    %c12_128 = arith.constant 12 : index
    %c0_129 = arith.constant 0 : index
    %c0_130 = arith.constant 0 : index
    %217 = vector.load %arg3[%c12_128, %c0_129, %c0_130] : memref<18x1x256xf32, #tpu.memory_space<vmem>>, vector<1x1x256xf32>
    %218 = vector.shape_cast %217 : vector<1x1x256xf32> to vector<1x256xf32>
    %219 = vector.broadcast %218 : vector<1x256xf32> to vector<8x256xf32>
    %220 = arith.addf %216, %219 : vector<8x256xf32>
    %cst_131 = arith.constant 0.000000e+00 : f32
    %221 = vector.broadcast %cst_131 : f32 to vector<8x256xf32>
    %222 = arith.maximumf %220, %221 : vector<8x256xf32>
    %223 = arith.truncf %222 : vector<8x256xf32> to vector<8x256xbf16>
    %c13 = arith.constant 13 : index
    %c0_132 = arith.constant 0 : index
    %c0_133 = arith.constant 0 : index
    %224 = vector.load %arg2[%c13, %c0_132, %c0_133] : memref<18x256x256xbf16, #tpu.memory_space<vmem>>, vector<1x256x256xbf16>
    %225 = vector.shape_cast %224 : vector<1x256x256xbf16> to vector<256x256xbf16>
    %cst_134 = arith.constant dense<0.000000e+00> : vector<8x256xf32>
    %226 = tpu.matmul %223, %225, %cst_134 {dimension_numbers = #tpu.dot_dimension_numbers<[1], [0], [0], [1], [0, 0, 1, 1], [], []>} : vector<8x256xbf16>, vector<256x256xbf16>, vector<8x256xf32> -> vector<8x256xf32>
    %c13_135 = arith.constant 13 : index
    %c0_136 = arith.constant 0 : index
    %c0_137 = arith.constant 0 : index
    %227 = vector.load %arg3[%c13_135, %c0_136, %c0_137] : memref<18x1x256xf32, #tpu.memory_space<vmem>>, vector<1x1x256xf32>
    %228 = vector.shape_cast %227 : vector<1x1x256xf32> to vector<1x256xf32>
    %229 = vector.broadcast %228 : vector<1x256xf32> to vector<8x256xf32>
    %230 = arith.addf %226, %229 : vector<8x256xf32>
    %cst_138 = arith.constant 0.000000e+00 : f32
    %231 = vector.broadcast %cst_138 : f32 to vector<8x256xf32>
    %232 = arith.maximumf %230, %231 : vector<8x256xf32>
    %233 = arith.truncf %232 : vector<8x256xf32> to vector<8x256xbf16>
    %c14 = arith.constant 14 : index
    %c0_139 = arith.constant 0 : index
    %c0_140 = arith.constant 0 : index
    %234 = vector.load %arg2[%c14, %c0_139, %c0_140] : memref<18x256x256xbf16, #tpu.memory_space<vmem>>, vector<1x256x256xbf16>
    %235 = vector.shape_cast %234 : vector<1x256x256xbf16> to vector<256x256xbf16>
    %cst_141 = arith.constant dense<0.000000e+00> : vector<8x256xf32>
    %236 = tpu.matmul %233, %235, %cst_141 {dimension_numbers = #tpu.dot_dimension_numbers<[1], [0], [0], [1], [0, 0, 1, 1], [], []>} : vector<8x256xbf16>, vector<256x256xbf16>, vector<8x256xf32> -> vector<8x256xf32>
    %c14_142 = arith.constant 14 : index
    %c0_143 = arith.constant 0 : index
    %c0_144 = arith.constant 0 : index
    %237 = vector.load %arg3[%c14_142, %c0_143, %c0_144] : memref<18x1x256xf32, #tpu.memory_space<vmem>>, vector<1x1x256xf32>
    %238 = vector.shape_cast %237 : vector<1x1x256xf32> to vector<1x256xf32>
    %239 = vector.broadcast %238 : vector<1x256xf32> to vector<8x256xf32>
    %240 = arith.addf %236, %239 : vector<8x256xf32>
    %241 = arith.addf %240, %212 : vector<8x256xf32>
    %cst_145 = arith.constant dense<0.000000e+00> : vector<8xf32>
    %242 = vector.multi_reduction <add>, %241, %cst_145 [1] : vector<8x256xf32> to vector<8xf32>
    %243 = vector.shape_cast %242 : vector<8xf32> to vector<8x1xf32>
    %cst_146 = arith.constant 2.560000e+02 : f32
    %244 = vector.broadcast %cst_146 : f32 to vector<8x1xf32>
    %245 = arith.divf %243, %244 : vector<8x1xf32>
    %246 = vector.broadcast %245 : vector<8x1xf32> to vector<8x256xf32>
    %247 = arith.subf %241, %246 : vector<8x256xf32>
    %248 = arith.mulf %247, %247 : vector<8x256xf32>
    %cst_147 = arith.constant dense<0.000000e+00> : vector<8xf32>
    %249 = vector.multi_reduction <add>, %248, %cst_147 [1] : vector<8x256xf32> to vector<8xf32>
    %250 = vector.shape_cast %249 : vector<8xf32> to vector<8x1xf32>
    %cst_148 = arith.constant 2.560000e+02 : f32
    %251 = vector.broadcast %cst_148 : f32 to vector<8x1xf32>
    %252 = arith.divf %250, %251 : vector<8x1xf32>
    %cst_149 = arith.constant 9.99999974E-6 : f32
    %253 = vector.broadcast %cst_149 : f32 to vector<8x1xf32>
    %254 = arith.addf %252, %253 : vector<8x1xf32>
    %255 = math.rsqrt %254 : vector<8x1xf32>
    %256 = vector.broadcast %255 : vector<8x1xf32> to vector<8x256xf32>
    %257 = arith.mulf %247, %256 : vector<8x256xf32>
    %c4_150 = arith.constant 4 : index
    %c0_151 = arith.constant 0 : index
    %c0_152 = arith.constant 0 : index
    %258 = vector.load %arg4[%c4_150, %c0_151, %c0_152] : memref<5x1x256xf32, #tpu.memory_space<vmem>>, vector<1x1x256xf32>
    %259 = vector.shape_cast %258 : vector<1x1x256xf32> to vector<1x256xf32>
    %260 = vector.broadcast %259 : vector<1x256xf32> to vector<8x256xf32>
    %261 = arith.mulf %257, %260 : vector<8x256xf32>
    %c4_153 = arith.constant 4 : index
    %c0_154 = arith.constant 0 : index
    %c0_155 = arith.constant 0 : index
    %262 = vector.load %arg5[%c4_153, %c0_154, %c0_155] : memref<5x1x256xf32, #tpu.memory_space<vmem>>, vector<1x1x256xf32>
    %263 = vector.shape_cast %262 : vector<1x1x256xf32> to vector<1x256xf32>
    %264 = vector.broadcast %263 : vector<1x256xf32> to vector<8x256xf32>
    %265 = arith.addf %261, %264 : vector<8x256xf32>
    %266 = arith.truncf %265 : vector<8x256xf32> to vector<8x256xbf16>
    %c15 = arith.constant 15 : index
    %c0_156 = arith.constant 0 : index
    %c0_157 = arith.constant 0 : index
    %267 = vector.load %arg2[%c15, %c0_156, %c0_157] : memref<18x256x256xbf16, #tpu.memory_space<vmem>>, vector<1x256x256xbf16>
    %268 = vector.shape_cast %267 : vector<1x256x256xbf16> to vector<256x256xbf16>
    %cst_158 = arith.constant dense<0.000000e+00> : vector<8x256xf32>
    %269 = tpu.matmul %266, %268, %cst_158 {dimension_numbers = #tpu.dot_dimension_numbers<[1], [0], [0], [1], [0, 0, 1, 1], [], []>} : vector<8x256xbf16>, vector<256x256xbf16>, vector<8x256xf32> -> vector<8x256xf32>
    %c15_159 = arith.constant 15 : index
    %c0_160 = arith.constant 0 : index
    %c0_161 = arith.constant 0 : index
    %270 = vector.load %arg3[%c15_159, %c0_160, %c0_161] : memref<18x1x256xf32, #tpu.memory_space<vmem>>, vector<1x1x256xf32>
    %271 = vector.shape_cast %270 : vector<1x1x256xf32> to vector<1x256xf32>
    %272 = vector.broadcast %271 : vector<1x256xf32> to vector<8x256xf32>
    %273 = arith.addf %269, %272 : vector<8x256xf32>
    %cst_162 = arith.constant 0.000000e+00 : f32
    %274 = vector.broadcast %cst_162 : f32 to vector<8x256xf32>
    %275 = arith.maximumf %273, %274 : vector<8x256xf32>
    %276 = arith.truncf %275 : vector<8x256xf32> to vector<8x256xbf16>
    %c16 = arith.constant 16 : index
    %c0_163 = arith.constant 0 : index
    %c0_164 = arith.constant 0 : index
    %277 = vector.load %arg2[%c16, %c0_163, %c0_164] : memref<18x256x256xbf16, #tpu.memory_space<vmem>>, vector<1x256x256xbf16>
    %278 = vector.shape_cast %277 : vector<1x256x256xbf16> to vector<256x256xbf16>
    %cst_165 = arith.constant dense<0.000000e+00> : vector<8x256xf32>
    %279 = tpu.matmul %276, %278, %cst_165 {dimension_numbers = #tpu.dot_dimension_numbers<[1], [0], [0], [1], [0, 0, 1, 1], [], []>} : vector<8x256xbf16>, vector<256x256xbf16>, vector<8x256xf32> -> vector<8x256xf32>
    %c16_166 = arith.constant 16 : index
    %c0_167 = arith.constant 0 : index
    %c0_168 = arith.constant 0 : index
    %280 = vector.load %arg3[%c16_166, %c0_167, %c0_168] : memref<18x1x256xf32, #tpu.memory_space<vmem>>, vector<1x1x256xf32>
    %281 = vector.shape_cast %280 : vector<1x1x256xf32> to vector<1x256xf32>
    %282 = vector.broadcast %281 : vector<1x256xf32> to vector<8x256xf32>
    %283 = arith.addf %279, %282 : vector<8x256xf32>
    %cst_169 = arith.constant 0.000000e+00 : f32
    %284 = vector.broadcast %cst_169 : f32 to vector<8x256xf32>
    %285 = arith.maximumf %283, %284 : vector<8x256xf32>
    %286 = arith.truncf %285 : vector<8x256xf32> to vector<8x256xbf16>
    %c17 = arith.constant 17 : index
    %c0_170 = arith.constant 0 : index
    %c0_171 = arith.constant 0 : index
    %287 = vector.load %arg2[%c17, %c0_170, %c0_171] : memref<18x256x256xbf16, #tpu.memory_space<vmem>>, vector<1x256x256xbf16>
    %288 = vector.shape_cast %287 : vector<1x256x256xbf16> to vector<256x256xbf16>
    %cst_172 = arith.constant dense<0.000000e+00> : vector<8x256xf32>
    %289 = tpu.matmul %286, %288, %cst_172 {dimension_numbers = #tpu.dot_dimension_numbers<[1], [0], [0], [1], [0, 0, 1, 1], [], []>} : vector<8x256xbf16>, vector<256x256xbf16>, vector<8x256xf32> -> vector<8x256xf32>
    %c17_173 = arith.constant 17 : index
    %c0_174 = arith.constant 0 : index
    %c0_175 = arith.constant 0 : index
    %290 = vector.load %arg3[%c17_173, %c0_174, %c0_175] : memref<18x1x256xf32, #tpu.memory_space<vmem>>, vector<1x1x256xf32>
    %291 = vector.shape_cast %290 : vector<1x1x256xf32> to vector<1x256xf32>
    %292 = vector.broadcast %291 : vector<1x256xf32> to vector<8x256xf32>
    %293 = arith.addf %289, %292 : vector<8x256xf32>
    %294 = arith.addf %293, %265 : vector<8x256xf32>
    %c0_176 = arith.constant 0 : index
    %c0_177 = arith.constant 0 : index
    %295 = vector.load %arg6[%c0_176, %c0_177] : memref<8x256xf32, #tpu.memory_space<vmem>>, vector<8x256xf32>
    tpu.vector_store %arg6[%c0_176, %c0_177], %294 {strides = array<i32>} : memref<8x256xf32, #tpu.memory_space<vmem>>, vector<8x256xf32>,
    return
  }
  func.func @transform_0(%arg0: i32) -> (i32, i32) {
    %c0_i32 = arith.constant 0 : i32
    %c0_i32_0 = arith.constant 0 : i32
    return %arg0, %c0_i32 : i32, i32
  }
  func.func @transform_1(%arg0: i32) -> (i32, i32, i32) {
    %c0_i32 = arith.constant 0 : i32
    %c0_i32_0 = arith.constant 0 : i32
    %c0_i32_1 = arith.constant 0 : i32
    %c0_i32_2 = arith.constant 0 : i32
    return %c0_i32, %c0_i32_0, %c0_i32_1 : i32, i32, i32
  }
  func.func @transform_2(%arg0: i32) -> (i32, i32, i32) {
    %c0_i32 = arith.constant 0 : i32
    %c0_i32_0 = arith.constant 0 : i32
    %c0_i32_1 = arith.constant 0 : i32
    %c0_i32_2 = arith.constant 0 : i32
    return %c0_i32, %c0_i32_0, %c0_i32_1 : i32, i32, i32
  }
  func.func @transform_3(%arg0: i32) -> (i32, i32, i32) {
    %c0_i32 = arith.constant 0 : i32
    %c0_i32_0 = arith.constant 0 : i32
    %c0_i32_1 = arith.constant 0 : i32
    %c0_i32_2 = arith.constant 0 : i32
    return %c0_i32, %c0_i32_0, %c0_i32_1 : i32, i32, i32
  }
  func.func @transform_4(%arg0: i32) -> (i32, i32, i32) {
    %c0_i32 = arith.constant 0 : i32
    %c0_i32_0 = arith.constant 0 : i32
    %c0_i32_1 = arith.constant 0 : i32
    %c0_i32_2 = arith.constant 0 : i32
    return %c0_i32, %c0_i32_0, %c0_i32_1 : i32, i32, i32
  }
  func.func @transform_5(%arg0: i32) -> (i32, i32) {
    %c0_i32 = arith.constant 0 : i32
    %c0_i32_0 = arith.constant 0 : i32
    return %arg0, %c0_i32 : i32, i32
  }
}

</mosaic_0001>

<bundles_post_ra>
// kernel: bignet4bit_forward.1
= control target key start
LH: loop header
LB: loop body
LE: loop exit
PB: predicated region body
PF: predicated region fallthrough
CT: control target
= control target key end

     0   :  { %10 = vsyncpa [#allocation3], 0  ;;  %s7451_s0 = inlined_call_operand.hbm [shape: f32[16,256], index: 0, kind: input, shape index: {}]   ;;  %s7452_s1 = inlined_call_operand.hbm [shape: bf16[18,256,256], index: 1, kind: input, shape index: {}]   ;;  %s7453_s2 = inlined_call_operand.hbm [shape: f32[18,1,256], index: 2, kind: input, shape index: {}]   ;;  %s7454_s3 = inlined_call_operand.hbm [shape: f32[5,1,256], index: 3, kind: input, shape index: {}]   ;;  %s7455_s4 = inlined_call_operand.hbm [shape: f32[5,1,256], index: 4, kind: input, shape index: {}]   ;;  %s7456_s5 = inlined_call_operand.hbm [shape: f32[16,256], index: 5, kind: output, shape index: {}]  }
   0x1   :  { %12 = vsyncpa [#allocation3 + $0x1], 0 }
   0x2   :  { %13 = vsyncpa [#allocation6], 0 }
   0x3   :  { %14 = vsyncpa [#allocation9], 0 }
   0x4   :  { %15 = vsyncpa [#allocation4], 0 }
   0x5   :  { %17 = vsyncpa [#allocation4 + $0x1], 0  ;;  %s6996_s18 = smov 0   ;;  %s6998_s19 = smov 0  }
   0x6   :  { %s7000_s20 = smov 0   ;;  %s7002_s21 = smov 0  }
   0x7 LB: > { %s6956_s22 = smov [#allocation5]   ;;  %s7017_s24 = sadd.s32 4294967295, %s6954_s21   ;;  %s6954_s21 = sphi %s7002_s21, %s7480_s21   ;;  %s6950_s20 = sphi %s7000_s20, %s7479_s20   ;;  %s6946_s19 = sphi %s6998_s19, %s7478_s19   ;;  %s6942_s18 = sphi %s6996_s18, %s7477_s18  }
   0x8   : > { %s176_s23 = sshll.u32 %s6956_s22, 4  ;;  %p5172_p0 = scmp.ge.s32.totalorder %s6954_s21, 1  ;;  %s7022_s23 = int_to_ptr.vmem [resolvable:$true] %s176_s23 }
   0x9   : > { %p7457_p1 = scmp.eq.s32.totalorder %s7017_s24, 0  ;;  %p164_p2 = scmp.lt.s32.totalorder %s6954_s21, 3 }
   0xa   : > { %s6957_s27 = smov [#allocation8]   ;;  %s6958_s29 = smov [#allocation7]  }
   0xb   : > { %p7024_p3 = pnand %p5172_p0, %p164_p2  ;;  %s202_s28 = sshll.u32 %s6957_s27, 4  ;;  %s7037_s28 = int_to_ptr.vmem [resolvable:$true] %s202_s28 }
   0xc   : > { %s7039_s30 = sshll.u32 %s6958_s29, 4  ;;  %s6738_s8 = scalar_lea.hbm %s7452_s1, 73728  ;;  %s190_s30 = int_to_ptr.vmem [resolvable:$true] %s7039_s30 }
   0xd   : > { %s7460_s25 = scalar_select %p7024_p3, 1, 0 }
   0xe   : > { %p5791_p5 = pneg %p7024_p3  ;;  %p6739_p7 = scmp.ne.s32.totalorder %s7452_s1, %s6738_s8 }
   0xf   : > { %p6745_p11 = scmp.lt.u32.totalorder %s6738_s8, %s7452_s1 }
  0x10   : > { %p7033_p6 = pnand %p5791_p5, %p7457_p1 }
  0x12   : > { %p7049_p8 = pneg %p7033_p6 }
  0x14   : > { %p6741_p9 = pnand %p7049_p8, %p6739_p7 }
  0x16   : > { %p6742_p10 = pneg %p6741_p9 }
  0x18   : > { %p6747_p12 = pnand %p6745_p11, %p6742_p10 }
  0x1a   : > { %6750 = shalt.err (!%p6747_p12)
}
  0x1b   : > { %s6751_s14 = scalar_lea.vmem %s7022_s23, 73728  ;;  %p6759_p5 = scmp.lt.s32.totalorder %s7022_s23, %s7022_s23 }
  0x1c   : > { %p6752_p13 = scmp.ne.s32.totalorder %s7022_s23, %s6751_s14  ;;  %p6760_p4 = scmp.lt.s32.totalorder %s6751_s14, %s6751_s14 }
  0x1e   : > { %p6754_p0 = pnand %p6752_p13, %p7049_p8  ;;  %p6761_p7 = por %p6760_p4, %p6759_p5 }
  0x20   : > { %p6755_p2 = pneg %p6754_p0 }
  0x22   : > { %p6762_p9 = pnand %p6761_p7, %p6755_p2 }
  0x24   : > { %6765 = shalt.err (!%p6762_p9)
}
  0x25   : > { %s6959_s15 = smov 128   ;;  %s6960_s16 = smov 8  }
  0x26   : > { %5794 = dma.hbm_to_vmem [thread:$0]  (!%p7033_p6), %s7452_s1, 73728, %s7022_s23, [#allocation6], %s6959_s15, %s6959_s15, %s6960_s16  }
  0x27   : > { %s6766_s6 = scalar_lea.hbm %s7454_s3, 160 }
  0x28   : > { %p6767_p4 = scmp.ne.s32.totalorder %s7454_s3, %s6766_s6  ;;  %p6773_p12 = scmp.lt.u32.totalorder %s6766_s6, %s7454_s3 }
  0x2a   : > { %p6769_p10 = pnand %p6767_p4, %p7049_p8 }
  0x2c   : > { %p6770_p11 = pneg %p6769_p10 }
  0x2e   : > { %p6775_p13 = pnand %p6773_p12, %p6770_p11 }
  0x30   : > { %6778 = shalt.err (!%p6775_p13)
}
  0x31   : > { %s6779_s23 = scalar_lea.vmem %s7037_s28, 160  ;;  %p6787_p7 = scmp.lt.s32.totalorder %s7037_s28, %s7037_s28 }
  0x32   : > { %p6780_p0 = scmp.ne.s32.totalorder %s7037_s28, %s6779_s23  ;;  %p6788_p9 = scmp.lt.s32.totalorder %s6779_s23, %s6779_s23 }
  0x34   : > { %p6782_p2 = pnand %p6780_p0, %p7049_p8  ;;  %p6789_p4 = por %p6788_p9, %p6787_p7 }
  0x36   : > { %p6783_p5 = pneg %p6782_p2 }
  0x38   : > { %p6790_p10 = pnand %p6789_p4, %p6783_p5 }
  0x3a   : > { %6793 = shalt.err (!%p6790_p10)
}
  0x3b   : > { %s6961_s12 = smov 32   ;;  %s6962_s13 = smov 2  }
  0x3c   : > { %5800 = dma.hbm_to_vmem [thread:$0]  (!%p7033_p6), %s7454_s3, 160, %s7037_s28, [#allocation9], %s6961_s12, %s6961_s12, %s6962_s13  }
  0x3d   : > { %s6794_s22 = scalar_lea.hbm %s7453_s2, 576 }
  0x3e   : > { %p6795_p11 = scmp.ne.s32.totalorder %s7453_s2, %s6794_s22  ;;  %p6801_p0 = scmp.lt.u32.totalorder %s6794_s22, %s7453_s2 }
  0x40   : > { %p6797_p12 = pnand %p6795_p11, %p7049_p8 }
  0x42   : > { %p6798_p13 = pneg %p6797_p12 }
  0x44   : > { %p6803_p2 = pnand %p6801_p0, %p6798_p13 }
  0x46   : > { %6806 = shalt.err (!%p6803_p2)
}
  0x47   : > { %s6807_s8 = scalar_lea.vmem %s190_s30, 576  ;;  %p6815_p4 = scmp.lt.s32.totalorder %s190_s30, %s190_s30 }
  0x48   : > { %p6808_p5 = scmp.ne.s32.totalorder %s190_s30, %s6807_s8  ;;  %p6816_p10 = scmp.lt.s32.totalorder %s6807_s8, %s6807_s8 }
  0x4a   : > { %p6810_p7 = pnand %p6808_p5, %p7049_p8  ;;  %p6817_p1 = por %p6816_p10, %p6815_p4 }
  0x4c   : > { %p6811_p9 = pneg %p6810_p7 }
  0x4e   : > { %p6818_p3 = pnand %p6817_p1, %p6811_p9 }
  0x50   : > { %6821 = shalt.err (!%p6818_p3)
}
  0x51   : > { %5797 = dma.hbm_to_vmem [thread:$0]  (!%p7033_p6), %s7453_s2, 576, %s190_s30, [#allocation6], %s6961_s12, %s6961_s12, %s6962_s13  }
  0x52   : > { %s6963_s10 = smov [#allocation10]   ;;  %s6822_s16 = scalar_lea.hbm %s7455_s4, 160 }
  0x53   : > { %s215_s23 = sshll.u32 %s6963_s10, 4  ;;  %p6823_p1 = scmp.ne.s32.totalorder %s7455_s4, %s6822_s16  ;;  %s216_s23 = int_to_ptr.vmem [resolvable:$true] %s215_s23 }
  0x54   : > { %p6829_p12 = scmp.lt.u32.totalorder %s6822_s16, %s7455_s4 }
  0x55   : > { %p6825_p3 = pnand %p6823_p1, %p7049_p8 }
  0x57   : > { %p6826_p11 = pneg %p6825_p3 }
  0x59   : > { %p6831_p13 = pnand %p6829_p12, %p6826_p11 }
  0x5b   : > { %6834 = shalt.err (!%p6831_p13)
}
  0x5c   : > { %s6835_s30 = scalar_lea.vmem %s216_s23, 160  ;;  %p6843_p7 = scmp.lt.s32.totalorder %s216_s23, %s216_s23 }
  0x5d   : > { %p6836_p0 = scmp.ne.s32.totalorder %s216_s23, %s6835_s30  ;;  %p6844_p9 = scmp.lt.s32.totalorder %s6835_s30, %s6835_s30 }
  0x5f   : > { %p6838_p2 = pnand %p6836_p0, %p7049_p8  ;;  %p6845_p4 = por %p6844_p9, %p6843_p7 }
  0x61   : > { %p6839_p5 = pneg %p6838_p2 }
  0x63   : > { %p6846_p10 = pnand %p6845_p4, %p6839_p5 }
  0x65   : > { %6849 = shalt.err (!%p6846_p10)
}
  0x66   : > { %5803 = dma.hbm_to_vmem [thread:$0]  (!%p7033_p6), %s7455_s4, 160, %s216_s23, [#allocation9], %s6961_s12, %s6961_s12, %s6962_s13  }
  0x67   : > { %s5171_s26 = sadd.s32 4294967294, %s6954_s21   ;;  %s7141_s11 = sadd.s32 1, %s6954_s21  }
  0x68   : > { %s27_s8 = ssub.s32 %s6954_s21, %s7141_s11  ;;  %s30_s28 = sadd.s32 1, %s6950_s20 }
  0x69   : > { %p28_p8 = scmp.eq.s32.totalorder %s27_s8, 0  ;;  %p37_p1 = scmp.ne.s32.totalorder %s6950_s20, %s6946_s19 }
  0x6a   : > { %p38_p3 = scmp.eq.s32.totalorder %s6954_s21, 0  ;;  %p43_p11 = scmp.ne.s32.totalorder %s6946_s19, %s6942_s18 }
  0x6b   : > { %s7152_s9 = scalar_select %p28_p8, %s6950_s20, %s30_s28  }
  0x6c   : > { %p7154_p12 = por %p38_p3, %p37_p1  ;;  %p7464_p13 = scmp.eq.s32.totalorder %s7017_s24, 0 }
  0x6d   : > { %p151_p0 = scmp.eq.s32.totalorder %s7017_s24, 1  ;;  %p157_p2 = scmp.eq.s32.totalorder %s5171_s26, 1 }
  0x6e   : > { %p7160_p6 = por %p7464_p13, %p43_p11  ;;  %p5816_p5 = scmp.lt.s32.totalorder %s6954_s21, 2 }
  0x6f   : > { %s229_s13 = sand.u32 1, %s6950_s20   ;;  %p7167_p7 = por %p151_p0, %p37_p1 }
  0x70   : > { %p7171_p9 = por %p157_p2, %p43_p11  ;;  %s5178_s15 = sshll.u32 %s229_s13, 4 }
  0x71   : > { %s7466_s23 = scalar_select %p7167_p7, 1, 0 }
  0x72   : > { %s7467_s14 = scalar_select %p7171_p9, 1, 0 }
  0x73   : > { %s5769_s16 = sshll.u32 %s6954_s21, 8  ;;  %s233_s29 = scalar_lea.vmem [#allocation2], %s5178_s15 }
  0x74   : > { %s7179_s27 = scalar_lea.hbm %s7451_s0, %s5769_s16  ;;  %s241_s30 = sshll.u32 %s233_s29, 4  ;;  %s7181_s30 = int_to_ptr.vmem [resolvable:$true] %s241_s30 }
  0x75   : > { %p7185_p4 = pnand %p5816_p5, %p7154_p12  ;;  %s230_s7 = scalar_lea.sflag [#allocation3], %s229_s13 }
  0x76   : > { %s6850_s26 = scalar_lea.hbm %s7179_s27, 256  ;;  %s6855_s15 = scalar_lea.hbm %s7451_s0, 512 }
  0x77   : > { %p6851_p10 = scmp.ne.s32.totalorder %s7179_s27, %s6850_s26  ;;  %p6852_p8 = pneg %p7185_p4 }
  0x78   : > { %p6856_p11 = scmp.lt.u32.totalorder %s7179_s27, %s7451_s0  ;;  %p6857_p12 = scmp.lt.u32.totalorder %s6855_s15, %s6850_s26 }
  0x79   : > { %p6853_p1 = pnand %p6852_p8, %p6851_p10  ;;  %p6859_p0 = scmp.lt.u32.totalorder %s6850_s26, %s7179_s27 }
  0x7a   : > { %p6858_p13 = por %p6857_p12, %p6856_p11 }
  0x7b   : > { %p6854_p3 = pneg %p6853_p1 }
  0x7c   : > { %p6860_p2 = por %p6859_p0, %p6858_p13 }
  0x7e   : > { %p6861_p5 = pnand %p6860_p2, %p6854_p3 }
  0x80   : > { %6864 = shalt.err (!%p6861_p5)
}
  0x81   : > { %s6865_s13 = scalar_lea.vmem %s7181_s30, 256  ;;  %s6964_s17 = smov [#allocation2]  }
  0x82   : > { %p6866_p10 = scmp.ne.s32.totalorder %s7181_s30, %s6865_s13  ;;  %s6870_s22 = sshll.u32 %s6964_s17, 4  ;;  %s6871_s22 = int_to_ptr.vmem [resolvable:$false] %s6870_s22 }
  0x83   : > { %s6872_s29 = scalar_lea.vmem %s6871_s22, 512  ;;  %p6873_p7 = scmp.lt.s32.totalorder %s7181_s30, %s6871_s22 }
  0x84   : > { %p6868_p1 = pnand %p6866_p10, %p6852_p8  ;;  %p6874_p11 = scmp.lt.s32.totalorder %s6872_s29, %s6865_s13 }
  0x86   : > { %p6869_p9 = pneg %p6868_p1  ;;  %p6875_p12 = por %p6874_p11, %p6873_p7 }
  0x88   : > { %p6876_p13 = pnand %p6875_p12, %p6869_p9 }
  0x8a   : > { %6879 = shalt.err (!%p6876_p13)
}
  0x8b   : > { %5807 = dma.hbm_to_vmem [thread:$0]  (!%p7185_p4), %s7179_s27, 256, %s7181_s30, %s230_s7  }
  0x8c   : > { %p7469_p3 = scmp.ne.s32.totalorder %s7460_s25, 0 }
  0x8d   : > { %s7217_s26 = sand.u32 (!%p7469_p3), 1, %s6946_s19  }
  0x8e   : > { %250 = sbr.rel (%p7469_p3) target bundleno = 5767 (0x1687), region = 40  ;;  %s5182_s8 = sshll.u32 (!%p7469_p3), %s7217_s26, 4 }
  0x8f   : > { %s253_s28 = scalar_lea.sflag (!%p7469_p3), [#allocation3], %s7217_s26  ;;  %s7223_s15 = scalar_lea.vmem (!%p7469_p3), [#allocation2], %s5182_s8 }
  0x95   : > { %6925 = dma.done.wait (%p7160_p6), %s253_s28, 256  }
  0x96   : > { %6927 = vsyncadd (%p7160_p6), %s253_s28, 4294967040  ;;  %p7470_p7 = scmp.eq.s32.totalorder %s7017_s24, 0 }
  0x98   : > { %6929 = dma.done.wait (%p7470_p7), [#allocation6], 74304   ;;  %p7471_p9 = pmov %p7470_p7 }
  0x99   : > { %p7472_p4 = pmov %p7470_p7 }
  0x9a   : > { %6931 = vsyncadd (%p7471_p9), [#allocation6], 4294892992 }
  0x9b   : > { %6933 = dma.done.wait (%p7472_p4), [#allocation9], 320   ;;  %p7473_p8 = pmov %p7472_p4 }
  0x9c   : > { %v5862_v0 = vld [vmem:[#allocation5 + $0x4] ss:$8 sps:$4 sm:$0xff]   ;;  %v5864_v1 = vld [vmem:[#allocation5] ss:$8 sps:$4 sm:$0xff]   ;;  %v5865_v2 = vld [vmem:[#allocation5 + $0x14] ss:$8 sps:$4 sm:$0xff]  }
  0x9d   : > { %6935 = vsyncadd (%p7473_p8), [#allocation9], 4294966976  ;;  %507 = vmatprep.subr.bf16.mxu0 %v5862_v0  ;;  %v5867_v3 = vld [vmem:[#allocation5 + $0x10] ss:$8 sps:$4 sm:$0xff]   ;;  %v5868_v4 = vld [vmem:[#allocation5 + $0x24] ss:$8 sps:$4 sm:$0xff]  }
  0x9e   : > { %508 = vmatpush1.bf16.msra.mxu0 %v5864_v1  ;;  %v5870_v5 = vld [vmem:[#allocation5 + $0x20] ss:$8 sps:$4 sm:$0xff]   ;;  %v5871_v6 = vld [vmem:[#allocation5 + $0x34] ss:$8 sps:$4 sm:$0xff]   ;;  %v5873_v7 = vld [vmem:[#allocation5 + $0x30] ss:$8 sps:$4 sm:$0xff]  }
  0x9f   : > { %509 = vmatprep.subr.bf16.mxu0 %v5865_v2  ;;  %v5874_v8 = vld [vmem:[#allocation5 + $0x44] ss:$8 sps:$4 sm:$0xff]   ;;  %v5876_v9 = vld [vmem:[#allocation5 + $0x40] ss:$8 sps:$4 sm:$0xff]   ;;  %v5877_v10 = vld [vmem:[#allocation5 + $0x54] ss:$8 sps:$4 sm:$0xff]  }
  0xa0   : > { %v5879_v11 = vld [vmem:[#allocation5 + $0x50] ss:$8 sps:$4 sm:$0xff]   ;;  %v5880_v12 = vld [vmem:[#allocation5 + $0x64] ss:$8 sps:$4 sm:$0xff]   ;;  %v5882_v13 = vld [vmem:[#allocation5 + $0x60] ss:$8 sps:$4 sm:$0xff]  }
  0xa1   : > { %v300_v14 = vld [vmem:[%s7223_s15 + $0x8] sm:$0xff]  ;;  %v299_v54 = vld [vmem:[%s7223_s15] sm:$0xff]  ;;  %s5770_s25 = sshll.u32 %s7017_s24, 8  ;;  %s298_s12 = scalar_lea.vmem [#allocation11], %s5182_s8 }
  0xa2   : > { %510 = vmatpush1.bf16.msra.mxu0 %v5867_v3  ;;  %v302_v15 = vpack.c.bf16 %v300_v14, %v300_v14  ;;  %v5910_v16 = vld [vmem:[#allocation5 + $0x104] ss:$8 sps:$4 sm:$0xff]   ;;  %v5912_v17 = vld [vmem:[#allocation5 + $0x100] ss:$8 sps:$4 sm:$0xff]   ;;  %v5883_v18 = vld [vmem:[#allocation5 + $0x74] ss:$8 sps:$4 sm:$0xff]   ;;  %v301_v58 = vpack.c.bf16 %v299_v54, %v299_v54  ;;  %s7407_s7 = scalar_lea.hbm %s7456_s5, %s5770_s25 }
  0xa3   : > { %511 = vmatprep.subr.bf16.mxu0 %v5868_v4  ;;  %v5913_v19 = vld [vmem:[#allocation5 + $0x114] ss:$8 sps:$4 sm:$0xff]   ;;  %v5885_v20 = vld [vmem:[#allocation5 + $0x70] ss:$8 sps:$4 sm:$0xff]   ;;  %758 = vmatprep.subr.bf16.mxu1 %v5910_v16  ;;  %v5916_v22 = vld [vmem:[#allocation5 + $0x124] ss:$8 sps:$4 sm:$0xff]  }
  0xa4   : > { %539 = vmatprep.mubr.bf16.mxu0 %v302_v15  ;;  %759 = vmatpush1.bf16.msra.mxu1 %v5912_v17  ;;  %v5915_v21 = vld [vmem:[#allocation5 + $0x110] ss:$8 sps:$4 sm:$0xff]   ;;  %v5886_v23 = vld [vmem:[#allocation5 + $0x84] ss:$8 sps:$4 sm:$0xff]   ;;  %v5888_v24 = vld [vmem:[#allocation5 + $0x80] ss:$8 sps:$4 sm:$0xff]  }
  0xa5   : > { %760 = vmatprep.subr.bf16.mxu1 %v5913_v19  ;;  %v5918_v25 = vld [vmem:[#allocation5 + $0x120] ss:$8 sps:$4 sm:$0xff]   ;;  %v5919_v26 = vld [vmem:[#allocation5 + $0x134] ss:$8 sps:$4 sm:$0xff]   ;;  %v5891_v28 = vld [vmem:[#allocation5 + $0x90] ss:$8 sps:$4 sm:$0xff]  }
  0xa6   : > { %512 = vmatpush1.bf16.msra.mxu0 %v5870_v5  ;;  %v5889_v27 = vld [vmem:[#allocation5 + $0x94] ss:$8 sps:$4 sm:$0xff]   ;;  %v5921_v29 = vld [vmem:[#allocation5 + $0x130] ss:$8 sps:$4 sm:$0xff]   ;;  %v5922_v30 = vld [vmem:[#allocation5 + $0x144] ss:$8 sps:$4 sm:$0xff]  }
  0xa7   : > { %513 = vmatprep.subr.bf16.mxu0 %v5871_v6  ;;  %v5892_v31 = vld [vmem:[#allocation5 + $0xa4] ss:$8 sps:$4 sm:$0xff]   ;;  %v5894_v32 = vld [vmem:[#allocation5 + $0xa0] ss:$8 sps:$4 sm:$0xff]   ;;  %v5925_v34 = vld [vmem:[#allocation5 + $0x154] ss:$8 sps:$4 sm:$0xff]  }
  0xa8   : > { %761 = vmatpush1.bf16.msra.mxu1 %v5915_v21  ;;  %v5924_v33 = vld [vmem:[#allocation5 + $0x140] ss:$8 sps:$4 sm:$0xff]   ;;  %v5895_v35 = vld [vmem:[#allocation5 + $0xb4] ss:$8 sps:$4 sm:$0xff]   ;;  %v5927_v36 = vld [vmem:[#allocation5 + $0x150] ss:$8 sps:$4 sm:$0xff]  }
  0xa9   : > { %762 = vmatprep.subr.bf16.mxu1 %v5916_v22  ;;  %v5897_v37 = vld [vmem:[#allocation5 + $0xb0] ss:$8 sps:$4 sm:$0xff]   ;;  %v5928_v38 = vld [vmem:[#allocation5 + $0x164] ss:$8 sps:$4 sm:$0xff]   ;;  %v5930_v40 = vld [vmem:[#allocation5 + $0x160] ss:$8 sps:$4 sm:$0xff]  }
  0xaa   : > { %514 = vmatpush1.bf16.msra.mxu0 %v5873_v7  ;;  %v5898_v39 = vld [vmem:[#allocation5 + $0xc4] ss:$8 sps:$4 sm:$0xff]   ;;  %v5900_v41 = vld [vmem:[#allocation5 + $0xc0] ss:$8 sps:$4 sm:$0xff]   ;;  %v5931_v42 = vld [vmem:[#allocation5 + $0x174] ss:$8 sps:$4 sm:$0xff]  }
  0xab   : > { %515 = vmatprep.subr.bf16.mxu0 %v5874_v8  ;;  %v5901_v43 = vld [vmem:[#allocation5 + $0xd4] ss:$8 sps:$4 sm:$0xff]   ;;  %v5933_v44 = vld [vmem:[#allocation5 + $0x170] ss:$8 sps:$4 sm:$0xff]   ;;  %v5934_v46 = vld [vmem:[#allocation5 + $0x184] ss:$8 sps:$4 sm:$0xff]  }
  0xac   : > { %763 = vmatpush1.bf16.msra.mxu1 %v5918_v25  ;;  %v5903_v45 = vld [vmem:[#allocation5 + $0xd0] ss:$8 sps:$4 sm:$0xff]   ;;  %v5904_v47 = vld [vmem:[#allocation5 + $0xe4] ss:$8 sps:$4 sm:$0xff]   ;;  %v5936_v48 = vld [vmem:[#allocation5 + $0x180] ss:$8 sps:$4 sm:$0xff]  }
  0xad   : > { %764 = vmatprep.subr.bf16.mxu1 %v5919_v26  ;;  %v5906_v49 = vld [vmem:[#allocation5 + $0xe0] ss:$8 sps:$4 sm:$0xff]   ;;  %v5937_v50 = vld [vmem:[#allocation5 + $0x194] ss:$8 sps:$4 sm:$0xff]   ;;  %v5939_v52 = vld [vmem:[#allocation5 + $0x190] ss:$8 sps:$4 sm:$0xff]  }
  0xae   : > { %516 = vmatpush1.bf16.msra.mxu0 %v5876_v9  ;;  %v5907_v51 = vld [vmem:[#allocation5 + $0xf4] ss:$8 sps:$4 sm:$0xff]   ;;  %v5909_v53 = vld [vmem:[#allocation5 + $0xf0] ss:$8 sps:$4 sm:$0xff]   ;;  %v5940_v55 = vld [vmem:[#allocation5 + $0x1a4] ss:$8 sps:$4 sm:$0xff]  }
  0xaf   : > { %517 = vmatprep.subr.bf16.mxu0 %v5877_v10  ;;  %v5942_v56 = vld [vmem:[#allocation5 + $0x1a0] ss:$8 sps:$4 sm:$0xff]   ;;  %v5943_v57 = vld [vmem:[#allocation5 + $0x1b4] ss:$8 sps:$4 sm:$0xff]   ;;  %v5945_v59 = vld [vmem:[#allocation5 + $0x1b0] ss:$8 sps:$4 sm:$0xff]  }
  0xb0   : > { %765 = vmatpush1.bf16.msra.mxu1 %v5921_v29  ;;  %v5946_v60 = vld [vmem:[#allocation5 + $0x1c4] ss:$8 sps:$4 sm:$0xff]   ;;  %v5948_v61 = vld [vmem:[#allocation5 + $0x1c0] ss:$8 sps:$4 sm:$0xff]   ;;  %v5949_v62 = vld [vmem:[#allocation5 + $0x1d4] ss:$8 sps:$4 sm:$0xff]  }
  0xb1   : > { %766 = vmatprep.subr.bf16.mxu1 %v5922_v30  ;;  %v5951_v63 = vld [vmem:[#allocation5 + $0x1d0] ss:$8 sps:$4 sm:$0xff]   ;;  %v5952_v0 = vld [vmem:[#allocation5 + $0x1e4] ss:$8 sps:$4 sm:$0xff]   ;;  %v5954_v1 = vld [vmem:[#allocation5 + $0x1e0] ss:$8 sps:$4 sm:$0xff]  }
  0xb2   : > { %518 = vmatpush1.bf16.msra.mxu0 %v5879_v11  ;;  %v5955_v2 = vld [vmem:[#allocation5 + $0x1f4] ss:$8 sps:$4 sm:$0xff]   ;;  %v5957_v3 = vld [vmem:[#allocation5 + $0x1f0] ss:$8 sps:$4 sm:$0xff]   ;;  %v5958_v4 = vld [vmem:[#allocation5 + $0x200] ss:$8 sps:$4 sm:$0xff]  }
  0xb3   : > { %519 = vmatprep.subr.bf16.mxu0 %v5880_v12  ;;  %v5960_v5 = vld [vmem:[#allocation5 + $0x204] ss:$8 sps:$4 sm:$0xff]   ;;  %v5963_v6 = vld [vmem:[#allocation5 + $0x214] ss:$8 sps:$4 sm:$0xff]   ;;  %v5961_v7 = vld [vmem:[#allocation5 + $0x210] ss:$8 sps:$4 sm:$0xff]  }
  0xb4   : > { %767 = vmatpush1.bf16.msra.mxu1 %v5924_v33  ;;  %v5966_v8 = vld [vmem:[#allocation5 + $0x224] ss:$8 sps:$4 sm:$0xff]   ;;  %v5964_v9 = vld [vmem:[#allocation5 + $0x220] ss:$8 sps:$4 sm:$0xff]   ;;  %v5969_v10 = vld [vmem:[#allocation5 + $0x234] ss:$8 sps:$4 sm:$0xff]  }
  0xb5   : > { %768 = vmatprep.subr.bf16.mxu1 %v5925_v34  ;;  %v5967_v11 = vld [vmem:[#allocation5 + $0x230] ss:$8 sps:$4 sm:$0xff]   ;;  %v5972_v12 = vld [vmem:[#allocation5 + $0x244] ss:$8 sps:$4 sm:$0xff]   ;;  %v5975_v14 = vld [vmem:[#allocation5 + $0x254] ss:$8 sps:$4 sm:$0xff]  }
  0xb6   : > { %520 = vmatpush1.bf16.msra.mxu0 %v5882_v13  ;;  %v5970_v13 = vld [vmem:[#allocation5 + $0x240] ss:$8 sps:$4 sm:$0xff]   ;;  %v5973_v15 = vld [vmem:[#allocation5 + $0x250] ss:$8 sps:$4 sm:$0xff]   ;;  %v5978_v16 = vld [vmem:[#allocation5 + $0x264] ss:$8 sps:$4 sm:$0xff]  }
  0xb7   : > { %521 = vmatprep.subr.bf16.mxu0 %v5883_v18  ;;  %v5976_v17 = vld [vmem:[#allocation5 + $0x260] ss:$8 sps:$4 sm:$0xff]   ;;  %v5981_v18 = vld [vmem:[#allocation5 + $0x274] ss:$8 sps:$4 sm:$0xff]   ;;  %v5979_v19 = vld [vmem:[#allocation5 + $0x270] ss:$8 sps:$4 sm:$0xff]  }
  0xb8   : > { %769 = vmatpush1.bf16.msra.mxu1 %v5927_v36  ;;  %v5982_v21 = vld [vmem:[#allocation5 + $0x280] ss:$8 sps:$4 sm:$0xff]   ;;  %v5987_v22 = vld [vmem:[#allocation5 + $0x294] ss:$8 sps:$4 sm:$0xff]   ;;  %s5063_s27 = sshll.u32 %s298_s12, 4  ;;  %s5049_s24 = scalar_lea.sflag [#allocation4], %s7217_s26  ;;  %s7409_s27 = int_to_ptr.vmem [resolvable:$true] %s5063_s27 }
  0xb9   : > { %770 = vmatprep.subr.bf16.mxu1 %v5928_v38  ;;  %v5988_v25 = vld [vmem:[#allocation5 + $0x2a0] ss:$8 sps:$4 sm:$0xff]   ;;  %v5993_v26 = vld [vmem:[#allocation5 + $0x2b4] ss:$8 sps:$4 sm:$0xff]   ;;  %s6880_s10 = scalar_lea.vmem %s7409_s27, 256  ;;  %p7474_p0 = scmp.ne.s32.totalorder %s7466_s23, 0 }
  0xba   : > { %522 = vmatpush1.bf16.msra.mxu0 %v5885_v20  ;;  %v5984_v20 = vld [vmem:[#allocation5 + $0x284] ss:$8 sps:$4 sm:$0xff]   ;;  %v5994_v29 = vld [vmem:[#allocation5 + $0x2c0] ss:$8 sps:$4 sm:$0xff]   ;;  %v5999_v30 = vld [vmem:[#allocation5 + $0x2d4] ss:$8 sps:$4 sm:$0xff]   ;;  %p6881_p6 = scmp.ne.s32.totalorder %s7409_s27, %s6880_s10 }
  0xbb   : > { %523 = vmatprep.subr.bf16.mxu0 %v5886_v23  ;;  %v5985_v23 = vld [vmem:[#allocation5 + $0x290] ss:$8 sps:$4 sm:$0xff]   ;;  %s6965_s16 = smov [#allocation11]  }
  0xbc   : > { %771 = vmatpush1.bf16.msra.mxu1 %v5930_v40  ;;  %p6882_p2 = pnand %p6881_p6, %p7474_p0  ;;  %s6884_s13 = sshll.u32 %s6965_s16, 4  ;;  %s6885_s13 = int_to_ptr.vmem [resolvable:$false] %s6884_s13 }
  0xbd   : > { %772 = vmatprep.subr.bf16.mxu1 %v5931_v42  ;;  %s6886_s17 = scalar_lea.vmem %s6885_s13, 512  ;;  %p6887_p10 = scmp.lt.s32.totalorder %s7409_s27, %s6885_s13 }
  0xbe   : > { %524 = vmatpush1.bf16.msra.mxu0 %v5888_v24  ;;  %v5990_v24 = vld [vmem:[#allocation5 + $0x2a4] ss:$8 sps:$4 sm:$0xff]   ;;  %p6883_p5 = pneg %p6882_p2  ;;  %p6888_p1 = scmp.lt.s32.totalorder %s6886_s17, %s6880_s10 }
  0xbf   : > { %525 = vmatprep.subr.bf16.mxu0 %v5889_v27  ;;  %v5991_v27 = vld [vmem:[#allocation5 + $0x2b0] ss:$8 sps:$4 sm:$0xff]  }
  0xc0   : > { %773 = vmatpush1.bf16.msra.mxu1 %v5933_v44  ;;  %p6889_p11 = por %p6888_p1, %p6887_p10 }
  0xc1   : > { %774 = vmatprep.subr.bf16.mxu1 %v5934_v46 }
  0xc2   : > { %526 = vmatpush1.bf16.msra.mxu0 %v5891_v28  ;;  %v5996_v28 = vld [vmem:[#allocation5 + $0x2c4] ss:$8 sps:$4 sm:$0xff]   ;;  %p6890_p12 = pnand %p6889_p11, %p6883_p5 }
  0xc3   : > { %527 = vmatprep.subr.bf16.mxu0 %v5892_v31  ;;  %v5997_v31 = vld [vmem:[#allocation5 + $0x2d0] ss:$8 sps:$4 sm:$0xff]  }
  0xc4   : > { %775 = vmatpush1.bf16.msra.mxu1 %v5936_v48 }
  0xc5   : > { %776 = vmatprep.subr.bf16.mxu1 %v5937_v50  ;;  %v6000_v50 = vld [vmem:[#allocation5 + $0x2e0] ss:$8 sps:$4 sm:$0xff]  }
  0xc6   : > { %528 = vmatpush1.bf16.msra.mxu0 %v5894_v32  ;;  %v337_v32 = vlaneseq }
  0xc7   : > { %529 = vmatprep.subr.bf16.mxu0 %v5895_v35  ;;  %v335_v35 = vld [vmem:[#allocation7] sm:$0x3] }
  0xc8   : > { %777 = vmatpush1.bf16.msra.mxu1 %v5939_v52  ;;  %v338_v33 = vshrl.u32 %v337_v32, 7  ;;  %v6003_v52 = vld [vmem:[#allocation5 + $0x2f0] ss:$8 sps:$4 sm:$0xff]   ;;  %v6032_v32 = vld [vmem:[#allocation5 + $0x384] ss:$8 sps:$4 sm:$0xff]  }
  0xc9   : > { %778 = vmatprep.subr.bf16.mxu1 %v5940_v55 }
  0xca   : > { %530 = vmatpush1.bf16.msra.mxu0 %v5897_v37  ;;  %v7239_v34 = vsub.s32 0, %v338_v33  ;;  %v7241_v36 = vsub.s32 1, %v338_v33  ;;  %v6030_v33 = vld [vmem:[#allocation5 + $0x380] ss:$8 sps:$4 sm:$0xff]  }
  0xcb   : > { %531 = vmatprep.subr.bf16.mxu0 %v5898_v39 }
  0xcc   : > { %779 = vmatpush1.bf16.msra.mxu1 %v5942_v56  ;;  %v340_v37 = vrot.slane %v335_v35, %v7239_v34  ;;  %v344_v38 = vrot.slane %v335_v35, %v7241_v36  ;;  %v6035_v35 = vld [vmem:[#allocation5 + $0x394] ss:$8 sps:$4 sm:$0xff]  }
  0xcd   : > { %780 = vmatprep.subr.bf16.mxu1 %v5943_v57 }
  0xce   : > { %532 = vmatpush1.bf16.msra.mxu0 %v5900_v41 }
  0xcf   : > { %533 = vmatprep.subr.bf16.mxu0 %v5901_v43 }
  0xd0   : > { %781 = vmatpush1.bf16.msra.mxu1 %v5945_v59 }
  0xd1   : > { %782 = vmatprep.subr.bf16.mxu1 %v5946_v60 }
  0xd2   : > { %534 = vmatpush1.bf16.msra.mxu0 %v5903_v45 }
  0xd3   : > { %535 = vmatprep.subr.bf16.mxu0 %v5904_v47 }
  0xd4   : > { %783 = vmatpush1.bf16.msra.mxu1 %v5948_v61 }
  0xd5   : > { %784 = vmatprep.subr.bf16.mxu1 %v5949_v62 }
  0xd6   : > { %536 = vmatpush1.bf16.msra.mxu0 %v5906_v49  ;;  %v6002_v49 = vld [vmem:[#allocation5 + $0x2e4] ss:$8 sps:$4 sm:$0xff]  }
  0xd7   : > { %537 = vmatprep.subr.bf16.mxu0 %v5907_v51  ;;  %v6005_v51 = vld [vmem:[#allocation5 + $0x2f4] ss:$8 sps:$4 sm:$0xff]  }
  0xd8   : > { %785 = vmatpush1.bf16.msra.mxu1 %v5951_v63 }
  0xd9   : > { %786 = vmatprep.subr.bf16.mxu1 %v5952_v0 }
  0xda   : > { %538 = vmatpush1.bf16.msra.mxu0 %v5909_v53  ;;  %v586_v53 = vld [vmem:[#allocation7 + $0x2] sm:$0x3] }
  0xdb   : > { %1009 = vmatprep.subr.bf16.mxu0 %v5960_v5  ;;  %v591_v54 = vrot.slane %v586_v53, %v7239_v34  ;;  %v595_v55 = vrot.slane %v586_v53, %v7241_v36  ;;  %v6050_v53 = vld [vmem:[#allocation5 + $0x3e4] ss:$8 sps:$4 sm:$0xff]  }
  0xdc   : > { %787 = vmatpush1.bf16.msra.mxu1 %v5954_v1 }
  0xdd   : > { %540 = vmatmul.mubr.bf16.vlgmr.msra.gmra.mrb[0].mxu0 %v301_v58  ;;  %788 = vmatprep.subr.bf16.mxu1 %v5955_v2  ;;  %v837_v2 = vld [vmem:[#allocation7 + $0x4] sm:$0x3] }
  0xde   : > { %1010 = vmatpush1.bf16.msra.mxu0 %v5958_v4  ;;  %v846_v4 = vrot.slane %v837_v2, %v7241_v36 }
  0xdf   : > { %1011 = vmatprep.subr.bf16.mxu0 %v5963_v6 }
  0xe0   : > { %789 = vmatpush1.bf16.msra.mxu1 %v5957_v3  ;;  %v842_v3 = vrot.slane %v837_v2, %v7239_v34  ;;  %v6066_v2 = vld [vmem:[#allocation5 + $0x440] ss:$8 sps:$4 sm:$0xff]  }
  0xe2   : > { %1012 = vmatpush1.bf16.msra.mxu0 %v5961_v7 }
  0xe3   : > { %1013 = vmatprep.subr.bf16.mxu0 %v5966_v8 }
  0xe6   : > { %1014 = vmatpush1.bf16.msra.mxu0 %v5964_v9 }
  0xe7   : > { %1015 = vmatprep.subr.bf16.mxu0 %v5969_v10 }
  0xea   : > { %1016 = vmatpush1.bf16.msra.mxu0 %v5967_v11  ;;  %v6736_v11 = vld [vmem:[%s7223_s15] sm:$0xff] }
  0xeb   : > { %1017 = vmatprep.subr.bf16.mxu0 %v5972_v12 }
  0xee   : > { %1018 = vmatpush1.bf16.msra.mxu0 %v5970_v13  ;;  %v6737_v13 = vld [vmem:[%s7223_s15 + $0x8] sm:$0xff] }
  0xef   : > { %1019 = vmatprep.subr.bf16.mxu0 %v5975_v14 }
  0xf2   : > { %1020 = vmatpush1.bf16.msra.mxu0 %v5973_v15 }
  0xf3   : > { %1021 = vmatprep.subr.bf16.mxu0 %v5978_v16  ;;  %v6006_v16 = vld [vmem:[#allocation5 + $0x300] ss:$8 sps:$4 sm:$0xff]  }
  0xf6   : > { %1022 = vmatpush1.bf16.msra.mxu0 %v5976_v17  ;;  %v6008_v17 = vld [vmem:[#allocation5 + $0x304] ss:$8 sps:$4 sm:$0xff]  }
  0xf7   : > { %1023 = vmatprep.subr.bf16.mxu0 %v5981_v18  ;;  %v6011_v18 = vld [vmem:[#allocation5 + $0x314] ss:$8 sps:$4 sm:$0xff]   ;;  %1305 = vmatprep.subr.bf16.mxu1 %v6008_v17  ;;  %v6092_v17 = vld [vmem:[#allocation5 + $0x4c4] ss:$8 sps:$4 sm:$0xff]  }
  0xfa   : > { %1024 = vmatpush1.bf16.msra.mxu0 %v5979_v19  ;;  %v6009_v19 = vld [vmem:[#allocation5 + $0x310] ss:$8 sps:$4 sm:$0xff]  }
  0xfb   : > { %1025 = vmatprep.subr.bf16.mxu0 %v5984_v20  ;;  %v6014_v20 = vld [vmem:[#allocation5 + $0x324] ss:$8 sps:$4 sm:$0xff]  }
  0xfe   : > { %1026 = vmatpush1.bf16.msra.mxu0 %v5982_v21  ;;  %v6012_v21 = vld [vmem:[#allocation5 + $0x320] ss:$8 sps:$4 sm:$0xff]  }
  0xff   : > { %1027 = vmatprep.subr.bf16.mxu0 %v5987_v22  ;;  %v6017_v22 = vld [vmem:[#allocation5 + $0x334] ss:$8 sps:$4 sm:$0xff]  }
 0x102   : > { %1028 = vmatpush1.bf16.msra.mxu0 %v5985_v23  ;;  %v6015_v23 = vld [vmem:[#allocation5 + $0x330] ss:$8 sps:$4 sm:$0xff]  }
 0x103   : > { %1029 = vmatprep.subr.bf16.mxu0 %v5990_v24  ;;  %v6020_v24 = vld [vmem:[#allocation5 + $0x344] ss:$8 sps:$4 sm:$0xff]  }
 0x106   : > { %1030 = vmatpush1.bf16.msra.mxu0 %v5988_v25  ;;  %v6018_v25 = vld [vmem:[#allocation5 + $0x340] ss:$8 sps:$4 sm:$0xff]  }
 0x107   : > { %1031 = vmatprep.subr.bf16.mxu0 %v5993_v26  ;;  %v6023_v26 = vld [vmem:[#allocation5 + $0x354] ss:$8 sps:$4 sm:$0xff]  }
 0x10a   : > { %1032 = vmatpush1.bf16.msra.mxu0 %v5991_v27  ;;  %v6021_v27 = vld [vmem:[#allocation5 + $0x350] ss:$8 sps:$4 sm:$0xff]  }
 0x10b   : > { %1033 = vmatprep.subr.bf16.mxu0 %v5996_v28  ;;  %v6026_v28 = vld [vmem:[#allocation5 + $0x364] ss:$8 sps:$4 sm:$0xff]  }
 0x10e   : > { %1034 = vmatpush1.bf16.msra.mxu0 %v5994_v29  ;;  %v6024_v29 = vld [vmem:[#allocation5 + $0x360] ss:$8 sps:$4 sm:$0xff]  }
 0x10f   : > { %1035 = vmatprep.subr.bf16.mxu0 %v5999_v30  ;;  %v6029_v30 = vld [vmem:[#allocation5 + $0x374] ss:$8 sps:$4 sm:$0xff]  }
 0x112   : > { %1036 = vmatpush1.bf16.msra.mxu0 %v5997_v31  ;;  %v6027_v31 = vld [vmem:[#allocation5 + $0x370] ss:$8 sps:$4 sm:$0xff]  }
 0x113   : > { %1037 = vmatprep.subr.bf16.mxu0 %v6002_v49  ;;  %v6044_v49 = vld [vmem:[#allocation5 + $0x3c4] ss:$8 sps:$4 sm:$0xff]  }
 0x116   : > { %1038 = vmatpush1.bf16.msra.mxu0 %v6000_v50  ;;  %v6042_v50 = vld [vmem:[#allocation5 + $0x3c0] ss:$8 sps:$4 sm:$0xff]  }
 0x117   : > { %1039 = vmatprep.subr.bf16.mxu0 %v6005_v51  ;;  %v6047_v51 = vld [vmem:[#allocation5 + $0x3d4] ss:$8 sps:$4 sm:$0xff]  }
 0x11a   : > { %1040 = vmatpush1.bf16.msra.mxu0 %v6003_v52  ;;  %v6045_v52 = vld [vmem:[#allocation5 + $0x3d0] ss:$8 sps:$4 sm:$0xff]  }
 0x1b0   : > { %v541_v39 = vpop.f32.mrb[0].mxu0 }
 0x1b1   : > { %v542_v40 = vadd.f32 %v541_v39, %v340_v37  ;;  %v543_v41 = vpop.f32.mrb[1].mxu0  ;;  %v6033_v37 = vld [vmem:[#allocation5 + $0x390] ss:$8 sps:$4 sm:$0xff]  }
 0x1b2   : > { %v544_v42 = vadd.f32 %v543_v41, %v344_v38  ;;  %v545_v43 = vpop.f32.mrb[2].mxu0 }
 0x1b3   : > { %v548_v44 = vmax.f32 %v542_v40, 0.0  ;;  %v546_v45 = vpop.f32.mrb[3].mxu0 }
 0x1b4   : > { %v549_v46 = vmax.f32 %v544_v42, 0.0  ;;  %v6038_v45 = vld [vmem:[#allocation5 + $0x3a4] ss:$8 sps:$4 sm:$0xff]  }
 0x1b5   : > { %v550_v48 = vpack.c.bf16 %v548_v44, %v548_v44 }
 0x1b6   : > { %v551_v47 = vpack.c.bf16 %v549_v46, %v549_v46  ;;  %v6036_v46 = vld [vmem:[#allocation5 + $0x3a0] ss:$8 sps:$4 sm:$0xff]  }
 0x1b8   : > { %790 = vmatprep.mubr.bf16.mxu1 %v551_v47  ;;  %v6041_v47 = vld [vmem:[#allocation5 + $0x3b4] ss:$8 sps:$4 sm:$0xff]  }
 0x1b9   : > { %791 = vmatmul.mubr.bf16.vlgmr.msra.gmra.mrb[0].mxu1 %v550_v48  ;;  %v6039_v48 = vld [vmem:[#allocation5 + $0x3b0] ss:$8 sps:$4 sm:$0xff]  }
 0x1ba   : > { %1306 = vmatpush1.bf16.msra.mxu1 %v6006_v16  ;;  %v6087_v16 = vld [vmem:[#allocation5 + $0x4b0] ss:$8 sps:$4 sm:$0xff]  }
 0x1bb   : > { %1307 = vmatprep.subr.bf16.mxu1 %v6011_v18  ;;  %v6090_v18 = vld [vmem:[#allocation5 + $0x4c0] ss:$8 sps:$4 sm:$0xff]  }
 0x1be   : > { %1308 = vmatpush1.bf16.msra.mxu1 %v6009_v19  ;;  %v6095_v19 = vld [vmem:[#allocation5 + $0x4d4] ss:$8 sps:$4 sm:$0xff]  }
 0x1bf   : > { %1309 = vmatprep.subr.bf16.mxu1 %v6014_v20  ;;  %v6093_v20 = vld [vmem:[#allocation5 + $0x4d0] ss:$8 sps:$4 sm:$0xff]  }
 0x1c2   : > { %1310 = vmatpush1.bf16.msra.mxu1 %v6012_v21 }
 0x1c3   : > { %1311 = vmatprep.subr.bf16.mxu1 %v6017_v22 }
 0x1c6   : > { %1312 = vmatpush1.bf16.msra.mxu1 %v6015_v23 }
 0x1c7   : > { %1313 = vmatprep.subr.bf16.mxu1 %v6020_v24  ;;  %v1069_v24 = vld [vmem:[#allocation8] sm:$0x3] }
 0x1ca   : > { %1314 = vmatpush1.bf16.msra.mxu1 %v6018_v25  ;;  %v1083_v25 = vld [vmem:[#allocation10] sm:$0x3] }
 0x1cb   : > { %1315 = vmatprep.subr.bf16.mxu1 %v6023_v26  ;;  %v1074_v26 = vrot.slane %v1069_v24, %v7239_v34 }
 0x1ce   : > { %1316 = vmatpush1.bf16.msra.mxu1 %v6021_v27  ;;  %v1078_v27 = vrot.slane %v1069_v24, %v7241_v36  ;;  %v6149_v24 = vld [vmem:[#allocation5 + $0x5f4] ss:$8 sps:$4 sm:$0xff]  }
 0x1cf   : > { %1317 = vmatprep.subr.bf16.mxu1 %v6026_v28 }
 0x1d2   : > { %1318 = vmatpush1.bf16.msra.mxu1 %v6024_v29 }
 0x1d3   : > { %1319 = vmatprep.subr.bf16.mxu1 %v6029_v30 }
 0x1d6   : > { %1320 = vmatpush1.bf16.msra.mxu1 %v6027_v31  ;;  %v1088_v31 = vrot.slane %v1083_v25, %v7239_v34 }
 0x1d7   : > { %1321 = vmatprep.subr.bf16.mxu1 %v6032_v32  ;;  %v1092_v32 = vrot.slane %v1083_v25, %v7241_v36  ;;  %v6147_v25 = vld [vmem:[#allocation5 + $0x5f0] ss:$8 sps:$4 sm:$0xff]  }
 0x1da   : > { %1322 = vmatpush1.bf16.msra.mxu1 %v6030_v33 }
 0x1db   : > { %1323 = vmatprep.subr.bf16.mxu1 %v6035_v35 }
 0x1de   : > { %1324 = vmatpush1.bf16.msra.mxu1 %v6033_v37 }
 0x1df   : > { %1325 = vmatprep.subr.bf16.mxu1 %v6038_v45  ;;  %v6102_v45 = vld [vmem:[#allocation5 + $0x500] ss:$8 sps:$4 sm:$0xff]  }
 0x1e2   : > { %1326 = vmatpush1.bf16.msra.mxu1 %v6036_v46  ;;  %v6104_v46 = vld [vmem:[#allocation5 + $0x504] ss:$8 sps:$4 sm:$0xff]  }
 0x1e3   : > { %1327 = vmatprep.subr.bf16.mxu1 %v6041_v47  ;;  %v6107_v47 = vld [vmem:[#allocation5 + $0x514] ss:$8 sps:$4 sm:$0xff]  }
 0x1e6   : > { %1328 = vmatpush1.bf16.msra.mxu1 %v6039_v48  ;;  %v6105_v48 = vld [vmem:[#allocation5 + $0x510] ss:$8 sps:$4 sm:$0xff]  }
 0x1e7   : > { %1329 = vmatprep.subr.bf16.mxu1 %v6044_v49  ;;  %v6110_v49 = vld [vmem:[#allocation5 + $0x524] ss:$8 sps:$4 sm:$0xff]  }
 0x1ea   : > { %1330 = vmatpush1.bf16.msra.mxu1 %v6042_v50  ;;  %v6108_v50 = vld [vmem:[#allocation5 + $0x520] ss:$8 sps:$4 sm:$0xff]  }
 0x1eb   : > { %1331 = vmatprep.subr.bf16.mxu1 %v6047_v51  ;;  %v6113_v51 = vld [vmem:[#allocation5 + $0x534] ss:$8 sps:$4 sm:$0xff]  }
 0x1ee   : > { %1332 = vmatpush1.bf16.msra.mxu1 %v6045_v52  ;;  %v6111_v52 = vld [vmem:[#allocation5 + $0x530] ss:$8 sps:$4 sm:$0xff]  }
 0x1ef   : > { %1333 = vmatprep.subr.bf16.mxu1 %v6050_v53  ;;  %v6116_v53 = vld [vmem:[#allocation5 + $0x544] ss:$8 sps:$4 sm:$0xff]  }
 0x28c   : > { %v792_v56 = vpop.f32.mrb[0].mxu1 }
 0x28d   : > { %v793_v57 = vadd.f32 %v792_v56, %v591_v54  ;;  %v794_v58 = vpop.f32.mrb[1].mxu1  ;;  %v6048_v54 = vld [vmem:[#allocation5 + $0x3e0] ss:$8 sps:$4 sm:$0xff]   ;;  %v6051_v56 = vld [vmem:[#allocation5 + $0x3f0] ss:$8 sps:$4 sm:$0xff]  }
 0x28e   : > { %v795_v59 = vadd.f32 %v794_v58, %v595_v55  ;;  %v796_v60 = vpop.f32.mrb[2].mxu1  ;;  %v6053_v55 = vld [vmem:[#allocation5 + $0x3f4] ss:$8 sps:$4 sm:$0xff]   ;;  %1334 = vmatpush1.bf16.msra.mxu1 %v6048_v54  ;;  %v6056_v58 = vld [vmem:[#allocation5 + $0x404] ss:$8 sps:$4 sm:$0xff]  }
 0x28f   : > { %v799_v61 = vmax.f32 %v793_v57, 0.0  ;;  %v797_v62 = vpop.f32.mrb[3].mxu1  ;;  %1335 = vmatprep.subr.bf16.mxu1 %v6053_v55  ;;  %v6054_v57 = vld [vmem:[#allocation5 + $0x400] ss:$8 sps:$4 sm:$0xff]   ;;  %1556 = vmatprep.subr.bf16.mxu0 %v6056_v58  ;;  %v6057_v60 = vld [vmem:[#allocation5 + $0x410] ss:$8 sps:$4 sm:$0xff]  }
 0x290   : > { %v800_v63 = vmax.f32 %v795_v59, 0.0  ;;  %v6059_v59 = vld [vmem:[#allocation5 + $0x414] ss:$8 sps:$4 sm:$0xff]   ;;  %v6060_v62 = vld [vmem:[#allocation5 + $0x420] ss:$8 sps:$4 sm:$0xff]  }
 0x291   : > { %v801_v1 = vpack.c.bf16 %v799_v61, %v799_v61  ;;  %v6062_v61 = vld [vmem:[#allocation5 + $0x424] ss:$8 sps:$4 sm:$0xff]   ;;  %v6114_v54 = vld [vmem:[#allocation5 + $0x540] ss:$8 sps:$4 sm:$0xff]   ;;  %v6119_v55 = vld [vmem:[#allocation5 + $0x554] ss:$8 sps:$4 sm:$0xff]  }
 0x292   : > { %v802_v0 = vpack.c.bf16 %v800_v63, %v800_v63  ;;  %1336 = vmatpush1.bf16.msra.mxu1 %v6051_v56  ;;  %v6065_v63 = vld [vmem:[#allocation5 + $0x434] ss:$8 sps:$4 sm:$0xff]   ;;  %v6117_v56 = vld [vmem:[#allocation5 + $0x550] ss:$8 sps:$4 sm:$0xff]   ;;  %v6120_v58 = vld [vmem:[#allocation5 + $0x560] ss:$8 sps:$4 sm:$0xff]  }
 0x293   : > { %1807 = vmatprep.subr.bf16.mxu1 %v6104_v46 }
 0x294   : > { %1041 = vmatprep.mubr.bf16.mxu0 %v802_v0  ;;  %v6063_v0 = vld [vmem:[#allocation5 + $0x430] ss:$8 sps:$4 sm:$0xff]  }
 0x295   : > { %1042 = vmatmul.mubr.bf16.vlgmr.msra.gmra.mrb[4].mxu0 %v801_v1  ;;  %v6068_v1 = vld [vmem:[#allocation5 + $0x444] ss:$8 sps:$4 sm:$0xff]  }
 0x296   : > { %1557 = vmatpush1.bf16.msra.mxu0 %v6054_v57  ;;  %v6122_v57 = vld [vmem:[#allocation5 + $0x564] ss:$8 sps:$4 sm:$0xff]  }
 0x297   : > { %1558 = vmatprep.subr.bf16.mxu0 %v6059_v59  ;;  %v6125_v59 = vld [vmem:[#allocation5 + $0x574] ss:$8 sps:$4 sm:$0xff]  }
 0x29a   : > { %1559 = vmatpush1.bf16.msra.mxu0 %v6057_v60  ;;  %v6123_v60 = vld [vmem:[#allocation5 + $0x570] ss:$8 sps:$4 sm:$0xff]  }
 0x29b   : > { %1560 = vmatprep.subr.bf16.mxu0 %v6062_v61  ;;  %v6128_v61 = vld [vmem:[#allocation5 + $0x584] ss:$8 sps:$4 sm:$0xff]  }
 0x29e   : > { %1561 = vmatpush1.bf16.msra.mxu0 %v6060_v62  ;;  %v6126_v62 = vld [vmem:[#allocation5 + $0x580] ss:$8 sps:$4 sm:$0xff]  }
 0x29f   : > { %1562 = vmatprep.subr.bf16.mxu0 %v6065_v63  ;;  %v6131_v63 = vld [vmem:[#allocation5 + $0x594] ss:$8 sps:$4 sm:$0xff]  }
 0x2a2   : > { %1563 = vmatpush1.bf16.msra.mxu0 %v6063_v0  ;;  %v6129_v0 = vld [vmem:[#allocation5 + $0x590] ss:$8 sps:$4 sm:$0xff]  }
 0x2a3   : > { %1564 = vmatprep.subr.bf16.mxu0 %v6068_v1  ;;  %v6134_v1 = vld [vmem:[#allocation5 + $0x5a4] ss:$8 sps:$4 sm:$0xff]  }
 0x2a6   : > { %1565 = vmatpush1.bf16.msra.mxu0 %v6066_v2  ;;  %v6132_v2 = vld [vmem:[#allocation5 + $0x5a0] ss:$8 sps:$4 sm:$0xff]  }
 0x368   : > { %v1043_v5 = vpop.f32.mrb[4].mxu0 }
 0x369   : > { %v1044_v6 = vadd.f32 %v1043_v5, %v842_v3  ;;  %v1045_v7 = vpop.f32.mrb[5].mxu0  ;;  %v6071_v3 = vld [vmem:[#allocation5 + $0x454] ss:$8 sps:$4 sm:$0xff]   ;;  %v6074_v5 = vld [vmem:[#allocation5 + $0x464] ss:$8 sps:$4 sm:$0xff]  }
 0x36a   : > { %v1046_v8 = vadd.f32 %v1045_v7, %v846_v4  ;;  %v1047_v9 = vpop.f32.mrb[6].mxu0  ;;  %v6069_v4 = vld [vmem:[#allocation5 + $0x450] ss:$8 sps:$4 sm:$0xff]   ;;  %1566 = vmatprep.subr.bf16.mxu0 %v6071_v3  ;;  %v6077_v7 = vld [vmem:[#allocation5 + $0x474] ss:$8 sps:$4 sm:$0xff]  }
 0x36b   : > { %v1048_v10 = vpop.f32.mrb[7].mxu0  ;;  %v1050_v12 = vadd.f32 %v6736_v11, %v1044_v6  ;;  %1567 = vmatpush1.bf16.msra.mxu0 %v6069_v4  ;;  %v6072_v6 = vld [vmem:[#allocation5 + $0x460] ss:$8 sps:$4 sm:$0xff]   ;;  %v6080_v9 = vld [vmem:[#allocation5 + $0x484] ss:$8 sps:$4 sm:$0xff]  }
 0x36c   : > { %v1051_v14 = vadd.f32 %v6737_v13, %v1046_v8  ;;  %1568 = vmatprep.subr.bf16.mxu0 %v6074_v5  ;;  %v6075_v8 = vld [vmem:[#allocation5 + $0x470] ss:$8 sps:$4 sm:$0xff]   ;;  %v6078_v10 = vld [vmem:[#allocation5 + $0x480] ss:$8 sps:$4 sm:$0xff]   ;;  %v6083_v11 = vld [vmem:[#allocation5 + $0x494] ss:$8 sps:$4 sm:$0xff]  }
 0x36d   : > { %v6086_v13 = vld [vmem:[#allocation5 + $0x4a4] ss:$8 sps:$4 sm:$0xff]   ;;  %v6137_v3 = vld [vmem:[#allocation5 + $0x5b4] ss:$8 sps:$4 sm:$0xff]   ;;  %v6135_v4 = vld [vmem:[#allocation5 + $0x5b0] ss:$8 sps:$4 sm:$0xff]  }
 0x36e   : > { %v1052_v15 = vadd.f32 %v1051_v14, %v1050_v12  ;;  %v6140_v5 = vld [vmem:[#allocation5 + $0x5c4] ss:$8 sps:$4 sm:$0xff]  }
 0x36f   : > { %1569 = vmatpush1.bf16.msra.mxu0 %v6072_v6  ;;  %v6138_v6 = vld [vmem:[#allocation5 + $0x5c0] ss:$8 sps:$4 sm:$0xff]  }
 0x370   : > { %1053 = vadd.xlane.f32.xlu0 %v1052_v15  ;;  %1570 = vmatprep.subr.bf16.mxu0 %v6077_v7  ;;  %v6089_v15 = vld [vmem:[#allocation5 + $0x4b4] ss:$8 sps:$4 sm:$0xff]  }
 0x371   : > { %v6143_v7 = vld [vmem:[#allocation5 + $0x5d4] ss:$8 sps:$4 sm:$0xff]  }
 0x373   : > { %1571 = vmatpush1.bf16.msra.mxu0 %v6075_v8  ;;  %v6141_v8 = vld [vmem:[#allocation5 + $0x5d0] ss:$8 sps:$4 sm:$0xff]  }
 0x374   : > { %1572 = vmatprep.subr.bf16.mxu0 %v6080_v9  ;;  %v1133_v9 = vld [vmem:[#allocation7 + $0x6] sm:$0x3] }
 0x377   : > { %1573 = vmatpush1.bf16.msra.mxu0 %v6078_v10  ;;  %v1138_v10 = vrot.slane %v1133_v9, %v7239_v34 }
 0x378   : > { %1574 = vmatprep.subr.bf16.mxu0 %v6083_v11  ;;  %v1142_v11 = vrot.slane %v1133_v9, %v7241_v36 }
 0x3fd   : > { %v1054_v38 = vpop.xlane.xlu0 %1053 }
 0x3fe   : > { %v1056_v39 = vmul.f32 0.00390625, %v1054_v38 }
 0x400   : > { %v7251_v40 = vsub.f32 %v1050_v12, %v1056_v39  ;;  %v7253_v41 = vsub.f32 %v1051_v14, %v1056_v39  ;;  %v6081_v12 = vld [vmem:[#allocation5 + $0x490] ss:$8 sps:$4 sm:$0xff]   ;;  %v6084_v14 = vld [vmem:[#allocation5 + $0x4a0] ss:$8 sps:$4 sm:$0xff]  }
 0x401   : > { %1575 = vmatpush1.bf16.msra.mxu0 %v6081_v12 }
 0x402   : > { %v1059_v42 = vmul.f32 %v7251_v40, %v7251_v40  ;;  %v1060_v43 = vmul.f32 %v7253_v41, %v7253_v41  ;;  %1576 = vmatprep.subr.bf16.mxu0 %v6086_v13 }
 0x404   : > { %v1061_v44 = vadd.f32 %v1060_v43, %v1059_v42  ;;  %v6101_v43 = vld [vmem:[#allocation5 + $0x4f4] ss:$8 sps:$4 sm:$0xff]  }
 0x405   : > { %1577 = vmatpush1.bf16.msra.mxu0 %v6084_v14 }
 0x406   : > { %1062 = vadd.xlane.f32.xlu0 %v1061_v44  ;;  %1578 = vmatprep.subr.bf16.mxu0 %v6089_v15  ;;  %v6099_v44 = vld [vmem:[#allocation5 + $0x4f0] ss:$8 sps:$4 sm:$0xff]  }
 0x409   : > { %1579 = vmatpush1.bf16.msra.mxu0 %v6087_v16 }
 0x40a   : > { %1580 = vmatprep.subr.bf16.mxu0 %v6092_v17 }
 0x40d   : > { %1581 = vmatpush1.bf16.msra.mxu0 %v6090_v18 }
 0x40e   : > { %1582 = vmatprep.subr.bf16.mxu0 %v6095_v19 }
 0x411   : > { %1583 = vmatpush1.bf16.msra.mxu0 %v6093_v20 }
 0x493   : > { %v1063_v21 = vpop.xlane.xlu0 %1062 }
 0x494   : > { %v1064_v22 = vmul.f32 0.00390625, %v1063_v21 }
 0x496   : > { %v1065_v23 = vadd.f32 1e-05, %v1064_v22  ;;  %v6146_v22 = vld [vmem:[#allocation5 + $0x5e4] ss:$8 sps:$4 sm:$0xff]  }
 0x498   : > { %6726 = vrsqrt.f32 %v1065_v23  ;;  %v6144_v23 = vld [vmem:[#allocation5 + $0x5e0] ss:$8 sps:$4 sm:$0xff]  }
 0x4a2   : > { %v6727_v28 = vpop.eup %6726 }
 0x4a3   : > { %v1067_v29 = vmul.f32 %v6727_v28, %v7251_v40  ;;  %v1068_v30 = vmul.f32 %v6727_v28, %v7253_v41  ;;  %v6098_v40 = vld [vmem:[#allocation5 + $0x4e4] ss:$8 sps:$4 sm:$0xff]   ;;  %v6096_v41 = vld [vmem:[#allocation5 + $0x4e0] ss:$8 sps:$4 sm:$0xff]  }
 0x4a4   : > { %1584 = vmatprep.subr.bf16.mxu0 %v6098_v40 }
 0x4a5   : > { %v1082_v33 = vmul.f32 %v1078_v27, %v1068_v30  ;;  %v1081_v35 = vmul.f32 %v1074_v26, %v1067_v29  ;;  %1585 = vmatpush1.bf16.msra.mxu0 %v6096_v41  ;;  %v1384_v26 = vld [vmem:[#allocation7 + $0x8] sm:$0x3] }
 0x4a6   : > { %1586 = vmatprep.subr.bf16.mxu0 %v6101_v43  ;;  %v1389_v27 = vrot.slane %v1384_v26, %v7239_v34  ;;  %v1393_v28 = vrot.slane %v1384_v26, %v7241_v36  ;;  %v1635_v43 = vld [vmem:[#allocation7 + $0xa] sm:$0x3]  ;;  %v6197_v26 = vld [vmem:[#allocation5 + $0x6f4] ss:$8 sps:$4 sm:$0xff]  }
 0x4a7   : > { %v7265_v37 = vadd.f32 %v1092_v32, %v1082_v33  ;;  %v7267_v38 = vadd.f32 %v1088_v31, %v1081_v35 }
 0x4a9   : > { %v1098_v39 = vpack.c.bf16 %v7265_v37, %v7265_v37  ;;  %v1097_v42 = vpack.c.bf16 %v7267_v38, %v7267_v38  ;;  %1587 = vmatpush1.bf16.msra.mxu0 %v6099_v44  ;;  %v1640_v44 = vrot.slane %v1635_v43, %v7239_v34 }
 0x4ab   : > { %1337 = vmatprep.mubr.bf16.mxu1 %v1098_v39 }
 0x4ac   : > { %1338 = vmatmul.mubr.bf16.vlgmr.msra.gmra.mrb[4].mxu1 %v1097_v42 }
 0x4ad   : > { %1808 = vmatpush1.bf16.msra.mxu1 %v6102_v45  ;;  %v1644_v45 = vrot.slane %v1635_v43, %v7241_v36  ;;  %v6213_v43 = vld [vmem:[#allocation5 + $0x750] ss:$8 sps:$4 sm:$0xff]  }
 0x4ae   : > { %1809 = vmatprep.subr.bf16.mxu1 %v6107_v47 }
 0x4b1   : > { %1810 = vmatpush1.bf16.msra.mxu1 %v6105_v48 }
 0x4b2   : > { %1811 = vmatprep.subr.bf16.mxu1 %v6110_v49 }
 0x4b5   : > { %1812 = vmatpush1.bf16.msra.mxu1 %v6108_v50 }
 0x4b6   : > { %1813 = vmatprep.subr.bf16.mxu1 %v6113_v51 }
 0x4b9   : > { %1814 = vmatpush1.bf16.msra.mxu1 %v6111_v52 }
 0x4ba   : > { %1815 = vmatprep.subr.bf16.mxu1 %v6116_v53 }
 0x4bd   : > { %1816 = vmatpush1.bf16.msra.mxu1 %v6114_v54 }
 0x4be   : > { %1817 = vmatprep.subr.bf16.mxu1 %v6119_v55  ;;  %v6150_v55 = vld [vmem:[#allocation5 + $0x600] ss:$8 sps:$4 sm:$0xff]  }
 0x4c1   : > { %1818 = vmatpush1.bf16.msra.mxu1 %v6117_v56  ;;  %v6152_v56 = vld [vmem:[#allocation5 + $0x604] ss:$8 sps:$4 sm:$0xff]  }
 0x4c2   : > { %1819 = vmatprep.subr.bf16.mxu1 %v6122_v57  ;;  %v6155_v57 = vld [vmem:[#allocation5 + $0x614] ss:$8 sps:$4 sm:$0xff]   ;;  %2104 = vmatprep.subr.bf16.mxu0 %v6152_v56  ;;  %v6236_v56 = vld [vmem:[#allocation5 + $0x7c4] ss:$8 sps:$4 sm:$0xff]  }
 0x4c5   : > { %1820 = vmatpush1.bf16.msra.mxu1 %v6120_v58  ;;  %v6153_v58 = vld [vmem:[#allocation5 + $0x610] ss:$8 sps:$4 sm:$0xff]  }
 0x4c6   : > { %1821 = vmatprep.subr.bf16.mxu1 %v6125_v59  ;;  %v6158_v59 = vld [vmem:[#allocation5 + $0x624] ss:$8 sps:$4 sm:$0xff]  }
 0x4c9   : > { %1822 = vmatpush1.bf16.msra.mxu1 %v6123_v60  ;;  %v6156_v60 = vld [vmem:[#allocation5 + $0x620] ss:$8 sps:$4 sm:$0xff]  }
 0x4ca   : > { %1823 = vmatprep.subr.bf16.mxu1 %v6128_v61  ;;  %v6161_v61 = vld [vmem:[#allocation5 + $0x634] ss:$8 sps:$4 sm:$0xff]  }
 0x4cd   : > { %1824 = vmatpush1.bf16.msra.mxu1 %v6126_v62  ;;  %v6159_v62 = vld [vmem:[#allocation5 + $0x630] ss:$8 sps:$4 sm:$0xff]  }
 0x4ce   : > { %1825 = vmatprep.subr.bf16.mxu1 %v6131_v63  ;;  %v6167_v63 = vld [vmem:[#allocation5 + $0x654] ss:$8 sps:$4 sm:$0xff]  }
 0x4d1   : > { %1826 = vmatpush1.bf16.msra.mxu1 %v6129_v0  ;;  %v6165_v0 = vld [vmem:[#allocation5 + $0x650] ss:$8 sps:$4 sm:$0xff]  }
 0x4d2   : > { %1827 = vmatprep.subr.bf16.mxu1 %v6134_v1  ;;  %v6170_v1 = vld [vmem:[#allocation5 + $0x664] ss:$8 sps:$4 sm:$0xff]  }
 0x4d5   : > { %1828 = vmatpush1.bf16.msra.mxu1 %v6132_v2  ;;  %v6168_v2 = vld [vmem:[#allocation5 + $0x660] ss:$8 sps:$4 sm:$0xff]  }
 0x4d6   : > { %1829 = vmatprep.subr.bf16.mxu1 %v6137_v3  ;;  %v6173_v3 = vld [vmem:[#allocation5 + $0x674] ss:$8 sps:$4 sm:$0xff]  }
 0x4d9   : > { %1830 = vmatpush1.bf16.msra.mxu1 %v6135_v4  ;;  %v6171_v4 = vld [vmem:[#allocation5 + $0x670] ss:$8 sps:$4 sm:$0xff]  }
 0x4da   : > { %1831 = vmatprep.subr.bf16.mxu1 %v6140_v5  ;;  %v6176_v5 = vld [vmem:[#allocation5 + $0x684] ss:$8 sps:$4 sm:$0xff]  }
 0x4dd   : > { %1832 = vmatpush1.bf16.msra.mxu1 %v6138_v6  ;;  %v6174_v6 = vld [vmem:[#allocation5 + $0x680] ss:$8 sps:$4 sm:$0xff]  }
 0x4de   : > { %1833 = vmatprep.subr.bf16.mxu1 %v6143_v7  ;;  %v6179_v7 = vld [vmem:[#allocation5 + $0x694] ss:$8 sps:$4 sm:$0xff]  }
 0x4e1   : > { %1834 = vmatpush1.bf16.msra.mxu1 %v6141_v8  ;;  %v6177_v8 = vld [vmem:[#allocation5 + $0x690] ss:$8 sps:$4 sm:$0xff]  }
 0x4e2   : > { %1835 = vmatprep.subr.bf16.mxu1 %v6146_v22  ;;  %v6191_v22 = vld [vmem:[#allocation5 + $0x6d4] ss:$8 sps:$4 sm:$0xff]  }
 0x4e5   : > { %1836 = vmatpush1.bf16.msra.mxu1 %v6144_v23  ;;  %v6189_v23 = vld [vmem:[#allocation5 + $0x6d0] ss:$8 sps:$4 sm:$0xff]  }
 0x4e6   : > { %1837 = vmatprep.subr.bf16.mxu1 %v6149_v24  ;;  %v6194_v24 = vld [vmem:[#allocation5 + $0x6e4] ss:$8 sps:$4 sm:$0xff]  }
 0x4e9   : > { %1838 = vmatpush1.bf16.msra.mxu1 %v6147_v25  ;;  %v6192_v25 = vld [vmem:[#allocation5 + $0x6e0] ss:$8 sps:$4 sm:$0xff]  }
 0x57f   : > { %v1339_v12 = vpop.f32.mrb[4].mxu1 }
 0x580   : > { %v1340_v13 = vadd.f32 %v1339_v12, %v1138_v10  ;;  %v1341_v14 = vpop.f32.mrb[5].mxu1 }
 0x581   : > { %v1342_v15 = vadd.f32 %v1341_v14, %v1142_v11  ;;  %v1343_v16 = vpop.f32.mrb[6].mxu1 }
 0x582   : > { %v1346_v17 = vmax.f32 %v1340_v13, 0.0  ;;  %v1344_v18 = vpop.f32.mrb[7].mxu1  ;;  %v6182_v16 = vld [vmem:[#allocation5 + $0x6a4] ss:$8 sps:$4 sm:$0xff]  }
 0x583   : > { %v1347_v19 = vmax.f32 %v1342_v15, 0.0  ;;  %v6185_v18 = vld [vmem:[#allocation5 + $0x6b4] ss:$8 sps:$4 sm:$0xff]  }
 0x584   : > { %v1348_v21 = vpack.c.bf16 %v1346_v17, %v1346_v17  ;;  %v6180_v17 = vld [vmem:[#allocation5 + $0x6a0] ss:$8 sps:$4 sm:$0xff]  }
 0x585   : > { %v1349_v20 = vpack.c.bf16 %v1347_v19, %v1347_v19  ;;  %v6183_v19 = vld [vmem:[#allocation5 + $0x6b0] ss:$8 sps:$4 sm:$0xff]  }
 0x587   : > { %1588 = vmatprep.mubr.bf16.mxu0 %v1349_v20  ;;  %v6188_v20 = vld [vmem:[#allocation5 + $0x6c4] ss:$8 sps:$4 sm:$0xff]  }
 0x588   : > { %1589 = vmatmul.mubr.bf16.vlgmr.msra.gmra.mrb[8].mxu0 %v1348_v21  ;;  %v6186_v21 = vld [vmem:[#allocation5 + $0x6c0] ss:$8 sps:$4 sm:$0xff]  }
 0x589   : > { %2105 = vmatpush1.bf16.msra.mxu0 %v6150_v55  ;;  %v6231_v55 = vld [vmem:[#allocation5 + $0x7b0] ss:$8 sps:$4 sm:$0xff]  }
 0x58a   : > { %2106 = vmatprep.subr.bf16.mxu0 %v6155_v57  ;;  %v6234_v57 = vld [vmem:[#allocation5 + $0x7c0] ss:$8 sps:$4 sm:$0xff]  }
 0x58d   : > { %2107 = vmatpush1.bf16.msra.mxu0 %v6153_v58  ;;  %v6239_v58 = vld [vmem:[#allocation5 + $0x7d4] ss:$8 sps:$4 sm:$0xff]  }
 0x58e   : > { %2108 = vmatprep.subr.bf16.mxu0 %v6158_v59  ;;  %v6237_v59 = vld [vmem:[#allocation5 + $0x7d0] ss:$8 sps:$4 sm:$0xff]  }
 0x591   : > { %2109 = vmatpush1.bf16.msra.mxu0 %v6156_v60 }
 0x592   : > { %2110 = vmatprep.subr.bf16.mxu0 %v6161_v61 }
 0x595   : > { %2111 = vmatpush1.bf16.msra.mxu0 %v6159_v62 }
 0x65b   : > { %v1590_v29 = vpop.f32.mrb[8].mxu0 }
 0x65c   : > { %v1591_v30 = vadd.f32 %v1590_v29, %v1389_v27  ;;  %v1592_v31 = vpop.f32.mrb[9].mxu0  ;;  %v6195_v27 = vld [vmem:[#allocation5 + $0x6f0] ss:$8 sps:$4 sm:$0xff]   ;;  %v6200_v29 = vld [vmem:[#allocation5 + $0x704] ss:$8 sps:$4 sm:$0xff]  }
 0x65d   : > { %v1593_v32 = vadd.f32 %v1592_v31, %v1393_v28  ;;  %v1594_v33 = vpop.f32.mrb[10].mxu0  ;;  %v6198_v28 = vld [vmem:[#allocation5 + $0x700] ss:$8 sps:$4 sm:$0xff]   ;;  %2355 = vmatprep.subr.bf16.mxu1 %v6200_v29  ;;  %v6201_v31 = vld [vmem:[#allocation5 + $0x710] ss:$8 sps:$4 sm:$0xff]  }
 0x65e   : > { %v1597_v35 = vmax.f32 %v1591_v30, 0.0  ;;  %v1595_v39 = vpop.f32.mrb[11].mxu0  ;;  %v6203_v30 = vld [vmem:[#allocation5 + $0x714] ss:$8 sps:$4 sm:$0xff]   ;;  %v6204_v33 = vld [vmem:[#allocation5 + $0x720] ss:$8 sps:$4 sm:$0xff]  }
 0x65f   : > { %v1598_v42 = vmax.f32 %v1593_v32, 0.0  ;;  %v6206_v32 = vld [vmem:[#allocation5 + $0x724] ss:$8 sps:$4 sm:$0xff]   ;;  %v6207_v39 = vld [vmem:[#allocation5 + $0x730] ss:$8 sps:$4 sm:$0xff]  }
 0x660   : > { %v1599_v41 = vpack.c.bf16 %v1597_v35, %v1597_v35  ;;  %v6209_v35 = vld [vmem:[#allocation5 + $0x734] ss:$8 sps:$4 sm:$0xff]   ;;  %v6264_v29 = vld [vmem:[#allocation5 + $0x860] ss:$8 sps:$4 sm:$0xff]  }
 0x661   : > { %v1600_v40 = vpack.c.bf16 %v1598_v42, %v1598_v42  ;;  %v6212_v42 = vld [vmem:[#allocation5 + $0x744] ss:$8 sps:$4 sm:$0xff]  }
 0x663   : > { %1839 = vmatprep.mubr.bf16.mxu1 %v1600_v40  ;;  %v6210_v40 = vld [vmem:[#allocation5 + $0x740] ss:$8 sps:$4 sm:$0xff]  }
 0x664   : > { %1840 = vmatmul.mubr.bf16.vlgmr.msra.gmra.mrb[8].mxu1 %v1599_v41  ;;  %v6215_v41 = vld [vmem:[#allocation5 + $0x754] ss:$8 sps:$4 sm:$0xff]  }
 0x665   : > { %2356 = vmatpush1.bf16.msra.mxu1 %v6198_v28  ;;  %v6266_v28 = vld [vmem:[#allocation5 + $0x864] ss:$8 sps:$4 sm:$0xff]  }
 0x666   : > { %2357 = vmatprep.subr.bf16.mxu1 %v6203_v30  ;;  %v6269_v30 = vld [vmem:[#allocation5 + $0x874] ss:$8 sps:$4 sm:$0xff]  }
 0x669   : > { %2358 = vmatpush1.bf16.msra.mxu1 %v6201_v31  ;;  %v6267_v31 = vld [vmem:[#allocation5 + $0x870] ss:$8 sps:$4 sm:$0xff]  }
 0x66a   : > { %2359 = vmatprep.subr.bf16.mxu1 %v6206_v32  ;;  %v6272_v32 = vld [vmem:[#allocation5 + $0x884] ss:$8 sps:$4 sm:$0xff]  }
 0x66d   : > { %2360 = vmatpush1.bf16.msra.mxu1 %v6204_v33  ;;  %v6270_v33 = vld [vmem:[#allocation5 + $0x880] ss:$8 sps:$4 sm:$0xff]  }
 0x66e   : > { %2361 = vmatprep.subr.bf16.mxu1 %v6209_v35  ;;  %v6275_v35 = vld [vmem:[#allocation5 + $0x894] ss:$8 sps:$4 sm:$0xff]  }
 0x671   : > { %2362 = vmatpush1.bf16.msra.mxu1 %v6207_v39  ;;  %v6273_v39 = vld [vmem:[#allocation5 + $0x890] ss:$8 sps:$4 sm:$0xff]  }
 0x672   : > { %2363 = vmatprep.subr.bf16.mxu1 %v6212_v42  ;;  %v6278_v42 = vld [vmem:[#allocation5 + $0x8a4] ss:$8 sps:$4 sm:$0xff]  }
 0x675   : > { %2364 = vmatpush1.bf16.msra.mxu1 %v6210_v40  ;;  %v6276_v40 = vld [vmem:[#allocation5 + $0x8a0] ss:$8 sps:$4 sm:$0xff]  }
 0x676   : > { %2365 = vmatprep.subr.bf16.mxu1 %v6215_v41  ;;  %v6281_v41 = vld [vmem:[#allocation5 + $0x8b4] ss:$8 sps:$4 sm:$0xff]  }
 0x679   : > { %2366 = vmatpush1.bf16.msra.mxu1 %v6213_v43  ;;  %v6279_v43 = vld [vmem:[#allocation5 + $0x8b0] ss:$8 sps:$4 sm:$0xff]  }
 0x737   : > { %v1841_v46 = vpop.f32.mrb[8].mxu1 }
 0x738   : > { %v1842_v47 = vadd.f32 %v1841_v46, %v1640_v44  ;;  %v1843_v48 = vpop.f32.mrb[9].mxu1  ;;  %v6218_v44 = vld [vmem:[#allocation5 + $0x764] ss:$8 sps:$4 sm:$0xff]   ;;  %v6221_v46 = vld [vmem:[#allocation5 + $0x774] ss:$8 sps:$4 sm:$0xff]  }
 0x739   : > { %v1844_v49 = vadd.f32 %v1843_v48, %v1644_v45  ;;  %v1845_v50 = vpop.f32.mrb[10].mxu1  ;;  %v6216_v45 = vld [vmem:[#allocation5 + $0x760] ss:$8 sps:$4 sm:$0xff]   ;;  %2367 = vmatprep.subr.bf16.mxu1 %v6218_v44  ;;  %v6224_v48 = vld [vmem:[#allocation5 + $0x784] ss:$8 sps:$4 sm:$0xff]  }
 0x73a   : > { %v1846_v51 = vpop.f32.mrb[11].mxu1  ;;  %v1848_v52 = vadd.f32 %v1842_v47, %v7267_v38  ;;  %v6164_v38 = vld [vmem:[#allocation5 + $0x644] ss:$8 sps:$4 sm:$0xff]   ;;  %2368 = vmatpush1.bf16.msra.mxu1 %v6216_v45  ;;  %v6219_v47 = vld [vmem:[#allocation5 + $0x770] ss:$8 sps:$4 sm:$0xff]  }
 0x73b   : > { %v1849_v53 = vadd.f32 %v1844_v49, %v7265_v37  ;;  %v6162_v37 = vld [vmem:[#allocation5 + $0x640] ss:$8 sps:$4 sm:$0xff]   ;;  %2112 = vmatprep.subr.bf16.mxu0 %v6164_v38  ;;  %2369 = vmatprep.subr.bf16.mxu1 %v6221_v46  ;;  %v6227_v50 = vld [vmem:[#allocation5 + $0x794] ss:$8 sps:$4 sm:$0xff]   ;;  %v6225_v51 = vld [vmem:[#allocation5 + $0x790] ss:$8 sps:$4 sm:$0xff]  }
 0x73c   : > { %2113 = vmatpush1.bf16.msra.mxu0 %v6162_v37  ;;  %v6222_v49 = vld [vmem:[#allocation5 + $0x780] ss:$8 sps:$4 sm:$0xff]   ;;  %v1867_v38 = vld [vmem:[#allocation8 + $0x2] sm:$0x3]  ;;  %v1882_v37 = vld [vmem:[#allocation10 + $0x2] sm:$0x3] }
 0x73d   : > { %v1850_v54 = vadd.f32 %v1849_v53, %v1848_v52  ;;  %2114 = vmatprep.subr.bf16.mxu0 %v6167_v63  ;;  %v1872_v63 = vrot.slane %v1867_v38, %v7239_v34  ;;  %v6284_v44 = vld [vmem:[#allocation5 + $0x8c4] ss:$8 sps:$4 sm:$0xff]   ;;  %v6282_v45 = vld [vmem:[#allocation5 + $0x8c0] ss:$8 sps:$4 sm:$0xff]   ;;  %v6287_v46 = vld [vmem:[#allocation5 + $0x8d4] ss:$8 sps:$4 sm:$0xff]  }
 0x73e   : > { %2370 = vmatpush1.bf16.msra.mxu1 %v6219_v47  ;;  %v6285_v47 = vld [vmem:[#allocation5 + $0x8d0] ss:$8 sps:$4 sm:$0xff]  }
 0x73f   : > { %1851 = vadd.xlane.f32.xlu1 %v1850_v54  ;;  %2371 = vmatprep.subr.bf16.mxu1 %v6224_v48  ;;  %v6233_v54 = vld [vmem:[#allocation5 + $0x7b4] ss:$8 sps:$4 sm:$0xff]   ;;  %v1932_v48 = vld [vmem:[#allocation7 + $0xc] sm:$0x3] }
 0x740   : > { %2115 = vmatpush1.bf16.msra.mxu0 %v6165_v0  ;;  %v1876_v0 = vrot.slane %v1867_v38, %v7241_v36  ;;  %v6293_v38 = vld [vmem:[#allocation5 + $0x8f4] ss:$8 sps:$4 sm:$0xff]  }
 0x741   : > { %2116 = vmatprep.subr.bf16.mxu0 %v6170_v1 }
 0x742   : > { %2372 = vmatpush1.bf16.msra.mxu1 %v6222_v49  ;;  %v1937_v49 = vrot.slane %v1932_v48, %v7239_v34 }
 0x743   : > { %2373 = vmatprep.subr.bf16.mxu1 %v6227_v50  ;;  %v1941_v50 = vrot.slane %v1932_v48, %v7241_v36 }
 0x744   : > { %2117 = vmatpush1.bf16.msra.mxu0 %v6168_v2 }
 0x745   : > { %2118 = vmatprep.subr.bf16.mxu0 %v6173_v3 }
 0x746   : > { %2374 = vmatpush1.bf16.msra.mxu1 %v6225_v51 }
 0x748   : > { %2119 = vmatpush1.bf16.msra.mxu0 %v6171_v4  ;;  %v1887_v4 = vrot.slane %v1882_v37, %v7239_v34 }
 0x749   : > { %2120 = vmatprep.subr.bf16.mxu0 %v6176_v5  ;;  %v1891_v5 = vrot.slane %v1882_v37, %v7241_v36  ;;  %v6291_v37 = vld [vmem:[#allocation5 + $0x8f0] ss:$8 sps:$4 sm:$0xff]  }
 0x74c   : > { %2121 = vmatpush1.bf16.msra.mxu0 %v6174_v6 }
 0x74d   : > { %2122 = vmatprep.subr.bf16.mxu0 %v6179_v7 }
 0x750   : > { %2123 = vmatpush1.bf16.msra.mxu0 %v6177_v8 }
 0x751   : > { %2124 = vmatprep.subr.bf16.mxu0 %v6182_v16  ;;  %v6246_v16 = vld [vmem:[#allocation5 + $0x800] ss:$8 sps:$4 sm:$0xff]  }
 0x754   : > { %2125 = vmatpush1.bf16.msra.mxu0 %v6180_v17  ;;  %v6248_v17 = vld [vmem:[#allocation5 + $0x804] ss:$8 sps:$4 sm:$0xff]  }
 0x755   : > { %2126 = vmatprep.subr.bf16.mxu0 %v6185_v18  ;;  %v6251_v18 = vld [vmem:[#allocation5 + $0x814] ss:$8 sps:$4 sm:$0xff]  }
 0x758   : > { %2127 = vmatpush1.bf16.msra.mxu0 %v6183_v19  ;;  %v6249_v19 = vld [vmem:[#allocation5 + $0x810] ss:$8 sps:$4 sm:$0xff]  }
 0x759   : > { %2128 = vmatprep.subr.bf16.mxu0 %v6188_v20  ;;  %v6254_v20 = vld [vmem:[#allocation5 + $0x824] ss:$8 sps:$4 sm:$0xff]  }
 0x75c   : > { %2129 = vmatpush1.bf16.msra.mxu0 %v6186_v21  ;;  %v6252_v21 = vld [vmem:[#allocation5 + $0x820] ss:$8 sps:$4 sm:$0xff]  }
 0x75d   : > { %2130 = vmatprep.subr.bf16.mxu0 %v6191_v22  ;;  %v6257_v22 = vld [vmem:[#allocation5 + $0x834] ss:$8 sps:$4 sm:$0xff]  }
 0x760   : > { %2131 = vmatpush1.bf16.msra.mxu0 %v6189_v23  ;;  %v6255_v23 = vld [vmem:[#allocation5 + $0x830] ss:$8 sps:$4 sm:$0xff]  }
 0x761   : > { %2132 = vmatprep.subr.bf16.mxu0 %v6194_v24  ;;  %v6260_v24 = vld [vmem:[#allocation5 + $0x844] ss:$8 sps:$4 sm:$0xff]  }
 0x764   : > { %2133 = vmatpush1.bf16.msra.mxu0 %v6192_v25  ;;  %v6258_v25 = vld [vmem:[#allocation5 + $0x840] ss:$8 sps:$4 sm:$0xff]  }
 0x765   : > { %2134 = vmatprep.subr.bf16.mxu0 %v6197_v26  ;;  %v6263_v26 = vld [vmem:[#allocation5 + $0x854] ss:$8 sps:$4 sm:$0xff]  }
 0x768   : > { %2135 = vmatpush1.bf16.msra.mxu0 %v6195_v27  ;;  %v6261_v27 = vld [vmem:[#allocation5 + $0x850] ss:$8 sps:$4 sm:$0xff]  }
 0x769   : > { %2606 = vmatprep.subr.bf16.mxu0 %v6248_v17 }
 0x7cc   : > { %v1852_v9 = vpop.xlane.xlu1 %1851 }
 0x7cd   : > { %v1853_v10 = vmul.f32 0.00390625, %v1852_v9 }
 0x7cf   : > { %v7281_v11 = vsub.f32 %v1848_v52, %v1853_v10  ;;  %v7283_v12 = vsub.f32 %v1849_v53, %v1853_v10  ;;  %v6230_v52 = vld [vmem:[#allocation5 + $0x7a4] ss:$8 sps:$4 sm:$0xff]   ;;  %v6228_v53 = vld [vmem:[#allocation5 + $0x7a0] ss:$8 sps:$4 sm:$0xff]  }
 0x7d0   : > { %2375 = vmatprep.subr.bf16.mxu1 %v6230_v52 }
 0x7d1   : > { %v1856_v13 = vmul.f32 %v7281_v11, %v7281_v11  ;;  %v1857_v14 = vmul.f32 %v7283_v12, %v7283_v12  ;;  %2376 = vmatpush1.bf16.msra.mxu1 %v6228_v53 }
 0x7d2   : > { %2377 = vmatprep.subr.bf16.mxu1 %v6233_v54 }
 0x7d3   : > { %v1858_v15 = vadd.f32 %v1857_v14, %v1856_v13  ;;  %v6245_v14 = vld [vmem:[#allocation5 + $0x7f4] ss:$8 sps:$4 sm:$0xff]  }
 0x7d5   : > { %1859 = vadd.xlane.f32.xlu1 %v1858_v15  ;;  %2378 = vmatpush1.bf16.msra.mxu1 %v6231_v55  ;;  %v6243_v15 = vld [vmem:[#allocation5 + $0x7f0] ss:$8 sps:$4 sm:$0xff]  }
 0x7d6   : > { %2379 = vmatprep.subr.bf16.mxu1 %v6236_v56 }
 0x7d9   : > { %2380 = vmatpush1.bf16.msra.mxu1 %v6234_v57 }
 0x7da   : > { %2381 = vmatprep.subr.bf16.mxu1 %v6239_v58 }
 0x7dd   : > { %2382 = vmatpush1.bf16.msra.mxu1 %v6237_v59 }
 0x862   : > { %v1860_v60 = vpop.xlane.xlu1 %1859 }
 0x863   : > { %v1861_v61 = vmul.f32 0.00390625, %v1860_v60 }
 0x865   : > { %v1862_v62 = vadd.f32 1e-05, %v1861_v61  ;;  %v6290_v61 = vld [vmem:[#allocation5 + $0x8e4] ss:$8 sps:$4 sm:$0xff]  }
 0x867   : > { %6728 = vrsqrt.f32 %v1862_v62  ;;  %v6288_v62 = vld [vmem:[#allocation5 + $0x8e0] ss:$8 sps:$4 sm:$0xff]  }
 0x871   : > { %v6729_v1 = vpop.eup %6728 }
 0x872   : > { %v1864_v2 = vmul.f32 %v6729_v1, %v7281_v11  ;;  %v1865_v3 = vmul.f32 %v6729_v1, %v7283_v12  ;;  %v6242_v11 = vld [vmem:[#allocation5 + $0x7e4] ss:$8 sps:$4 sm:$0xff]   ;;  %v6240_v12 = vld [vmem:[#allocation5 + $0x7e0] ss:$8 sps:$4 sm:$0xff]  }
 0x873   : > { %2383 = vmatprep.subr.bf16.mxu1 %v6242_v11 }
 0x874   : > { %v1880_v6 = vmul.f32 %v1876_v0, %v1865_v3  ;;  %v1879_v7 = vmul.f32 %v1872_v63, %v1864_v2  ;;  %2384 = vmatpush1.bf16.msra.mxu1 %v6240_v12  ;;  %v2183_v63 = vld [vmem:[#allocation7 + $0xe] sm:$0x3] }
 0x875   : > { %2385 = vmatprep.subr.bf16.mxu1 %v6245_v14  ;;  %v2188_v0 = vrot.slane %v2183_v63, %v7239_v34  ;;  %v2192_v1 = vrot.slane %v2183_v63, %v7241_v36  ;;  %v2434_v14 = vld [vmem:[#allocation7 + $0x10] sm:$0x3]  ;;  %v6341_v63 = vld [vmem:[#allocation5 + $0x9f4] ss:$8 sps:$4 sm:$0xff]  }
 0x876   : > { %v7295_v8 = vadd.f32 %v1891_v5, %v1880_v6  ;;  %v7297_v9 = vadd.f32 %v1887_v4, %v1879_v7 }
 0x878   : > { %v1897_v10 = vpack.c.bf16 %v7295_v8, %v7295_v8  ;;  %v1896_v13 = vpack.c.bf16 %v7297_v9, %v7297_v9  ;;  %2386 = vmatpush1.bf16.msra.mxu1 %v6243_v15  ;;  %v2439_v15 = vrot.slane %v2434_v14, %v7239_v34 }
 0x87a   : > { %2136 = vmatprep.mubr.bf16.mxu0 %v1897_v10 }
 0x87b   : > { %2137 = vmatmul.mubr.bf16.vlgmr.msra.gmra.mrb[12].mxu0 %v1896_v13 }
 0x87c   : > { %2607 = vmatpush1.bf16.msra.mxu0 %v6246_v16  ;;  %v2443_v16 = vrot.slane %v2434_v14, %v7241_v36  ;;  %v6357_v14 = vld [vmem:[#allocation5 + $0xa50] ss:$8 sps:$4 sm:$0xff]  }
 0x87d   : > { %2608 = vmatprep.subr.bf16.mxu0 %v6251_v18 }
 0x880   : > { %2609 = vmatpush1.bf16.msra.mxu0 %v6249_v19 }
 0x881   : > { %2610 = vmatprep.subr.bf16.mxu0 %v6254_v20 }
 0x884   : > { %2611 = vmatpush1.bf16.msra.mxu0 %v6252_v21 }
 0x885   : > { %2612 = vmatprep.subr.bf16.mxu0 %v6257_v22 }
 0x888   : > { %2613 = vmatpush1.bf16.msra.mxu0 %v6255_v23 }
 0x889   : > { %2614 = vmatprep.subr.bf16.mxu0 %v6260_v24 }
 0x88c   : > { %2615 = vmatpush1.bf16.msra.mxu0 %v6258_v25 }
 0x88d   : > { %2616 = vmatprep.subr.bf16.mxu0 %v6263_v26  ;;  %v6294_v26 = vld [vmem:[#allocation5 + $0x900] ss:$8 sps:$4 sm:$0xff]  }
 0x890   : > { %2617 = vmatpush1.bf16.msra.mxu0 %v6261_v27  ;;  %v6296_v27 = vld [vmem:[#allocation5 + $0x904] ss:$8 sps:$4 sm:$0xff]  }
 0x891   : > { %2618 = vmatprep.subr.bf16.mxu0 %v6266_v28  ;;  %v6299_v28 = vld [vmem:[#allocation5 + $0x914] ss:$8 sps:$4 sm:$0xff]   ;;  %2903 = vmatprep.subr.bf16.mxu1 %v6296_v27  ;;  %v6380_v27 = vld [vmem:[#allocation5 + $0xac4] ss:$8 sps:$4 sm:$0xff]  }
 0x894   : > { %2619 = vmatpush1.bf16.msra.mxu0 %v6264_v29  ;;  %v6297_v29 = vld [vmem:[#allocation5 + $0x910] ss:$8 sps:$4 sm:$0xff]  }
 0x895   : > { %2620 = vmatprep.subr.bf16.mxu0 %v6269_v30  ;;  %v6302_v30 = vld [vmem:[#allocation5 + $0x924] ss:$8 sps:$4 sm:$0xff]  }
 0x898   : > { %2621 = vmatpush1.bf16.msra.mxu0 %v6267_v31  ;;  %v6300_v31 = vld [vmem:[#allocation5 + $0x920] ss:$8 sps:$4 sm:$0xff]  }
 0x899   : > { %2622 = vmatprep.subr.bf16.mxu0 %v6272_v32  ;;  %v6305_v32 = vld [vmem:[#allocation5 + $0x934] ss:$8 sps:$4 sm:$0xff]  }
 0x89c   : > { %2623 = vmatpush1.bf16.msra.mxu0 %v6270_v33  ;;  %v6303_v33 = vld [vmem:[#allocation5 + $0x930] ss:$8 sps:$4 sm:$0xff]  }
 0x89d   : > { %2624 = vmatprep.subr.bf16.mxu0 %v6275_v35  ;;  %v6311_v35 = vld [vmem:[#allocation5 + $0x954] ss:$8 sps:$4 sm:$0xff]  }
 0x8a0   : > { %2625 = vmatpush1.bf16.msra.mxu0 %v6273_v39  ;;  %v6309_v39 = vld [vmem:[#allocation5 + $0x950] ss:$8 sps:$4 sm:$0xff]  }
 0x8a1   : > { %2626 = vmatprep.subr.bf16.mxu0 %v6278_v42  ;;  %v6314_v42 = vld [vmem:[#allocation5 + $0x964] ss:$8 sps:$4 sm:$0xff]  }
 0x8a4   : > { %2627 = vmatpush1.bf16.msra.mxu0 %v6276_v40  ;;  %v6312_v40 = vld [vmem:[#allocation5 + $0x960] ss:$8 sps:$4 sm:$0xff]  }
 0x8a5   : > { %2628 = vmatprep.subr.bf16.mxu0 %v6281_v41  ;;  %v6317_v41 = vld [vmem:[#allocation5 + $0x974] ss:$8 sps:$4 sm:$0xff]  }
 0x8a8   : > { %2629 = vmatpush1.bf16.msra.mxu0 %v6279_v43  ;;  %v6315_v43 = vld [vmem:[#allocation5 + $0x970] ss:$8 sps:$4 sm:$0xff]  }
 0x8a9   : > { %2630 = vmatprep.subr.bf16.mxu0 %v6284_v44  ;;  %v6320_v44 = vld [vmem:[#allocation5 + $0x984] ss:$8 sps:$4 sm:$0xff]  }
 0x8ac   : > { %2631 = vmatpush1.bf16.msra.mxu0 %v6282_v45  ;;  %v6318_v45 = vld [vmem:[#allocation5 + $0x980] ss:$8 sps:$4 sm:$0xff]  }
 0x8ad   : > { %2632 = vmatprep.subr.bf16.mxu0 %v6287_v46  ;;  %v6323_v46 = vld [vmem:[#allocation5 + $0x994] ss:$8 sps:$4 sm:$0xff]  }
 0x8b0   : > { %2633 = vmatpush1.bf16.msra.mxu0 %v6285_v47  ;;  %v6321_v47 = vld [vmem:[#allocation5 + $0x990] ss:$8 sps:$4 sm:$0xff]  }
 0x8b1   : > { %2634 = vmatprep.subr.bf16.mxu0 %v6290_v61  ;;  %v6335_v61 = vld [vmem:[#allocation5 + $0x9d4] ss:$8 sps:$4 sm:$0xff]  }
 0x8b4   : > { %2635 = vmatpush1.bf16.msra.mxu0 %v6288_v62  ;;  %v6333_v62 = vld [vmem:[#allocation5 + $0x9d0] ss:$8 sps:$4 sm:$0xff]  }
 0x8b5   : > { %2636 = vmatprep.subr.bf16.mxu0 %v6293_v38  ;;  %v6338_v38 = vld [vmem:[#allocation5 + $0x9e4] ss:$8 sps:$4 sm:$0xff]  }
 0x8b8   : > { %2637 = vmatpush1.bf16.msra.mxu0 %v6291_v37  ;;  %v6336_v37 = vld [vmem:[#allocation5 + $0x9e0] ss:$8 sps:$4 sm:$0xff]  }
 0x94e   : > { %v2138_v51 = vpop.f32.mrb[12].mxu0 }
 0x94f   : > { %v2139_v52 = vadd.f32 %v2138_v51, %v1937_v49  ;;  %v2140_v53 = vpop.f32.mrb[13].mxu0 }
 0x950   : > { %v2141_v54 = vadd.f32 %v2140_v53, %v1941_v50  ;;  %v2142_v55 = vpop.f32.mrb[14].mxu0 }
 0x951   : > { %v2145_v56 = vmax.f32 %v2139_v52, 0.0  ;;  %v2143_v57 = vpop.f32.mrb[15].mxu0  ;;  %v6326_v55 = vld [vmem:[#allocation5 + $0x9a4] ss:$8 sps:$4 sm:$0xff]  }
 0x952   : > { %v2146_v58 = vmax.f32 %v2141_v54, 0.0  ;;  %v6329_v57 = vld [vmem:[#allocation5 + $0x9b4] ss:$8 sps:$4 sm:$0xff]  }
 0x953   : > { %v2147_v60 = vpack.c.bf16 %v2145_v56, %v2145_v56  ;;  %v6324_v56 = vld [vmem:[#allocation5 + $0x9a0] ss:$8 sps:$4 sm:$0xff]  }
 0x954   : > { %v2148_v59 = vpack.c.bf16 %v2146_v58, %v2146_v58  ;;  %v6327_v58 = vld [vmem:[#allocation5 + $0x9b0] ss:$8 sps:$4 sm:$0xff]  }
 0x956   : > { %2387 = vmatprep.mubr.bf16.mxu1 %v2148_v59  ;;  %v6332_v59 = vld [vmem:[#allocation5 + $0x9c4] ss:$8 sps:$4 sm:$0xff]  }
 0x957   : > { %2388 = vmatmul.mubr.bf16.vlgmr.msra.gmra.mrb[12].mxu1 %v2147_v60  ;;  %v6330_v60 = vld [vmem:[#allocation5 + $0x9c0] ss:$8 sps:$4 sm:$0xff]  }
 0x958   : > { %2904 = vmatpush1.bf16.msra.mxu1 %v6294_v26  ;;  %v6375_v26 = vld [vmem:[#allocation5 + $0xab0] ss:$8 sps:$4 sm:$0xff]  }
 0x959   : > { %2905 = vmatprep.subr.bf16.mxu1 %v6299_v28  ;;  %v6378_v28 = vld [vmem:[#allocation5 + $0xac0] ss:$8 sps:$4 sm:$0xff]  }
 0x95c   : > { %2906 = vmatpush1.bf16.msra.mxu1 %v6297_v29  ;;  %v6383_v29 = vld [vmem:[#allocation5 + $0xad4] ss:$8 sps:$4 sm:$0xff]  }
 0x95d   : > { %2907 = vmatprep.subr.bf16.mxu1 %v6302_v30  ;;  %v6381_v30 = vld [vmem:[#allocation5 + $0xad0] ss:$8 sps:$4 sm:$0xff]  }
 0x960   : > { %2908 = vmatpush1.bf16.msra.mxu1 %v6300_v31 }
 0x961   : > { %2909 = vmatprep.subr.bf16.mxu1 %v6305_v32 }
 0x964   : > { %2910 = vmatpush1.bf16.msra.mxu1 %v6303_v33 }
 0xa2a   : > { %v2389_v2 = vpop.f32.mrb[12].mxu1 }
 0xa2b   : > { %v2390_v3 = vadd.f32 %v2389_v2, %v2188_v0  ;;  %v2391_v4 = vpop.f32.mrb[13].mxu1  ;;  %v6339_v0 = vld [vmem:[#allocation5 + $0x9f0] ss:$8 sps:$4 sm:$0xff]   ;;  %v6344_v2 = vld [vmem:[#allocation5 + $0xa04] ss:$8 sps:$4 sm:$0xff]  }
 0xa2c   : > { %v2392_v5 = vadd.f32 %v2391_v4, %v2192_v1  ;;  %v2393_v6 = vpop.f32.mrb[14].mxu1  ;;  %v6342_v1 = vld [vmem:[#allocation5 + $0xa00] ss:$8 sps:$4 sm:$0xff]   ;;  %3154 = vmatprep.subr.bf16.mxu0 %v6344_v2  ;;  %v6345_v4 = vld [vmem:[#allocation5 + $0xa10] ss:$8 sps:$4 sm:$0xff]  }
 0xa2d   : > { %v2396_v7 = vmax.f32 %v2390_v3, 0.0  ;;  %v2394_v10 = vpop.f32.mrb[15].mxu1  ;;  %v6347_v3 = vld [vmem:[#allocation5 + $0xa14] ss:$8 sps:$4 sm:$0xff]   ;;  %v6348_v6 = vld [vmem:[#allocation5 + $0xa20] ss:$8 sps:$4 sm:$0xff]  }
 0xa2e   : > { %v2397_v13 = vmax.f32 %v2392_v5, 0.0  ;;  %v6350_v5 = vld [vmem:[#allocation5 + $0xa24] ss:$8 sps:$4 sm:$0xff]   ;;  %v6351_v10 = vld [vmem:[#allocation5 + $0xa30] ss:$8 sps:$4 sm:$0xff]  }
 0xa2f   : > { %v2398_v12 = vpack.c.bf16 %v2396_v7, %v2396_v7  ;;  %v6353_v7 = vld [vmem:[#allocation5 + $0xa34] ss:$8 sps:$4 sm:$0xff]   ;;  %v6408_v2 = vld [vmem:[#allocation5 + $0xb60] ss:$8 sps:$4 sm:$0xff]  }
 0xa30   : > { %v2399_v11 = vpack.c.bf16 %v2397_v13, %v2397_v13  ;;  %v6356_v13 = vld [vmem:[#allocation5 + $0xa44] ss:$8 sps:$4 sm:$0xff]  }
 0xa32   : > { %2638 = vmatprep.mubr.bf16.mxu0 %v2399_v11  ;;  %v6354_v11 = vld [vmem:[#allocation5 + $0xa40] ss:$8 sps:$4 sm:$0xff]  }
 0xa33   : > { %2639 = vmatmul.mubr.bf16.vlgmr.msra.gmra.mrb[16].mxu0 %v2398_v12  ;;  %v6359_v12 = vld [vmem:[#allocation5 + $0xa54] ss:$8 sps:$4 sm:$0xff]  }
 0xa34   : > { %3155 = vmatpush1.bf16.msra.mxu0 %v6342_v1  ;;  %v6410_v1 = vld [vmem:[#allocation5 + $0xb64] ss:$8 sps:$4 sm:$0xff]  }
 0xa35   : > { %3156 = vmatprep.subr.bf16.mxu0 %v6347_v3  ;;  %v6413_v3 = vld [vmem:[#allocation5 + $0xb74] ss:$8 sps:$4 sm:$0xff]  }
 0xa38   : > { %3157 = vmatpush1.bf16.msra.mxu0 %v6345_v4  ;;  %v6411_v4 = vld [vmem:[#allocation5 + $0xb70] ss:$8 sps:$4 sm:$0xff]  }
 0xa39   : > { %3158 = vmatprep.subr.bf16.mxu0 %v6350_v5  ;;  %v6416_v5 = vld [vmem:[#allocation5 + $0xb84] ss:$8 sps:$4 sm:$0xff]  }
 0xa3c   : > { %3159 = vmatpush1.bf16.msra.mxu0 %v6348_v6  ;;  %v6414_v6 = vld [vmem:[#allocation5 + $0xb80] ss:$8 sps:$4 sm:$0xff]  }
 0xa3d   : > { %3160 = vmatprep.subr.bf16.mxu0 %v6353_v7  ;;  %v6419_v7 = vld [vmem:[#allocation5 + $0xb94] ss:$8 sps:$4 sm:$0xff]  }
 0xa40   : > { %3161 = vmatpush1.bf16.msra.mxu0 %v6351_v10  ;;  %v6417_v10 = vld [vmem:[#allocation5 + $0xb90] ss:$8 sps:$4 sm:$0xff]  }
 0xa41   : > { %3162 = vmatprep.subr.bf16.mxu0 %v6356_v13  ;;  %v6422_v13 = vld [vmem:[#allocation5 + $0xba4] ss:$8 sps:$4 sm:$0xff]  }
 0xa44   : > { %3163 = vmatpush1.bf16.msra.mxu0 %v6354_v11  ;;  %v6420_v11 = vld [vmem:[#allocation5 + $0xba0] ss:$8 sps:$4 sm:$0xff]  }
 0xa45   : > { %3164 = vmatprep.subr.bf16.mxu0 %v6359_v12  ;;  %v6425_v12 = vld [vmem:[#allocation5 + $0xbb4] ss:$8 sps:$4 sm:$0xff]  }
 0xa48   : > { %3165 = vmatpush1.bf16.msra.mxu0 %v6357_v14  ;;  %v6423_v14 = vld [vmem:[#allocation5 + $0xbb0] ss:$8 sps:$4 sm:$0xff]  }
 0xb06   : > { %v2640_v17 = vpop.f32.mrb[16].mxu0 }
 0xb07   : > { %v2641_v18 = vadd.f32 %v2640_v17, %v2439_v15  ;;  %v2642_v19 = vpop.f32.mrb[17].mxu0  ;;  %v6362_v15 = vld [vmem:[#allocation5 + $0xa64] ss:$8 sps:$4 sm:$0xff]   ;;  %v6365_v17 = vld [vmem:[#allocation5 + $0xa74] ss:$8 sps:$4 sm:$0xff]  }
 0xb08   : > { %v2643_v20 = vadd.f32 %v2642_v19, %v2443_v16  ;;  %v2644_v21 = vpop.f32.mrb[18].mxu0  ;;  %v6360_v16 = vld [vmem:[#allocation5 + $0xa60] ss:$8 sps:$4 sm:$0xff]   ;;  %3166 = vmatprep.subr.bf16.mxu0 %v6362_v15  ;;  %v6368_v19 = vld [vmem:[#allocation5 + $0xa84] ss:$8 sps:$4 sm:$0xff]  }
 0xb09   : > { %v2647_v22 = vadd.f32 %v2641_v18, %v7297_v9  ;;  %v2645_v23 = vpop.f32.mrb[19].mxu0  ;;  %v6308_v9 = vld [vmem:[#allocation5 + $0x944] ss:$8 sps:$4 sm:$0xff]   ;;  %3167 = vmatpush1.bf16.msra.mxu0 %v6360_v16  ;;  %v6363_v18 = vld [vmem:[#allocation5 + $0xa70] ss:$8 sps:$4 sm:$0xff]  }
 0xb0a   : > { %v2648_v24 = vadd.f32 %v2643_v20, %v7295_v8  ;;  %v6306_v8 = vld [vmem:[#allocation5 + $0x940] ss:$8 sps:$4 sm:$0xff]   ;;  %2911 = vmatprep.subr.bf16.mxu1 %v6308_v9  ;;  %3168 = vmatprep.subr.bf16.mxu0 %v6365_v17  ;;  %v6371_v21 = vld [vmem:[#allocation5 + $0xa94] ss:$8 sps:$4 sm:$0xff]   ;;  %v6374_v23 = vld [vmem:[#allocation5 + $0xaa4] ss:$8 sps:$4 sm:$0xff]  }
 0xb0b   : > { %2912 = vmatpush1.bf16.msra.mxu1 %v6306_v8  ;;  %v6366_v20 = vld [vmem:[#allocation5 + $0xa80] ss:$8 sps:$4 sm:$0xff]   ;;  %v2681_v8 = vld [vmem:[#allocation10 + $0x4] sm:$0x3]  ;;  %v6428_v15 = vld [vmem:[#allocation5 + $0xbc4] ss:$8 sps:$4 sm:$0xff]  }
 0xb0c   : > { %v2649_v25 = vadd.f32 %v2648_v24, %v2647_v22  ;;  %2913 = vmatprep.subr.bf16.mxu1 %v6311_v35  ;;  %v2666_v9 = vld [vmem:[#allocation8 + $0x4] sm:$0x3]  ;;  %v6431_v17 = vld [vmem:[#allocation5 + $0xbd4] ss:$8 sps:$4 sm:$0xff]  }
 0xb0d   : > { %3169 = vmatpush1.bf16.msra.mxu0 %v6363_v18  ;;  %v2671_v35 = vrot.slane %v2666_v9, %v7239_v34  ;;  %v6426_v16 = vld [vmem:[#allocation5 + $0xbc0] ss:$8 sps:$4 sm:$0xff]   ;;  %v6429_v18 = vld [vmem:[#allocation5 + $0xbd0] ss:$8 sps:$4 sm:$0xff]  }
 0xb0e   : > { %2650 = vadd.xlane.f32.xlu0 %v2649_v25  ;;  %3170 = vmatprep.subr.bf16.mxu0 %v6368_v19  ;;  %v6377_v25 = vld [vmem:[#allocation5 + $0xab4] ss:$8 sps:$4 sm:$0xff]   ;;  %v2731_v19 = vld [vmem:[#allocation7 + $0x12] sm:$0x3] }
 0xb0f   : > { %2914 = vmatpush1.bf16.msra.mxu1 %v6309_v39  ;;  %v2675_v39 = vrot.slane %v2666_v9, %v7241_v36  ;;  %v6437_v9 = vld [vmem:[#allocation5 + $0xbf4] ss:$8 sps:$4 sm:$0xff]  }
 0xb10   : > { %2915 = vmatprep.subr.bf16.mxu1 %v6314_v42 }
 0xb11   : > { %3171 = vmatpush1.bf16.msra.mxu0 %v6366_v20  ;;  %v2736_v20 = vrot.slane %v2731_v19, %v7239_v34 }
 0xb12   : > { %3172 = vmatprep.subr.bf16.mxu0 %v6371_v21  ;;  %v2740_v21 = vrot.slane %v2731_v19, %v7241_v36 }
 0xb13   : > { %2916 = vmatpush1.bf16.msra.mxu1 %v6312_v40 }
 0xb14   : > { %2917 = vmatprep.subr.bf16.mxu1 %v6317_v41 }
 0xb17   : > { %2918 = vmatpush1.bf16.msra.mxu1 %v6315_v43  ;;  %v2686_v43 = vrot.slane %v2681_v8, %v7239_v34 }
 0xb18   : > { %2919 = vmatprep.subr.bf16.mxu1 %v6320_v44  ;;  %v2690_v44 = vrot.slane %v2681_v8, %v7241_v36  ;;  %v6435_v8 = vld [vmem:[#allocation5 + $0xbf0] ss:$8 sps:$4 sm:$0xff]  }
 0xb1b   : > { %2920 = vmatpush1.bf16.msra.mxu1 %v6318_v45 }
 0xb1c   : > { %2921 = vmatprep.subr.bf16.mxu1 %v6323_v46 }
 0xb1f   : > { %2922 = vmatpush1.bf16.msra.mxu1 %v6321_v47 }
 0xb20   : > { %2923 = vmatprep.subr.bf16.mxu1 %v6326_v55  ;;  %v6390_v55 = vld [vmem:[#allocation5 + $0xb00] ss:$8 sps:$4 sm:$0xff]  }
 0xb23   : > { %2924 = vmatpush1.bf16.msra.mxu1 %v6324_v56  ;;  %v6392_v56 = vld [vmem:[#allocation5 + $0xb04] ss:$8 sps:$4 sm:$0xff]  }
 0xb24   : > { %2925 = vmatprep.subr.bf16.mxu1 %v6329_v57  ;;  %v6395_v57 = vld [vmem:[#allocation5 + $0xb14] ss:$8 sps:$4 sm:$0xff]  }
 0xb27   : > { %2926 = vmatpush1.bf16.msra.mxu1 %v6327_v58  ;;  %v6393_v58 = vld [vmem:[#allocation5 + $0xb10] ss:$8 sps:$4 sm:$0xff]  }
 0xb28   : > { %2927 = vmatprep.subr.bf16.mxu1 %v6332_v59  ;;  %v6398_v59 = vld [vmem:[#allocation5 + $0xb24] ss:$8 sps:$4 sm:$0xff]  }
 0xb2b   : > { %2928 = vmatpush1.bf16.msra.mxu1 %v6330_v60  ;;  %v6396_v60 = vld [vmem:[#allocation5 + $0xb20] ss:$8 sps:$4 sm:$0xff]  }
 0xb2c   : > { %2929 = vmatprep.subr.bf16.mxu1 %v6335_v61  ;;  %v6401_v61 = vld [vmem:[#allocation5 + $0xb34] ss:$8 sps:$4 sm:$0xff]  }
 0xb2f   : > { %2930 = vmatpush1.bf16.msra.mxu1 %v6333_v62  ;;  %v6399_v62 = vld [vmem:[#allocation5 + $0xb30] ss:$8 sps:$4 sm:$0xff]  }
 0xb30   : > { %2931 = vmatprep.subr.bf16.mxu1 %v6338_v38  ;;  %v6404_v38 = vld [vmem:[#allocation5 + $0xb44] ss:$8 sps:$4 sm:$0xff]  }
 0xb33   : > { %2932 = vmatpush1.bf16.msra.mxu1 %v6336_v37  ;;  %v6402_v37 = vld [vmem:[#allocation5 + $0xb40] ss:$8 sps:$4 sm:$0xff]  }
 0xb34   : > { %2933 = vmatprep.subr.bf16.mxu1 %v6341_v63  ;;  %v6407_v63 = vld [vmem:[#allocation5 + $0xb54] ss:$8 sps:$4 sm:$0xff]  }
 0xb37   : > { %2934 = vmatpush1.bf16.msra.mxu1 %v6339_v0  ;;  %v6405_v0 = vld [vmem:[#allocation5 + $0xb50] ss:$8 sps:$4 sm:$0xff]  }
 0xb38   : > { %3405 = vmatprep.subr.bf16.mxu1 %v6392_v56 }
 0xb9b   : > { %v2651_v48 = vpop.xlane.xlu0 %2650 }
 0xb9c   : > { %v2652_v49 = vmul.f32 0.00390625, %v2651_v48 }
 0xb9e   : > { %v7311_v50 = vsub.f32 %v2647_v22, %v2652_v49  ;;  %v7313_v51 = vsub.f32 %v2648_v24, %v2652_v49  ;;  %v6369_v22 = vld [vmem:[#allocation5 + $0xa90] ss:$8 sps:$4 sm:$0xff]   ;;  %v6372_v24 = vld [vmem:[#allocation5 + $0xaa0] ss:$8 sps:$4 sm:$0xff]  }
 0xb9f   : > { %3173 = vmatpush1.bf16.msra.mxu0 %v6369_v22 }
 0xba0   : > { %v2655_v52 = vmul.f32 %v7311_v50, %v7311_v50  ;;  %v2656_v53 = vmul.f32 %v7313_v51, %v7313_v51  ;;  %3174 = vmatprep.subr.bf16.mxu0 %v6374_v23 }
 0xba2   : > { %v2657_v54 = vadd.f32 %v2656_v53, %v2655_v52  ;;  %v6389_v53 = vld [vmem:[#allocation5 + $0xaf4] ss:$8 sps:$4 sm:$0xff]  }
 0xba3   : > { %3175 = vmatpush1.bf16.msra.mxu0 %v6372_v24 }
 0xba4   : > { %2658 = vadd.xlane.f32.xlu1 %v2657_v54  ;;  %3176 = vmatprep.subr.bf16.mxu0 %v6377_v25  ;;  %v6387_v54 = vld [vmem:[#allocation5 + $0xaf0] ss:$8 sps:$4 sm:$0xff]  }
 0xba7   : > { %3177 = vmatpush1.bf16.msra.mxu0 %v6375_v26 }
 0xba8   : > { %3178 = vmatprep.subr.bf16.mxu0 %v6380_v27 }
 0xbab   : > { %3179 = vmatpush1.bf16.msra.mxu0 %v6378_v28 }
 0xbac   : > { %3180 = vmatprep.subr.bf16.mxu0 %v6383_v29 }
 0xbaf   : > { %3181 = vmatpush1.bf16.msra.mxu0 %v6381_v30 }
 0xc31   : > { %v2659_v31 = vpop.xlane.xlu1 %2658 }
 0xc32   : > { %v2660_v32 = vmul.f32 0.00390625, %v2659_v31 }
 0xc34   : > { %v2661_v33 = vadd.f32 1e-05, %v2660_v32  ;;  %v6434_v32 = vld [vmem:[#allocation5 + $0xbe4] ss:$8 sps:$4 sm:$0xff]  }
 0xc36   : > { %6730 = vrsqrt.f32 %v2661_v33  ;;  %v6432_v33 = vld [vmem:[#allocation5 + $0xbe0] ss:$8 sps:$4 sm:$0xff]  }
 0xc40   : > { %v6731_v42 = vpop.eup %6730 }
 0xc41   : > { %v2663_v40 = vmul.f32 %v6731_v42, %v7311_v50  ;;  %v2664_v41 = vmul.f32 %v6731_v42, %v7313_v51  ;;  %v6386_v50 = vld [vmem:[#allocation5 + $0xae4] ss:$8 sps:$4 sm:$0xff]   ;;  %v6384_v51 = vld [vmem:[#allocation5 + $0xae0] ss:$8 sps:$4 sm:$0xff]  }
 0xc42   : > { %3182 = vmatprep.subr.bf16.mxu0 %v6386_v50 }
 0xc43   : > { %v2679_v45 = vmul.f32 %v2675_v39, %v2664_v41  ;;  %v2678_v46 = vmul.f32 %v2671_v35, %v2663_v40  ;;  %3183 = vmatpush1.bf16.msra.mxu0 %v6384_v51  ;;  %v2982_v35 = vld [vmem:[#allocation7 + $0x14] sm:$0x3] }
 0xc44   : > { %3184 = vmatprep.subr.bf16.mxu0 %v6389_v53  ;;  %v2987_v39 = vrot.slane %v2982_v35, %v7239_v34  ;;  %v2991_v42 = vrot.slane %v2982_v35, %v7241_v36  ;;  %v3233_v53 = vld [vmem:[#allocation7 + $0x16] sm:$0x3] }
 0xc45   : > { %v7325_v47 = vadd.f32 %v2690_v44, %v2679_v45  ;;  %v7327_v48 = vadd.f32 %v2686_v43, %v2678_v46  ;;  %v6485_v35 = vld [vmem:[#allocation5 + $0xcf4] ss:$8 sps:$4 sm:$0xff]  }
 0xc47   : > { %v2696_v49 = vpack.c.bf16 %v7325_v47, %v7325_v47  ;;  %v2695_v52 = vpack.c.bf16 %v7327_v48, %v7327_v48  ;;  %3185 = vmatpush1.bf16.msra.mxu0 %v6387_v54  ;;  %v3238_v54 = vrot.slane %v3233_v53, %v7239_v34 }
 0xc49   : > { %2935 = vmatprep.mubr.bf16.mxu1 %v2696_v49 }
 0xc4a   : > { %2936 = vmatmul.mubr.bf16.vlgmr.msra.gmra.mrb[16].mxu1 %v2695_v52 }
 0xc4b   : > { %3406 = vmatpush1.bf16.msra.mxu1 %v6390_v55  ;;  %v3242_v55 = vrot.slane %v3233_v53, %v7241_v36  ;;  %v6501_v53 = vld [vmem:[#allocation5 + $0xd50] ss:$8 sps:$4 sm:$0xff]  }
 0xc4c   : > { %3407 = vmatprep.subr.bf16.mxu1 %v6395_v57 }
 0xc4f   : > { %3408 = vmatpush1.bf16.msra.mxu1 %v6393_v58 }
 0xc50   : > { %3409 = vmatprep.subr.bf16.mxu1 %v6398_v59 }
 0xc53   : > { %3410 = vmatpush1.bf16.msra.mxu1 %v6396_v60 }
 0xc54   : > { %3411 = vmatprep.subr.bf16.mxu1 %v6401_v61 }
 0xc57   : > { %3412 = vmatpush1.bf16.msra.mxu1 %v6399_v62 }
 0xc58   : > { %3413 = vmatprep.subr.bf16.mxu1 %v6404_v38 }
 0xc5b   : > { %3414 = vmatpush1.bf16.msra.mxu1 %v6402_v37 }
 0xc5c   : > { %3415 = vmatprep.subr.bf16.mxu1 %v6407_v63  ;;  %v6438_v63 = vld [vmem:[#allocation5 + $0xc00] ss:$8 sps:$4 sm:$0xff]  }
 0xc5f   : > { %3416 = vmatpush1.bf16.msra.mxu1 %v6405_v0  ;;  %v6440_v0 = vld [vmem:[#allocation5 + $0xc04] ss:$8 sps:$4 sm:$0xff]  }
 0xc60   : > { %3417 = vmatprep.subr.bf16.mxu1 %v6410_v1  ;;  %v6443_v1 = vld [vmem:[#allocation5 + $0xc14] ss:$8 sps:$4 sm:$0xff]   ;;  %3702 = vmatprep.subr.bf16.mxu0 %v6440_v0  ;;  %v6524_v0 = vld [vmem:[#allocation5 + $0xdc4] ss:$8 sps:$4 sm:$0xff]  }
 0xc63   : > { %3418 = vmatpush1.bf16.msra.mxu1 %v6408_v2  ;;  %v6441_v2 = vld [vmem:[#allocation5 + $0xc10] ss:$8 sps:$4 sm:$0xff]  }
 0xc64   : > { %3419 = vmatprep.subr.bf16.mxu1 %v6413_v3  ;;  %v6446_v3 = vld [vmem:[#allocation5 + $0xc24] ss:$8 sps:$4 sm:$0xff]  }
 0xc67   : > { %3420 = vmatpush1.bf16.msra.mxu1 %v6411_v4  ;;  %v6444_v4 = vld [vmem:[#allocation5 + $0xc20] ss:$8 sps:$4 sm:$0xff]  }
 0xc68   : > { %3421 = vmatprep.subr.bf16.mxu1 %v6416_v5  ;;  %v6449_v5 = vld [vmem:[#allocation5 + $0xc34] ss:$8 sps:$4 sm:$0xff]  }
 0xc6b   : > { %3422 = vmatpush1.bf16.msra.mxu1 %v6414_v6  ;;  %v6447_v6 = vld [vmem:[#allocation5 + $0xc30] ss:$8 sps:$4 sm:$0xff]  }
 0xc6c   : > { %3423 = vmatprep.subr.bf16.mxu1 %v6419_v7  ;;  %v6455_v7 = vld [vmem:[#allocation5 + $0xc54] ss:$8 sps:$4 sm:$0xff]  }
 0xc6f   : > { %3424 = vmatpush1.bf16.msra.mxu1 %v6417_v10  ;;  %v6453_v10 = vld [vmem:[#allocation5 + $0xc50] ss:$8 sps:$4 sm:$0xff]  }
 0xc70   : > { %3425 = vmatprep.subr.bf16.mxu1 %v6422_v13  ;;  %v6458_v13 = vld [vmem:[#allocation5 + $0xc64] ss:$8 sps:$4 sm:$0xff]  }
 0xc73   : > { %3426 = vmatpush1.bf16.msra.mxu1 %v6420_v11  ;;  %v6456_v11 = vld [vmem:[#allocation5 + $0xc60] ss:$8 sps:$4 sm:$0xff]  }
 0xc74   : > { %3427 = vmatprep.subr.bf16.mxu1 %v6425_v12  ;;  %v6461_v12 = vld [vmem:[#allocation5 + $0xc74] ss:$8 sps:$4 sm:$0xff]  }
 0xc77   : > { %3428 = vmatpush1.bf16.msra.mxu1 %v6423_v14  ;;  %v6459_v14 = vld [vmem:[#allocation5 + $0xc70] ss:$8 sps:$4 sm:$0xff]  }
 0xc78   : > { %3429 = vmatprep.subr.bf16.mxu1 %v6428_v15  ;;  %v6464_v15 = vld [vmem:[#allocation5 + $0xc84] ss:$8 sps:$4 sm:$0xff]  }
 0xc7b   : > { %3430 = vmatpush1.bf16.msra.mxu1 %v6426_v16  ;;  %v6462_v16 = vld [vmem:[#allocation5 + $0xc80] ss:$8 sps:$4 sm:$0xff]  }
 0xc7c   : > { %3431 = vmatprep.subr.bf16.mxu1 %v6431_v17  ;;  %v6467_v17 = vld [vmem:[#allocation5 + $0xc94] ss:$8 sps:$4 sm:$0xff]  }
 0xc7f   : > { %3432 = vmatpush1.bf16.msra.mxu1 %v6429_v18  ;;  %v6465_v18 = vld [vmem:[#allocation5 + $0xc90] ss:$8 sps:$4 sm:$0xff]  }
 0xc80   : > { %3433 = vmatprep.subr.bf16.mxu1 %v6434_v32  ;;  %v6479_v32 = vld [vmem:[#allocation5 + $0xcd4] ss:$8 sps:$4 sm:$0xff]  }
 0xc83   : > { %3434 = vmatpush1.bf16.msra.mxu1 %v6432_v33  ;;  %v6477_v33 = vld [vmem:[#allocation5 + $0xcd0] ss:$8 sps:$4 sm:$0xff]  }
 0xc84   : > { %3435 = vmatprep.subr.bf16.mxu1 %v6437_v9  ;;  %v6482_v9 = vld [vmem:[#allocation5 + $0xce4] ss:$8 sps:$4 sm:$0xff]  }
 0xc87   : > { %3436 = vmatpush1.bf16.msra.mxu1 %v6435_v8  ;;  %v6480_v8 = vld [vmem:[#allocation5 + $0xce0] ss:$8 sps:$4 sm:$0xff]  }
 0xd1d   : > { %v2937_v22 = vpop.f32.mrb[16].mxu1 }
 0xd1e   : > { %v2938_v23 = vadd.f32 %v2937_v22, %v2736_v20  ;;  %v2939_v24 = vpop.f32.mrb[17].mxu1 }
 0xd1f   : > { %v2940_v25 = vadd.f32 %v2939_v24, %v2740_v21  ;;  %v2941_v26 = vpop.f32.mrb[18].mxu1 }
 0xd20   : > { %v2944_v27 = vmax.f32 %v2938_v23, 0.0  ;;  %v2942_v28 = vpop.f32.mrb[19].mxu1  ;;  %v6470_v26 = vld [vmem:[#allocation5 + $0xca4] ss:$8 sps:$4 sm:$0xff]  }
 0xd21   : > { %v2945_v29 = vmax.f32 %v2940_v25, 0.0  ;;  %v6473_v28 = vld [vmem:[#allocation5 + $0xcb4] ss:$8 sps:$4 sm:$0xff]  }
 0xd22   : > { %v2946_v31 = vpack.c.bf16 %v2944_v27, %v2944_v27  ;;  %v6468_v27 = vld [vmem:[#allocation5 + $0xca0] ss:$8 sps:$4 sm:$0xff]  }
 0xd23   : > { %v2947_v30 = vpack.c.bf16 %v2945_v29, %v2945_v29  ;;  %v6471_v29 = vld [vmem:[#allocation5 + $0xcb0] ss:$8 sps:$4 sm:$0xff]  }
 0xd25   : > { %3186 = vmatprep.mubr.bf16.mxu0 %v2947_v30  ;;  %v6476_v30 = vld [vmem:[#allocation5 + $0xcc4] ss:$8 sps:$4 sm:$0xff]  }
 0xd26   : > { %3187 = vmatmul.mubr.bf16.vlgmr.msra.gmra.mrb[20].mxu0 %v2946_v31  ;;  %v6474_v31 = vld [vmem:[#allocation5 + $0xcc0] ss:$8 sps:$4 sm:$0xff]  }
 0xd27   : > { %3703 = vmatpush1.bf16.msra.mxu0 %v6438_v63  ;;  %v6519_v63 = vld [vmem:[#allocation5 + $0xdb0] ss:$8 sps:$4 sm:$0xff]  }
 0xd28   : > { %3704 = vmatprep.subr.bf16.mxu0 %v6443_v1  ;;  %v6522_v1 = vld [vmem:[#allocation5 + $0xdc0] ss:$8 sps:$4 sm:$0xff]  }
 0xd2b   : > { %3705 = vmatpush1.bf16.msra.mxu0 %v6441_v2  ;;  %v6527_v2 = vld [vmem:[#allocation5 + $0xdd4] ss:$8 sps:$4 sm:$0xff]  }
 0xd2c   : > { %3706 = vmatprep.subr.bf16.mxu0 %v6446_v3  ;;  %v6525_v3 = vld [vmem:[#allocation5 + $0xdd0] ss:$8 sps:$4 sm:$0xff]  }
 0xd2f   : > { %3707 = vmatpush1.bf16.msra.mxu0 %v6444_v4 }
 0xd30   : > { %3708 = vmatprep.subr.bf16.mxu0 %v6449_v5 }
 0xd33   : > { %3709 = vmatpush1.bf16.msra.mxu0 %v6447_v6 }
 0xdf9   : > { %v3188_v40 = vpop.f32.mrb[20].mxu0 }
 0xdfa   : > { %v3189_v41 = vadd.f32 %v3188_v40, %v2987_v39  ;;  %v3190_v43 = vpop.f32.mrb[21].mxu0  ;;  %v6483_v39 = vld [vmem:[#allocation5 + $0xcf0] ss:$8 sps:$4 sm:$0xff]   ;;  %v6488_v40 = vld [vmem:[#allocation5 + $0xd04] ss:$8 sps:$4 sm:$0xff]  }
 0xdfb   : > { %v3191_v44 = vadd.f32 %v3190_v43, %v2991_v42  ;;  %v3192_v45 = vpop.f32.mrb[22].mxu0  ;;  %v6486_v42 = vld [vmem:[#allocation5 + $0xd00] ss:$8 sps:$4 sm:$0xff]   ;;  %3953 = vmatprep.subr.bf16.mxu1 %v6488_v40  ;;  %v6489_v43 = vld [vmem:[#allocation5 + $0xd10] ss:$8 sps:$4 sm:$0xff]  }
 0xdfc   : > { %v3195_v46 = vmax.f32 %v3189_v41, 0.0  ;;  %v3193_v49 = vpop.f32.mrb[23].mxu0  ;;  %v6491_v41 = vld [vmem:[#allocation5 + $0xd14] ss:$8 sps:$4 sm:$0xff]   ;;  %v6492_v45 = vld [vmem:[#allocation5 + $0xd20] ss:$8 sps:$4 sm:$0xff]  }
 0xdfd   : > { %v3196_v52 = vmax.f32 %v3191_v44, 0.0  ;;  %v6494_v44 = vld [vmem:[#allocation5 + $0xd24] ss:$8 sps:$4 sm:$0xff]   ;;  %v6495_v49 = vld [vmem:[#allocation5 + $0xd30] ss:$8 sps:$4 sm:$0xff]  }
 0xdfe   : > { %v3197_v51 = vpack.c.bf16 %v3195_v46, %v3195_v46  ;;  %v6497_v46 = vld [vmem:[#allocation5 + $0xd34] ss:$8 sps:$4 sm:$0xff]   ;;  %v6552_v40 = vld [vmem:[#allocation5 + $0xe60] ss:$8 sps:$4 sm:$0xff]  }
 0xdff   : > { %v3198_v50 = vpack.c.bf16 %v3196_v52, %v3196_v52  ;;  %v6500_v52 = vld [vmem:[#allocation5 + $0xd44] ss:$8 sps:$4 sm:$0xff]  }
 0xe01   : > { %3437 = vmatprep.mubr.bf16.mxu1 %v3198_v50  ;;  %v6498_v50 = vld [vmem:[#allocation5 + $0xd40] ss:$8 sps:$4 sm:$0xff]  }
 0xe02   : > { %3438 = vmatmul.mubr.bf16.vlgmr.msra.gmra.mrb[20].mxu1 %v3197_v51  ;;  %v6503_v51 = vld [vmem:[#allocation5 + $0xd54] ss:$8 sps:$4 sm:$0xff]  }
 0xe03   : > { %3954 = vmatpush1.bf16.msra.mxu1 %v6486_v42  ;;  %v6554_v42 = vld [vmem:[#allocation5 + $0xe64] ss:$8 sps:$4 sm:$0xff]  }
 0xe04   : > { %3955 = vmatprep.subr.bf16.mxu1 %v6491_v41  ;;  %v6557_v41 = vld [vmem:[#allocation5 + $0xe74] ss:$8 sps:$4 sm:$0xff]  }
 0xe07   : > { %3956 = vmatpush1.bf16.msra.mxu1 %v6489_v43  ;;  %v6555_v43 = vld [vmem:[#allocation5 + $0xe70] ss:$8 sps:$4 sm:$0xff]  }
 0xe08   : > { %3957 = vmatprep.subr.bf16.mxu1 %v6494_v44  ;;  %v6560_v44 = vld [vmem:[#allocation5 + $0xe84] ss:$8 sps:$4 sm:$0xff]  }
 0xe0b   : > { %3958 = vmatpush1.bf16.msra.mxu1 %v6492_v45  ;;  %v6558_v45 = vld [vmem:[#allocation5 + $0xe80] ss:$8 sps:$4 sm:$0xff]  }
 0xe0c   : > { %3959 = vmatprep.subr.bf16.mxu1 %v6497_v46  ;;  %v6563_v46 = vld [vmem:[#allocation5 + $0xe94] ss:$8 sps:$4 sm:$0xff]  }
 0xe0f   : > { %3960 = vmatpush1.bf16.msra.mxu1 %v6495_v49  ;;  %v6561_v49 = vld [vmem:[#allocation5 + $0xe90] ss:$8 sps:$4 sm:$0xff]  }
 0xe10   : > { %3961 = vmatprep.subr.bf16.mxu1 %v6500_v52  ;;  %v6566_v52 = vld [vmem:[#allocation5 + $0xea4] ss:$8 sps:$4 sm:$0xff]  }
 0xe13   : > { %3962 = vmatpush1.bf16.msra.mxu1 %v6498_v50  ;;  %v6564_v50 = vld [vmem:[#allocation5 + $0xea0] ss:$8 sps:$4 sm:$0xff]  }
 0xe14   : > { %3963 = vmatprep.subr.bf16.mxu1 %v6503_v51  ;;  %v6569_v51 = vld [vmem:[#allocation5 + $0xeb4] ss:$8 sps:$4 sm:$0xff]  }
 0xe17   : > { %3964 = vmatpush1.bf16.msra.mxu1 %v6501_v53  ;;  %v6567_v53 = vld [vmem:[#allocation5 + $0xeb0] ss:$8 sps:$4 sm:$0xff]  }
 0xed5   : > { %v3439_v56 = vpop.f32.mrb[20].mxu1 }
 0xed6   : > { %v3440_v57 = vadd.f32 %v3439_v56, %v3238_v54  ;;  %v3441_v58 = vpop.f32.mrb[21].mxu1  ;;  %v6506_v54 = vld [vmem:[#allocation5 + $0xd64] ss:$8 sps:$4 sm:$0xff]   ;;  %v6509_v56 = vld [vmem:[#allocation5 + $0xd74] ss:$8 sps:$4 sm:$0xff]  }
 0xed7   : > { %v3442_v59 = vadd.f32 %v3441_v58, %v3242_v55  ;;  %v3443_v60 = vpop.f32.mrb[22].mxu1  ;;  %v6504_v55 = vld [vmem:[#allocation5 + $0xd60] ss:$8 sps:$4 sm:$0xff]   ;;  %3965 = vmatprep.subr.bf16.mxu1 %v6506_v54  ;;  %v6512_v58 = vld [vmem:[#allocation5 + $0xd84] ss:$8 sps:$4 sm:$0xff]  }
 0xed8   : > { %v3446_v61 = vadd.f32 %v3440_v57, %v7327_v48  ;;  %v3444_v62 = vpop.f32.mrb[23].mxu1  ;;  %v6452_v48 = vld [vmem:[#allocation5 + $0xc44] ss:$8 sps:$4 sm:$0xff]   ;;  %3966 = vmatpush1.bf16.msra.mxu1 %v6504_v55  ;;  %v6507_v57 = vld [vmem:[#allocation5 + $0xd70] ss:$8 sps:$4 sm:$0xff]  }
 0xed9   : > { %v3447_v38 = vadd.f32 %v3442_v59, %v7325_v47  ;;  %v6450_v47 = vld [vmem:[#allocation5 + $0xc40] ss:$8 sps:$4 sm:$0xff]   ;;  %3710 = vmatprep.subr.bf16.mxu0 %v6452_v48  ;;  %3967 = vmatprep.subr.bf16.mxu1 %v6509_v56  ;;  %v6515_v60 = vld [vmem:[#allocation5 + $0xd94] ss:$8 sps:$4 sm:$0xff]   ;;  %v6518_v62 = vld [vmem:[#allocation5 + $0xda4] ss:$8 sps:$4 sm:$0xff]  }
 0xeda   : > { %3711 = vmatpush1.bf16.msra.mxu0 %v6450_v47  ;;  %v6510_v59 = vld [vmem:[#allocation5 + $0xd80] ss:$8 sps:$4 sm:$0xff]   ;;  %v3480_v47 = vld [vmem:[#allocation10 + $0x6] sm:$0x3]  ;;  %v6572_v54 = vld [vmem:[#allocation5 + $0xec4] ss:$8 sps:$4 sm:$0xff]  }
 0xedb   : > { %v3448_v37 = vadd.f32 %v3447_v38, %v3446_v61  ;;  %3712 = vmatprep.subr.bf16.mxu0 %v6455_v7  ;;  %v3465_v48 = vld [vmem:[#allocation8 + $0x6] sm:$0x3]  ;;  %v6575_v56 = vld [vmem:[#allocation5 + $0xed4] ss:$8 sps:$4 sm:$0xff]  }
 0xedc   : > { %3968 = vmatpush1.bf16.msra.mxu1 %v6507_v57  ;;  %v3470_v7 = vrot.slane %v3465_v48, %v7239_v34  ;;  %v6570_v55 = vld [vmem:[#allocation5 + $0xec0] ss:$8 sps:$4 sm:$0xff]   ;;  %v6573_v57 = vld [vmem:[#allocation5 + $0xed0] ss:$8 sps:$4 sm:$0xff]  }
 0xedd   : > { %3449 = vadd.xlane.f32.xlu0 %v3448_v37  ;;  %3969 = vmatprep.subr.bf16.mxu1 %v6512_v58  ;;  %v6521_v37 = vld [vmem:[#allocation5 + $0xdb4] ss:$8 sps:$4 sm:$0xff]   ;;  %v3530_v58 = vld [vmem:[#allocation7 + $0x18] sm:$0x3] }
 0xede   : > { %3713 = vmatpush1.bf16.msra.mxu0 %v6453_v10  ;;  %v3474_v10 = vrot.slane %v3465_v48, %v7241_v36  ;;  %v6581_v48 = vld [vmem:[#allocation5 + $0xef4] ss:$8 sps:$4 sm:$0xff]  }
 0xedf   : > { %3714 = vmatprep.subr.bf16.mxu0 %v6458_v13 }
 0xee0   : > { %3970 = vmatpush1.bf16.msra.mxu1 %v6510_v59  ;;  %v3535_v59 = vrot.slane %v3530_v58, %v7239_v34 }
 0xee1   : > { %3971 = vmatprep.subr.bf16.mxu1 %v6515_v60  ;;  %v3539_v60 = vrot.slane %v3530_v58, %v7241_v36 }
 0xee2   : > { %3715 = vmatpush1.bf16.msra.mxu0 %v6456_v11 }
 0xee3   : > { %3716 = vmatprep.subr.bf16.mxu0 %v6461_v12 }
 0xee6   : > { %3717 = vmatpush1.bf16.msra.mxu0 %v6459_v14  ;;  %v3485_v14 = vrot.slane %v3480_v47, %v7239_v34 }
 0xee7   : > { %3718 = vmatprep.subr.bf16.mxu0 %v6464_v15  ;;  %v3489_v15 = vrot.slane %v3480_v47, %v7241_v36  ;;  %v6579_v47 = vld [vmem:[#allocation5 + $0xef0] ss:$8 sps:$4 sm:$0xff]  }
 0xeea   : > { %3719 = vmatpush1.bf16.msra.mxu0 %v6462_v16 }
 0xeeb   : > { %3720 = vmatprep.subr.bf16.mxu0 %v6467_v17 }
 0xeee   : > { %3721 = vmatpush1.bf16.msra.mxu0 %v6465_v18 }
 0xeef   : > { %3722 = vmatprep.subr.bf16.mxu0 %v6470_v26  ;;  %v6534_v26 = vld [vmem:[#allocation5 + $0xe00] ss:$8 sps:$4 sm:$0xff]  }
 0xef2   : > { %3723 = vmatpush1.bf16.msra.mxu0 %v6468_v27  ;;  %v6536_v27 = vld [vmem:[#allocation5 + $0xe04] ss:$8 sps:$4 sm:$0xff]  }
 0xef3   : > { %3724 = vmatprep.subr.bf16.mxu0 %v6473_v28  ;;  %v6539_v28 = vld [vmem:[#allocation5 + $0xe14] ss:$8 sps:$4 sm:$0xff]  }
 0xef6   : > { %3725 = vmatpush1.bf16.msra.mxu0 %v6471_v29  ;;  %v6537_v29 = vld [vmem:[#allocation5 + $0xe10] ss:$8 sps:$4 sm:$0xff]  }
 0xef7   : > { %3726 = vmatprep.subr.bf16.mxu0 %v6476_v30  ;;  %v6542_v30 = vld [vmem:[#allocation5 + $0xe24] ss:$8 sps:$4 sm:$0xff]  }
 0xefa   : > { %3727 = vmatpush1.bf16.msra.mxu0 %v6474_v31  ;;  %v6540_v31 = vld [vmem:[#allocation5 + $0xe20] ss:$8 sps:$4 sm:$0xff]  }
 0xefb   : > { %3728 = vmatprep.subr.bf16.mxu0 %v6479_v32  ;;  %v6545_v32 = vld [vmem:[#allocation5 + $0xe34] ss:$8 sps:$4 sm:$0xff]  }
 0xefe   : > { %3729 = vmatpush1.bf16.msra.mxu0 %v6477_v33  ;;  %v6543_v33 = vld [vmem:[#allocation5 + $0xe30] ss:$8 sps:$4 sm:$0xff]  }
 0xeff   : > { %3730 = vmatprep.subr.bf16.mxu0 %v6482_v9  ;;  %v6548_v9 = vld [vmem:[#allocation5 + $0xe44] ss:$8 sps:$4 sm:$0xff]  }
 0xf02   : > { %3731 = vmatpush1.bf16.msra.mxu0 %v6480_v8  ;;  %v6546_v8 = vld [vmem:[#allocation5 + $0xe40] ss:$8 sps:$4 sm:$0xff]  }
 0xf03   : > { %3732 = vmatprep.subr.bf16.mxu0 %v6485_v35  ;;  %v6551_v35 = vld [vmem:[#allocation5 + $0xe54] ss:$8 sps:$4 sm:$0xff]  }
 0xf06   : > { %3733 = vmatpush1.bf16.msra.mxu0 %v6483_v39  ;;  %v6549_v39 = vld [vmem:[#allocation5 + $0xe50] ss:$8 sps:$4 sm:$0xff]  }
 0xf07   : > { %4204 = vmatprep.subr.bf16.mxu0 %v6536_v27 }
 0xf6a   : > { %v3450_v19 = vpop.xlane.xlu0 %3449 }
 0xf6b   : > { %v3451_v20 = vmul.f32 0.00390625, %v3450_v19 }
 0xf6d   : > { %v7341_v21 = vsub.f32 %v3446_v61, %v3451_v20  ;;  %v7343_v22 = vsub.f32 %v3447_v38, %v3451_v20  ;;  %v6513_v61 = vld [vmem:[#allocation5 + $0xd90] ss:$8 sps:$4 sm:$0xff]   ;;  %v6516_v38 = vld [vmem:[#allocation5 + $0xda0] ss:$8 sps:$4 sm:$0xff]  }
 0xf6e   : > { %3972 = vmatpush1.bf16.msra.mxu1 %v6513_v61 }
 0xf6f   : > { %v3454_v23 = vmul.f32 %v7341_v21, %v7341_v21  ;;  %v3455_v24 = vmul.f32 %v7343_v22, %v7343_v22  ;;  %3973 = vmatprep.subr.bf16.mxu1 %v6518_v62 }
 0xf71   : > { %v3456_v25 = vadd.f32 %v3455_v24, %v3454_v23  ;;  %v6533_v24 = vld [vmem:[#allocation5 + $0xdf4] ss:$8 sps:$4 sm:$0xff]  }
 0xf72   : > { %3974 = vmatpush1.bf16.msra.mxu1 %v6516_v38 }
 0xf73   : > { %3457 = vadd.xlane.f32.xlu1 %v3456_v25  ;;  %3975 = vmatprep.subr.bf16.mxu1 %v6521_v37  ;;  %v6531_v25 = vld [vmem:[#allocation5 + $0xdf0] ss:$8 sps:$4 sm:$0xff]  }
 0xf76   : > { %3976 = vmatpush1.bf16.msra.mxu1 %v6519_v63 }
 0xf77   : > { %3977 = vmatprep.subr.bf16.mxu1 %v6524_v0 }
 0xf7a   : > { %3978 = vmatpush1.bf16.msra.mxu1 %v6522_v1 }
 0xf7b   : > { %3979 = vmatprep.subr.bf16.mxu1 %v6527_v2 }
 0xf7e   : > { %3980 = vmatpush1.bf16.msra.mxu1 %v6525_v3 }
0x1000   : > { %v3458_v4 = vpop.xlane.xlu1 %3457 }
0x1001   : > { %v3459_v5 = vmul.f32 0.00390625, %v3458_v4 }
0x1003   : > { %v3460_v6 = vadd.f32 1e-05, %v3459_v5  ;;  %v6578_v5 = vld [vmem:[#allocation5 + $0xee4] ss:$8 sps:$4 sm:$0xff]  }
0x1005   : > { %6732 = vrsqrt.f32 %v3460_v6  ;;  %v6576_v6 = vld [vmem:[#allocation5 + $0xee0] ss:$8 sps:$4 sm:$0xff]  }
0x100f   : > { %v6733_v13 = vpop.eup %6732 }
0x1010   : > { %v3462_v11 = vmul.f32 %v6733_v13, %v7341_v21  ;;  %v3463_v12 = vmul.f32 %v6733_v13, %v7343_v22  ;;  %v6530_v21 = vld [vmem:[#allocation5 + $0xde4] ss:$8 sps:$4 sm:$0xff]   ;;  %v6528_v22 = vld [vmem:[#allocation5 + $0xde0] ss:$8 sps:$4 sm:$0xff]  }
0x1011   : > { %3981 = vmatprep.subr.bf16.mxu1 %v6530_v21 }
0x1012   : > { %v3478_v16 = vmul.f32 %v3474_v10, %v3463_v12  ;;  %v3477_v17 = vmul.f32 %v3470_v7, %v3462_v11  ;;  %3982 = vmatpush1.bf16.msra.mxu1 %v6528_v22  ;;  %v3781_v7 = vld [vmem:[#allocation7 + $0x1a] sm:$0x3] }
0x1013   : > { %3983 = vmatprep.subr.bf16.mxu1 %v6533_v24  ;;  %v3786_v10 = vrot.slane %v3781_v7, %v7239_v34  ;;  %v3790_v13 = vrot.slane %v3781_v7, %v7241_v36  ;;  %v4032_v24 = vld [vmem:[#allocation7 + $0x1c] sm:$0x3] }
0x1014   : > { %v7355_v18 = vadd.f32 %v3489_v15, %v3478_v16  ;;  %v7357_v19 = vadd.f32 %v3485_v14, %v3477_v17  ;;  %v6629_v7 = vld [vmem:[#allocation5 + $0xff4] ss:$8 sps:$4 sm:$0xff]  }
0x1016   : > { %v3495_v20 = vpack.c.bf16 %v7355_v18, %v7355_v18  ;;  %v3494_v23 = vpack.c.bf16 %v7357_v19, %v7357_v19  ;;  %3984 = vmatpush1.bf16.msra.mxu1 %v6531_v25  ;;  %v4037_v25 = vrot.slane %v4032_v24, %v7239_v34 }
0x1018   : > { %3734 = vmatprep.mubr.bf16.mxu0 %v3495_v20 }
0x1019   : > { %3735 = vmatmul.mubr.bf16.vlgmr.msra.gmra.mrb[24].mxu0 %v3494_v23 }
0x101a   : > { %4205 = vmatpush1.bf16.msra.mxu0 %v6534_v26  ;;  %v4041_v26 = vrot.slane %v4032_v24, %v7241_v36  ;;  %v6645_v24 = vld [vmem:[#allocation5 + $0x1050] ss:$8 sps:$4 sm:$0xff]  }
0x101b   : > { %4206 = vmatprep.subr.bf16.mxu0 %v6539_v28 }
0x101e   : > { %4207 = vmatpush1.bf16.msra.mxu0 %v6537_v29 }
0x101f   : > { %4208 = vmatprep.subr.bf16.mxu0 %v6542_v30 }
0x1022   : > { %4209 = vmatpush1.bf16.msra.mxu0 %v6540_v31 }
0x1023   : > { %4210 = vmatprep.subr.bf16.mxu0 %v6545_v32 }
0x1026   : > { %4211 = vmatpush1.bf16.msra.mxu0 %v6543_v33 }
0x1027   : > { %4212 = vmatprep.subr.bf16.mxu0 %v6548_v9 }
0x102a   : > { %4213 = vmatpush1.bf16.msra.mxu0 %v6546_v8 }
0x102b   : > { %4214 = vmatprep.subr.bf16.mxu0 %v6551_v35  ;;  %v6582_v35 = vld [vmem:[#allocation5 + $0xf00] ss:$8 sps:$4 sm:$0xff]  }
0x102e   : > { %4215 = vmatpush1.bf16.msra.mxu0 %v6549_v39  ;;  %v6584_v39 = vld [vmem:[#allocation5 + $0xf04] ss:$8 sps:$4 sm:$0xff]  }
0x102f   : > { %4216 = vmatprep.subr.bf16.mxu0 %v6554_v42  ;;  %v6587_v42 = vld [vmem:[#allocation5 + $0xf14] ss:$8 sps:$4 sm:$0xff]   ;;  %4501 = vmatprep.subr.bf16.mxu1 %v6584_v39  ;;  %v6668_v39 = vld [vmem:[#allocation5 + $0x10c4] ss:$8 sps:$4 sm:$0xff]  }
0x1032   : > { %4217 = vmatpush1.bf16.msra.mxu0 %v6552_v40  ;;  %v6585_v40 = vld [vmem:[#allocation5 + $0xf10] ss:$8 sps:$4 sm:$0xff]  }
0x1033   : > { %4218 = vmatprep.subr.bf16.mxu0 %v6557_v41  ;;  %v6590_v41 = vld [vmem:[#allocation5 + $0xf24] ss:$8 sps:$4 sm:$0xff]  }
0x1036   : > { %4219 = vmatpush1.bf16.msra.mxu0 %v6555_v43  ;;  %v6588_v43 = vld [vmem:[#allocation5 + $0xf20] ss:$8 sps:$4 sm:$0xff]  }
0x1037   : > { %4220 = vmatprep.subr.bf16.mxu0 %v6560_v44  ;;  %v6593_v44 = vld [vmem:[#allocation5 + $0xf34] ss:$8 sps:$4 sm:$0xff]  }
0x103a   : > { %4221 = vmatpush1.bf16.msra.mxu0 %v6558_v45  ;;  %v6591_v45 = vld [vmem:[#allocation5 + $0xf30] ss:$8 sps:$4 sm:$0xff]  }
0x103b   : > { %4222 = vmatprep.subr.bf16.mxu0 %v6563_v46  ;;  %v6599_v46 = vld [vmem:[#allocation5 + $0xf54] ss:$8 sps:$4 sm:$0xff]  }
0x103e   : > { %4223 = vmatpush1.bf16.msra.mxu0 %v6561_v49  ;;  %v6597_v49 = vld [vmem:[#allocation5 + $0xf50] ss:$8 sps:$4 sm:$0xff]  }
0x103f   : > { %4224 = vmatprep.subr.bf16.mxu0 %v6566_v52  ;;  %v6602_v52 = vld [vmem:[#allocation5 + $0xf64] ss:$8 sps:$4 sm:$0xff]  }
0x1042   : > { %4225 = vmatpush1.bf16.msra.mxu0 %v6564_v50  ;;  %v6600_v50 = vld [vmem:[#allocation5 + $0xf60] ss:$8 sps:$4 sm:$0xff]  }
0x1043   : > { %4226 = vmatprep.subr.bf16.mxu0 %v6569_v51  ;;  %v6605_v51 = vld [vmem:[#allocation5 + $0xf74] ss:$8 sps:$4 sm:$0xff]  }
0x1046   : > { %4227 = vmatpush1.bf16.msra.mxu0 %v6567_v53  ;;  %v6603_v53 = vld [vmem:[#allocation5 + $0xf70] ss:$8 sps:$4 sm:$0xff]  }
0x1047   : > { %4228 = vmatprep.subr.bf16.mxu0 %v6572_v54  ;;  %v6608_v54 = vld [vmem:[#allocation5 + $0xf84] ss:$8 sps:$4 sm:$0xff]  }
0x104a   : > { %4229 = vmatpush1.bf16.msra.mxu0 %v6570_v55  ;;  %v6606_v55 = vld [vmem:[#allocation5 + $0xf80] ss:$8 sps:$4 sm:$0xff]  }
0x104b   : > { %4230 = vmatprep.subr.bf16.mxu0 %v6575_v56  ;;  %v6611_v56 = vld [vmem:[#allocation5 + $0xf94] ss:$8 sps:$4 sm:$0xff]  }
0x104e   : > { %4231 = vmatpush1.bf16.msra.mxu0 %v6573_v57  ;;  %v6609_v57 = vld [vmem:[#allocation5 + $0xf90] ss:$8 sps:$4 sm:$0xff]  }
0x104f   : > { %4232 = vmatprep.subr.bf16.mxu0 %v6578_v5  ;;  %v6623_v5 = vld [vmem:[#allocation5 + $0xfd4] ss:$8 sps:$4 sm:$0xff]  }
0x1052   : > { %4233 = vmatpush1.bf16.msra.mxu0 %v6576_v6  ;;  %v6621_v6 = vld [vmem:[#allocation5 + $0xfd0] ss:$8 sps:$4 sm:$0xff]  }
0x1053   : > { %4234 = vmatprep.subr.bf16.mxu0 %v6581_v48  ;;  %v6626_v48 = vld [vmem:[#allocation5 + $0xfe4] ss:$8 sps:$4 sm:$0xff]  }
0x1056   : > { %4235 = vmatpush1.bf16.msra.mxu0 %v6579_v47  ;;  %v6624_v47 = vld [vmem:[#allocation5 + $0xfe0] ss:$8 sps:$4 sm:$0xff]  }
0x10ec   : > { %v3736_v61 = vpop.f32.mrb[24].mxu0 }
0x10ed   : > { %v3737_v62 = vadd.f32 %v3736_v61, %v3535_v59  ;;  %v3738_v38 = vpop.f32.mrb[25].mxu0 }
0x10ee   : > { %v3739_v37 = vadd.f32 %v3738_v38, %v3539_v60  ;;  %v3740_v63 = vpop.f32.mrb[26].mxu0 }
0x10ef   : > { %v3743_v0 = vmax.f32 %v3737_v62, 0.0  ;;  %v3741_v1 = vpop.f32.mrb[27].mxu0  ;;  %v6614_v63 = vld [vmem:[#allocation5 + $0xfa4] ss:$8 sps:$4 sm:$0xff]  }
0x10f0   : > { %v3744_v2 = vmax.f32 %v3739_v37, 0.0  ;;  %v6617_v1 = vld [vmem:[#allocation5 + $0xfb4] ss:$8 sps:$4 sm:$0xff]  }
0x10f1   : > { %v3745_v4 = vpack.c.bf16 %v3743_v0, %v3743_v0  ;;  %v6612_v0 = vld [vmem:[#allocation5 + $0xfa0] ss:$8 sps:$4 sm:$0xff]  }
0x10f2   : > { %v3746_v3 = vpack.c.bf16 %v3744_v2, %v3744_v2  ;;  %v6615_v2 = vld [vmem:[#allocation5 + $0xfb0] ss:$8 sps:$4 sm:$0xff]  }
0x10f4   : > { %3985 = vmatprep.mubr.bf16.mxu1 %v3746_v3  ;;  %v6620_v3 = vld [vmem:[#allocation5 + $0xfc4] ss:$8 sps:$4 sm:$0xff]  }
0x10f5   : > { %3986 = vmatmul.mubr.bf16.vlgmr.msra.gmra.mrb[24].mxu1 %v3745_v4  ;;  %v6618_v4 = vld [vmem:[#allocation5 + $0xfc0] ss:$8 sps:$4 sm:$0xff]  }
0x10f6   : > { %4502 = vmatpush1.bf16.msra.mxu1 %v6582_v35  ;;  %v6663_v35 = vld [vmem:[#allocation5 + $0x10b0] ss:$8 sps:$4 sm:$0xff]  }
0x10f7   : > { %4503 = vmatprep.subr.bf16.mxu1 %v6587_v42  ;;  %v6666_v42 = vld [vmem:[#allocation5 + $0x10c0] ss:$8 sps:$4 sm:$0xff]  }
0x10fa   : > { %4504 = vmatpush1.bf16.msra.mxu1 %v6585_v40  ;;  %v6671_v40 = vld [vmem:[#allocation5 + $0x10d4] ss:$8 sps:$4 sm:$0xff]  }
0x10fb   : > { %4505 = vmatprep.subr.bf16.mxu1 %v6590_v41  ;;  %v6669_v41 = vld [vmem:[#allocation5 + $0x10d0] ss:$8 sps:$4 sm:$0xff]  }
0x10fe   : > { %4506 = vmatpush1.bf16.msra.mxu1 %v6588_v43 }
0x10ff   : > { %4507 = vmatprep.subr.bf16.mxu1 %v6593_v44 }
0x1102   : > { %4508 = vmatpush1.bf16.msra.mxu1 %v6591_v45 }
0x11c8   : > { %v3987_v11 = vpop.f32.mrb[24].mxu1 }
0x11c9   : > { %v3988_v12 = vadd.f32 %v3987_v11, %v3786_v10  ;;  %v3989_v14 = vpop.f32.mrb[25].mxu1  ;;  %v6627_v10 = vld [vmem:[#allocation5 + $0xff0] ss:$8 sps:$4 sm:$0xff]   ;;  %v6632_v11 = vld [vmem:[#allocation5 + $0x1004] ss:$8 sps:$4 sm:$0xff]  }
0x11ca   : > { %v3990_v15 = vadd.f32 %v3989_v14, %v3790_v13  ;;  %v3991_v16 = vpop.f32.mrb[26].mxu1  ;;  %v6630_v13 = vld [vmem:[#allocation5 + $0x1000] ss:$8 sps:$4 sm:$0xff]   ;;  %4752 = vmatprep.subr.bf16.mxu0 %v6632_v11  ;;  %v6633_v14 = vld [vmem:[#allocation5 + $0x1010] ss:$8 sps:$4 sm:$0xff]  }
0x11cb   : > { %v3994_v17 = vmax.f32 %v3988_v12, 0.0  ;;  %v3992_v20 = vpop.f32.mrb[27].mxu1  ;;  %v6635_v12 = vld [vmem:[#allocation5 + $0x1014] ss:$8 sps:$4 sm:$0xff]   ;;  %v6636_v16 = vld [vmem:[#allocation5 + $0x1020] ss:$8 sps:$4 sm:$0xff]  }
0x11cc   : > { %v3995_v23 = vmax.f32 %v3990_v15, 0.0  ;;  %v6638_v15 = vld [vmem:[#allocation5 + $0x1024] ss:$8 sps:$4 sm:$0xff]   ;;  %v6639_v20 = vld [vmem:[#allocation5 + $0x1030] ss:$8 sps:$4 sm:$0xff]  }
0x11cd   : > { %v3996_v22 = vpack.c.bf16 %v3994_v17, %v3994_v17  ;;  %v6641_v17 = vld [vmem:[#allocation5 + $0x1034] ss:$8 sps:$4 sm:$0xff]   ;;  %v6696_v11 = vld [vmem:[#allocation5 + $0x1160] ss:$8 sps:$4 sm:$0xff]  }
0x11ce   : > { %v3997_v21 = vpack.c.bf16 %v3995_v23, %v3995_v23  ;;  %v6644_v23 = vld [vmem:[#allocation5 + $0x1044] ss:$8 sps:$4 sm:$0xff]  }
0x11d0   : > { %4236 = vmatprep.mubr.bf16.mxu0 %v3997_v21  ;;  %v6642_v21 = vld [vmem:[#allocation5 + $0x1040] ss:$8 sps:$4 sm:$0xff]  }
0x11d1   : > { %4237 = vmatmul.mubr.bf16.vlgmr.msra.gmra.mrb[28].mxu0 %v3996_v22  ;;  %v6647_v22 = vld [vmem:[#allocation5 + $0x1054] ss:$8 sps:$4 sm:$0xff]  }
0x11d2   : > { %4753 = vmatpush1.bf16.msra.mxu0 %v6630_v13  ;;  %v6698_v13 = vld [vmem:[#allocation5 + $0x1164] ss:$8 sps:$4 sm:$0xff]  }
0x11d3   : > { %4754 = vmatprep.subr.bf16.mxu0 %v6635_v12  ;;  %v6701_v12 = vld [vmem:[#allocation5 + $0x1174] ss:$8 sps:$4 sm:$0xff]  }
0x11d6   : > { %4755 = vmatpush1.bf16.msra.mxu0 %v6633_v14  ;;  %v6699_v14 = vld [vmem:[#allocation5 + $0x1170] ss:$8 sps:$4 sm:$0xff]  }
0x11d7   : > { %4756 = vmatprep.subr.bf16.mxu0 %v6638_v15  ;;  %v6704_v15 = vld [vmem:[#allocation5 + $0x1184] ss:$8 sps:$4 sm:$0xff]  }
0x11da   : > { %4757 = vmatpush1.bf16.msra.mxu0 %v6636_v16  ;;  %v6702_v16 = vld [vmem:[#allocation5 + $0x1180] ss:$8 sps:$4 sm:$0xff]  }
0x11db   : > { %4758 = vmatprep.subr.bf16.mxu0 %v6641_v17  ;;  %v6707_v17 = vld [vmem:[#allocation5 + $0x1194] ss:$8 sps:$4 sm:$0xff]  }
0x11de   : > { %4759 = vmatpush1.bf16.msra.mxu0 %v6639_v20  ;;  %v6705_v20 = vld [vmem:[#allocation5 + $0x1190] ss:$8 sps:$4 sm:$0xff]  }
0x11df   : > { %4760 = vmatprep.subr.bf16.mxu0 %v6644_v23  ;;  %v6710_v23 = vld [vmem:[#allocation5 + $0x11a4] ss:$8 sps:$4 sm:$0xff]  }
0x11e2   : > { %4761 = vmatpush1.bf16.msra.mxu0 %v6642_v21  ;;  %v6708_v21 = vld [vmem:[#allocation5 + $0x11a0] ss:$8 sps:$4 sm:$0xff]  }
0x11e3   : > { %4762 = vmatprep.subr.bf16.mxu0 %v6647_v22  ;;  %v6713_v22 = vld [vmem:[#allocation5 + $0x11b4] ss:$8 sps:$4 sm:$0xff]  }
0x11e6   : > { %4763 = vmatpush1.bf16.msra.mxu0 %v6645_v24  ;;  %v6711_v24 = vld [vmem:[#allocation5 + $0x11b0] ss:$8 sps:$4 sm:$0xff]  }
0x12a4   : > { %v4238_v27 = vpop.f32.mrb[28].mxu0 }
0x12a5   : > { %v4239_v28 = vadd.f32 %v4238_v27, %v4037_v25  ;;  %v4240_v29 = vpop.f32.mrb[29].mxu0  ;;  %v6650_v25 = vld [vmem:[#allocation5 + $0x1064] ss:$8 sps:$4 sm:$0xff]   ;;  %v6653_v27 = vld [vmem:[#allocation5 + $0x1074] ss:$8 sps:$4 sm:$0xff]  }
0x12a6   : > { %v4241_v30 = vadd.f32 %v4240_v29, %v4041_v26  ;;  %v4242_v31 = vpop.f32.mrb[30].mxu0  ;;  %v6648_v26 = vld [vmem:[#allocation5 + $0x1060] ss:$8 sps:$4 sm:$0xff]   ;;  %4764 = vmatprep.subr.bf16.mxu0 %v6650_v25  ;;  %v6656_v29 = vld [vmem:[#allocation5 + $0x1084] ss:$8 sps:$4 sm:$0xff]  }
0x12a7   : > { %v4245_v32 = vadd.f32 %v4239_v28, %v7357_v19  ;;  %v4243_v33 = vpop.f32.mrb[31].mxu0  ;;  %v6596_v19 = vld [vmem:[#allocation5 + $0xf44] ss:$8 sps:$4 sm:$0xff]   ;;  %4765 = vmatpush1.bf16.msra.mxu0 %v6648_v26  ;;  %v6651_v28 = vld [vmem:[#allocation5 + $0x1070] ss:$8 sps:$4 sm:$0xff]  }
0x12a8   : > { %v4246_v9 = vadd.f32 %v4241_v30, %v7355_v18  ;;  %v6594_v18 = vld [vmem:[#allocation5 + $0xf40] ss:$8 sps:$4 sm:$0xff]   ;;  %4509 = vmatprep.subr.bf16.mxu1 %v6596_v19  ;;  %4766 = vmatprep.subr.bf16.mxu0 %v6653_v27  ;;  %v6659_v31 = vld [vmem:[#allocation5 + $0x1094] ss:$8 sps:$4 sm:$0xff]   ;;  %v6662_v33 = vld [vmem:[#allocation5 + $0x10a4] ss:$8 sps:$4 sm:$0xff]  }
0x12a9   : > { %4510 = vmatpush1.bf16.msra.mxu1 %v6594_v18  ;;  %v6654_v30 = vld [vmem:[#allocation5 + $0x1080] ss:$8 sps:$4 sm:$0xff]   ;;  %v4264_v19 = vld [vmem:[#allocation8 + $0x8] sm:$0x3]  ;;  %v4279_v18 = vld [vmem:[#allocation10 + $0x8] sm:$0x3] }
0x12aa   : > { %v4247_v8 = vadd.f32 %v4246_v9, %v4245_v32  ;;  %4511 = vmatprep.subr.bf16.mxu1 %v6599_v46  ;;  %v4269_v46 = vrot.slane %v4264_v19, %v7239_v34  ;;  %v6716_v25 = vld [vmem:[#allocation5 + $0x11c4] ss:$8 sps:$4 sm:$0xff]   ;;  %v6714_v26 = vld [vmem:[#allocation5 + $0x11c0] ss:$8 sps:$4 sm:$0xff]   ;;  %v6719_v27 = vld [vmem:[#allocation5 + $0x11d4] ss:$8 sps:$4 sm:$0xff]  }
0x12ab   : > { %4767 = vmatpush1.bf16.msra.mxu0 %v6651_v28  ;;  %v6717_v28 = vld [vmem:[#allocation5 + $0x11d0] ss:$8 sps:$4 sm:$0xff]  }
0x12ac   : > { %4248 = vadd.xlane.f32.xlu0 %v4247_v8  ;;  %4768 = vmatprep.subr.bf16.mxu0 %v6656_v29  ;;  %v6665_v8 = vld [vmem:[#allocation5 + $0x10b4] ss:$8 sps:$4 sm:$0xff]  }
0x12ad   : > { %4512 = vmatpush1.bf16.msra.mxu1 %v6597_v49  ;;  %v4273_v49 = vrot.slane %v4264_v19, %v7241_v36  ;;  %v4329_v29 = vld [vmem:[#allocation7 + $0x1e] sm:$0x3] }
0x12ae   : > { %4513 = vmatprep.subr.bf16.mxu1 %v6602_v52  ;;  %v6725_v19 = vld [vmem:[#allocation5 + $0x11f4] ss:$8 sps:$4 sm:$0xff]  }
0x12af   : > { %4769 = vmatpush1.bf16.msra.mxu0 %v6654_v30  ;;  %v4334_v30 = vrot.slane %v4329_v29, %v7239_v34 }
0x12b0   : > { %4770 = vmatprep.subr.bf16.mxu0 %v6659_v31  ;;  %v4338_v31 = vrot.slane %v4329_v29, %v7241_v36 }
0x12b1   : > { %4514 = vmatpush1.bf16.msra.mxu1 %v6600_v50 }
0x12b2   : > { %4515 = vmatprep.subr.bf16.mxu1 %v6605_v51 }
0x12b5   : > { %4516 = vmatpush1.bf16.msra.mxu1 %v6603_v53  ;;  %v4284_v53 = vrot.slane %v4279_v18, %v7239_v34 }
0x12b6   : > { %4517 = vmatprep.subr.bf16.mxu1 %v6608_v54  ;;  %v4288_v54 = vrot.slane %v4279_v18, %v7241_v36  ;;  %v6723_v18 = vld [vmem:[#allocation5 + $0x11f0] ss:$8 sps:$4 sm:$0xff]  }
0x12b9   : > { %4518 = vmatpush1.bf16.msra.mxu1 %v6606_v55 }
0x12ba   : > { %4519 = vmatprep.subr.bf16.mxu1 %v6611_v56 }
0x12bd   : > { %4520 = vmatpush1.bf16.msra.mxu1 %v6609_v57 }
0x12be   : > { %4521 = vmatprep.subr.bf16.mxu1 %v6614_v63  ;;  %v6678_v63 = vld [vmem:[#allocation5 + $0x1100] ss:$8 sps:$4 sm:$0xff]  }
0x12c1   : > { %4522 = vmatpush1.bf16.msra.mxu1 %v6612_v0  ;;  %v6680_v0 = vld [vmem:[#allocation5 + $0x1104] ss:$8 sps:$4 sm:$0xff]  }
0x12c2   : > { %4523 = vmatprep.subr.bf16.mxu1 %v6617_v1  ;;  %v6683_v1 = vld [vmem:[#allocation5 + $0x1114] ss:$8 sps:$4 sm:$0xff]  }
0x12c5   : > { %4524 = vmatpush1.bf16.msra.mxu1 %v6615_v2  ;;  %v6681_v2 = vld [vmem:[#allocation5 + $0x1110] ss:$8 sps:$4 sm:$0xff]  }
0x12c6   : > { %4525 = vmatprep.subr.bf16.mxu1 %v6620_v3  ;;  %v6686_v3 = vld [vmem:[#allocation5 + $0x1124] ss:$8 sps:$4 sm:$0xff]  }
0x12c9   : > { %4526 = vmatpush1.bf16.msra.mxu1 %v6618_v4  ;;  %v6684_v4 = vld [vmem:[#allocation5 + $0x1120] ss:$8 sps:$4 sm:$0xff]  }
0x12ca   : > { %4527 = vmatprep.subr.bf16.mxu1 %v6623_v5  ;;  %v6689_v5 = vld [vmem:[#allocation5 + $0x1134] ss:$8 sps:$4 sm:$0xff]  }
0x12cd   : > { %4528 = vmatpush1.bf16.msra.mxu1 %v6621_v6  ;;  %v6687_v6 = vld [vmem:[#allocation5 + $0x1130] ss:$8 sps:$4 sm:$0xff]  }
0x12ce   : > { %4529 = vmatprep.subr.bf16.mxu1 %v6626_v48  ;;  %v6692_v48 = vld [vmem:[#allocation5 + $0x1144] ss:$8 sps:$4 sm:$0xff]  }
0x12d1   : > { %4530 = vmatpush1.bf16.msra.mxu1 %v6624_v47  ;;  %v6690_v47 = vld [vmem:[#allocation5 + $0x1140] ss:$8 sps:$4 sm:$0xff]  }
0x12d2   : > { %4531 = vmatprep.subr.bf16.mxu1 %v6629_v7  ;;  %v6695_v7 = vld [vmem:[#allocation5 + $0x1154] ss:$8 sps:$4 sm:$0xff]  }
0x12d5   : > { %4532 = vmatpush1.bf16.msra.mxu1 %v6627_v10  ;;  %v6693_v10 = vld [vmem:[#allocation5 + $0x1150] ss:$8 sps:$4 sm:$0xff]  }
0x12d6   : > { %5003 = vmatprep.subr.bf16.mxu1 %v6680_v0 }
0x1339   : > { %v4249_v58 = vpop.xlane.xlu0 %4248 }
0x133a   : > { %v4250_v59 = vmul.f32 0.00390625, %v4249_v58 }
0x133c   : > { %v7371_v60 = vsub.f32 %v4245_v32, %v4250_v59  ;;  %v7373_v61 = vsub.f32 %v4246_v9, %v4250_v59  ;;  %v6657_v32 = vld [vmem:[#allocation5 + $0x1090] ss:$8 sps:$4 sm:$0xff]   ;;  %v6660_v9 = vld [vmem:[#allocation5 + $0x10a0] ss:$8 sps:$4 sm:$0xff]  }
0x133d   : > { %4771 = vmatpush1.bf16.msra.mxu0 %v6657_v32 }
0x133e   : > { %v4253_v62 = vmul.f32 %v7371_v60, %v7371_v60  ;;  %v4254_v38 = vmul.f32 %v7373_v61, %v7373_v61  ;;  %4772 = vmatprep.subr.bf16.mxu0 %v6662_v33 }
0x1340   : > { %v4255_v37 = vadd.f32 %v4254_v38, %v4253_v62  ;;  %v6677_v38 = vld [vmem:[#allocation5 + $0x10f4] ss:$8 sps:$4 sm:$0xff]  }
0x1341   : > { %4773 = vmatpush1.bf16.msra.mxu0 %v6660_v9 }
0x1342   : > { %4256 = vadd.xlane.f32.xlu1 %v4255_v37  ;;  %4774 = vmatprep.subr.bf16.mxu0 %v6665_v8  ;;  %v6675_v37 = vld [vmem:[#allocation5 + $0x10f0] ss:$8 sps:$4 sm:$0xff]  }
0x1345   : > { %4775 = vmatpush1.bf16.msra.mxu0 %v6663_v35 }
0x1346   : > { %4776 = vmatprep.subr.bf16.mxu0 %v6668_v39 }
0x1349   : > { %4777 = vmatpush1.bf16.msra.mxu0 %v6666_v42 }
0x134a   : > { %4778 = vmatprep.subr.bf16.mxu0 %v6671_v40 }
0x134d   : > { %4779 = vmatpush1.bf16.msra.mxu0 %v6669_v41 }
0x13cf   : > { %v4257_v43 = vpop.xlane.xlu1 %4256 }
0x13d0   : > { %v4258_v44 = vmul.f32 0.00390625, %v4257_v43 }
0x13d2   : > { %v4259_v45 = vadd.f32 1e-05, %v4258_v44  ;;  %v6722_v44 = vld [vmem:[#allocation5 + $0x11e4] ss:$8 sps:$4 sm:$0xff]  }
0x13d4   : > { %6734 = vrsqrt.f32 %v4259_v45  ;;  %v6720_v45 = vld [vmem:[#allocation5 + $0x11e0] ss:$8 sps:$4 sm:$0xff]  }
0x13de   : > { %v6735_v52 = vpop.eup %6734 }
0x13df   : > { %v4261_v50 = vmul.f32 %v6735_v52, %v7371_v60  ;;  %v4262_v51 = vmul.f32 %v6735_v52, %v7373_v61  ;;  %v6674_v60 = vld [vmem:[#allocation5 + $0x10e4] ss:$8 sps:$4 sm:$0xff]   ;;  %v6672_v61 = vld [vmem:[#allocation5 + $0x10e0] ss:$8 sps:$4 sm:$0xff]  }
0x13e0   : > { %4780 = vmatprep.subr.bf16.mxu0 %v6674_v60 }
0x13e1   : > { %v4277_v55 = vmul.f32 %v4273_v49, %v4262_v51  ;;  %v4276_v56 = vmul.f32 %v4269_v46, %v4261_v50  ;;  %4781 = vmatpush1.bf16.msra.mxu0 %v6672_v61  ;;  %v4580_v46 = vld [vmem:[#allocation7 + $0x20] sm:$0x3] }
0x13e2   : > { %4782 = vmatprep.subr.bf16.mxu0 %v6677_v38  ;;  %v4585_v49 = vrot.slane %v4580_v46, %v7239_v34  ;;  %v4589_v52 = vrot.slane %v4580_v46, %v7241_v36  ;;  %v4831_v38 = vld [vmem:[#allocation7 + $0x22] sm:$0x3] }
0x13e3   : > { %v7385_v57 = vadd.f32 %v4288_v54, %v4277_v55  ;;  %v7387_v58 = vadd.f32 %v4284_v53, %v4276_v56 }
0x13e5   : > { %v4294_v59 = vpack.c.bf16 %v7385_v57, %v7385_v57  ;;  %v4293_v62 = vpack.c.bf16 %v7387_v58, %v7387_v58  ;;  %4783 = vmatpush1.bf16.msra.mxu0 %v6675_v37  ;;  %v4836_v37 = vrot.slane %v4831_v38, %v7239_v34 }
0x13e7   : > { %4533 = vmatprep.mubr.bf16.mxu1 %v4294_v59 }
0x13e8   : > { %4534 = vmatmul.mubr.bf16.vlgmr.msra.gmra.mrb[28].mxu1 %v4293_v62 }
0x13e9   : > { %5004 = vmatpush1.bf16.msra.mxu1 %v6678_v63  ;;  %v4840_v63 = vrot.slane %v4831_v38, %v7241_v36 }
0x13ea   : > { %5005 = vmatprep.subr.bf16.mxu1 %v6683_v1 }
0x13ed   : > { %5006 = vmatpush1.bf16.msra.mxu1 %v6681_v2 }
0x13ee   : > { %5007 = vmatprep.subr.bf16.mxu1 %v6686_v3 }
0x13f1   : > { %5008 = vmatpush1.bf16.msra.mxu1 %v6684_v4 }
0x13f2   : > { %5009 = vmatprep.subr.bf16.mxu1 %v6689_v5 }
0x13f5   : > { %5010 = vmatpush1.bf16.msra.mxu1 %v6687_v6 }
0x13f6   : > { %5011 = vmatprep.subr.bf16.mxu1 %v6692_v48 }
0x13f9   : > { %5012 = vmatpush1.bf16.msra.mxu1 %v6690_v47 }
0x13fa   : > { %5013 = vmatprep.subr.bf16.mxu1 %v6695_v7 }
0x13fd   : > { %5014 = vmatpush1.bf16.msra.mxu1 %v6693_v10 }
0x13fe   : > { %5015 = vmatprep.subr.bf16.mxu1 %v6698_v13 }
0x1401   : > { %5016 = vmatpush1.bf16.msra.mxu1 %v6696_v11 }
0x1402   : > { %5017 = vmatprep.subr.bf16.mxu1 %v6701_v12 }
0x1405   : > { %5018 = vmatpush1.bf16.msra.mxu1 %v6699_v14 }
0x1406   : > { %5019 = vmatprep.subr.bf16.mxu1 %v6704_v15 }
0x1409   : > { %5020 = vmatpush1.bf16.msra.mxu1 %v6702_v16 }
0x140a   : > { %5021 = vmatprep.subr.bf16.mxu1 %v6707_v17 }
0x140d   : > { %5022 = vmatpush1.bf16.msra.mxu1 %v6705_v20 }
0x140e   : > { %5023 = vmatprep.subr.bf16.mxu1 %v6710_v23 }
0x1411   : > { %5024 = vmatpush1.bf16.msra.mxu1 %v6708_v21 }
0x1412   : > { %5025 = vmatprep.subr.bf16.mxu1 %v6713_v22 }
0x1415   : > { %5026 = vmatpush1.bf16.msra.mxu1 %v6711_v24 }
0x1416   : > { %5027 = vmatprep.subr.bf16.mxu1 %v6716_v25 }
0x1419   : > { %5028 = vmatpush1.bf16.msra.mxu1 %v6714_v26 }
0x141a   : > { %5029 = vmatprep.subr.bf16.mxu1 %v6719_v27 }
0x141d   : > { %5030 = vmatpush1.bf16.msra.mxu1 %v6717_v28 }
0x141e   : > { %5031 = vmatprep.subr.bf16.mxu1 %v6722_v44 }
0x1421   : > { %5032 = vmatpush1.bf16.msra.mxu1 %v6720_v45 }
0x1422   : > { %5033 = vmatprep.subr.bf16.mxu1 %v6725_v19 }
0x1425   : > { %5034 = vmatpush1.bf16.msra.mxu1 %v6723_v18 }
0x14bb   : > { %v4535_v32 = vpop.f32.mrb[28].mxu1 }
0x14bc   : > { %v4536_v33 = vadd.f32 %v4535_v32, %v4334_v30  ;;  %v4537_v9 = vpop.f32.mrb[29].mxu1 }
0x14bd   : > { %v4538_v8 = vadd.f32 %v4537_v9, %v4338_v31  ;;  %v4539_v35 = vpop.f32.mrb[30].mxu1 }
0x14be   : > { %v4542_v39 = vmax.f32 %v4536_v33, 0.0  ;;  %v4540_v42 = vpop.f32.mrb[31].mxu1 }
0x14bf   : > { %v4543_v40 = vmax.f32 %v4538_v8, 0.0 }
0x14c0   : > { %v4544_v43 = vpack.c.bf16 %v4542_v39, %v4542_v39 }
0x14c1   : > { %v4545_v41 = vpack.c.bf16 %v4543_v40, %v4543_v40 }
0x14c3   : > { %4784 = vmatprep.mubr.bf16.mxu0 %v4545_v41 }
0x14c4   : > { %4785 = vmatmul.mubr.bf16.vlgmr.msra.gmra.mrb[32].mxu0 %v4544_v43 }
0x1597   : > { %v4786_v50 = vpop.f32.mrb[32].mxu0 }
0x1598   : > { %v4787_v51 = vadd.f32 %v4786_v50, %v4585_v49  ;;  %v4788_v53 = vpop.f32.mrb[33].mxu0 }
0x1599   : > { %v4789_v54 = vadd.f32 %v4788_v53, %v4589_v52  ;;  %v4790_v55 = vpop.f32.mrb[34].mxu0 }
0x159a   : > { %v4793_v56 = vmax.f32 %v4787_v51, 0.0  ;;  %v4791_v59 = vpop.f32.mrb[35].mxu0 }
0x159b   : > { %v4794_v62 = vmax.f32 %v4789_v54, 0.0 }
0x159c   : > { %v4795_v61 = vpack.c.bf16 %v4793_v56, %v4793_v56 }
0x159d   : > { %v4796_v60 = vpack.c.bf16 %v4794_v62, %v4794_v62 }
0x159f   : > { %5035 = vmatprep.mubr.bf16.mxu1 %v4796_v60 }
0x15a0   : > { %5036 = vmatmul.mubr.bf16.vlgmr.msra.gmra.mrb[32].mxu1 %v4795_v61 }
0x1673   : > { %v5037_v0 = vpop.f32.mrb[32].mxu1 }
0x1674   : > { %v5038_v1 = vadd.f32 %v5037_v0, %v4836_v37  ;;  %v5039_v2 = vpop.f32.mrb[33].mxu1 }
0x1675   : > { %v5040_v3 = vadd.f32 %v5039_v2, %v4840_v63  ;;  %v5041_v4 = vpop.f32.mrb[34].mxu1 }
0x1676   : > { %v5044_v5 = vadd.f32 %v5038_v1, %v7387_v58  ;;  %v5042_v6 = vpop.f32.mrb[35].mxu1 }
0x1677   : > { %v5045_v48 = vadd.f32 %v5040_v3, %v7385_v57 }
0x1678   : > { %5046 = vst [vmem:[%s298_s12] sm:$0xff] %v5044_v5 }
0x1679   : > { %5047 = vst [vmem:[%s298_s12 + $0x8] sm:$0xff] %v5045_v48 }
0x167a   : > { %6893 = shalt.err (!%p6890_p12)
}
0x167b   : > { %s6894_s22 = scalar_lea.hbm %s7407_s7, 256  ;;  %s6898_s8 = scalar_lea.hbm %s7456_s5, 512 }
0x167c   : > { %p6895_p13 = scmp.ne.s32.totalorder %s7407_s7, %s6894_s22  ;;  %p6899_p9 = scmp.lt.u32.totalorder %s7407_s7, %s7456_s5 }
0x167d   : > { %p6900_p4 = scmp.lt.u32.totalorder %s6898_s8, %s6894_s22  ;;  %p6902_p6 = scmp.lt.u32.totalorder %s6894_s22, %s7407_s7 }
0x167e   : > { %p6896_p3 = pnand %p6895_p13, %p7474_p0 }
0x167f   : > { %p6901_p8 = por %p6900_p4, %p6899_p9 }
0x1680   : > { %p6897_p7 = pneg %p6896_p3 }
0x1681   : > { %p6903_p2 = por %p6902_p6, %p6901_p8 }
0x1683   : > { %p6904_p5 = pnand %p6903_p2, %p6897_p7 }
0x1685   : > { %6907 = shalt.err (!%p6904_p5)
}
0x1686   : > { %5789 = dma.vmem_to_hbm [thread:$0]  (%p7474_p0), %s7409_s27, 256, %s7407_s7, %s5049_s24  }
0x1687 PF: > { %s5075_s25 = sand.u32 1, %s6942_s18   ;;  %p7475_p10 = scmp.ne.s32.totalorder %s7467_s14, 0 }
0x1688   : > { %p7476_p1 = scmp.ge.s32.totalorder %s6954_s21, 2  ;;  %s5076_s12 = scalar_lea.sflag [#allocation4], %s5075_s25 }
0x168a   : > { %p5809_p11 = pnand %p7476_p1, %p7475_p10 }
0x168c   : > { %6937 = dma.done.wait (!%p5809_p11), %s5076_s12, 256  }
0x168d   : > { %6939 = vsyncadd (!%p5809_p11), %s5076_s12, 4294967040  ;;  %p20_p12 = scmp.ge.s32.totalorder %s7141_s11, 4   ;;  %s7477_s18 = smov %s6946_s19 }
0x168e   : > { %s7478_s19 = smov %s6950_s20  ;;  %s7479_s20 = smov %s7152_s9 }
0x168f   : > { %s7480_s21 = smov %s7141_s11  ;;  %22 = sbr.rel (!%p20_p12) target bundleno = 7 (0x7), region = 143 }
0x1696   :  { %5081 = vsyncpa [#allocation3], 1 }
0x1697   :  { %5083 = vsyncpa [#allocation3 + $0x1], 1 }
0x1698   :  { %5084 = vsyncpa [#allocation6], 1 }
0x1699   :  { %5085 = vsyncpa [#allocation9], 1 }
0x169a   :  { %5086 = vsyncpa [#allocation4], 1 }
0x169b   :  { %5088 = vsyncpa [#allocation4 + $0x1], 1 }

</bundles_post_ra>
